<compile_context>
chip_gen: v7x
topology: tpu7x:2x2x1
jax: 0.10.0
libtpu: 0.0.40
codegen_flags: <defaults>
</compile_context>

<pallas_src>
import jax
import jax.numpy as jnp
from jax.experimental import pallas as pl
from jax.experimental.pallas import tpu as pltpu

BN_EPS = 1e-5
LANE = 128                      # lane (last-dim) padding target
TM_MAX = 1024                   # max row tile along M = B*H*W
VMEM_LIMIT = 32 * 1024 * 1024   # safe on v5e/v6e (128 MiB) and v7x (64 MiB)


def _round_up(x, m):
    return (x + m - 1) // m * m


def _pad_m(m):
    return _round_up(m, 128)


def _pick_tm(mp):
    """Largest multiple of 128 that divides mp and is <= TM_MAX."""
    best = 128
    t = 128
    while t <= min(mp, TM_MAX):
        if mp % t == 0:
            best = t
        t += 128
    return best


# ----------------------------------------------------------------------------
# Pallas kernels
# ----------------------------------------------------------------------------
def _matmul_stats_kernel(p_ref, w_ref, raw_ref, s1_ref, s2_ref):
    """Tiled matmul; bf16 raw output + per-tile fp32 sum / sum-of-squares."""
    acc = jnp.dot(p_ref[...], w_ref[...], preferred_element_type=jnp.float32)
    raw_ref[...] = acc.astype(raw_ref.dtype)
    s1_ref[...] = jnp.sum(acc, axis=0, keepdims=True)[None]
    s2_ref[...] = jnp.sum(acc * acc, axis=0, keepdims=True)[None]


def _bn_relu_kernel(raw_ref, sc_ref, sh_ref, o_ref):
    """y = relu(raw*scale + shift), bf16 out."""
    y = raw_ref[...].astype(jnp.float32) * sc_ref[...] + sh_ref[...]
    o_ref[...] = jnp.maximum(y, 0.0).astype(o_ref.dtype)


def _matmul_kernel(p_ref, w_ref, o_ref):
    """Plain matmul for the 1x1 redir convs (no BN / bias), bf16 out."""
    o_ref[...] = jnp.dot(p_ref[...], w_ref[...],
                         preferred_element_type=jnp.float32).astype(o_ref.dtype)


def _deconv_stats_kernel(p_ref, w_ref, raw_ref, s1_ref, s2_ref):
    """One polyphase of the deconv: shared patch tile x per-phase weight.

    grid = (tiles, 4 phases); patches stay VMEM-resident across the phase
    axis; BN stats accumulate across phases (phase axis is 'arbitrary')."""
    w = w_ref[...][0]                                   # (Kpad, Npad)
    acc = jnp.dot(p_ref[...], w, preferred_element_type=jnp.float32)
    raw_ref[...] = acc.astype(raw_ref.dtype)[None]

    @pl.when(pl.program_id(1) == 0)
    def _():
        s1_ref[...] = jnp.zeros_like(s1_ref)
        s2_ref[...] = jnp.zeros_like(s2_ref)

    s1_ref[...] += jnp.sum(acc, axis=0, keepdims=True)[None]
    s2_ref[...] += jnp.sum(acc * acc, axis=0, keepdims=True)[None]


def _deconv_bn_kernel(raw_ref, sc_ref, sh_ref, res_ref, o_ref):
    """y = relu(raw*scale + shift + res), bf16 out (one polyphase)."""
    raw = raw_ref[...][0].astype(jnp.float32)
    res = res_ref[...][0].astype(jnp.float32)
    y = raw * sc_ref[...] + sh_ref[...] + res
    o_ref[...] = jnp.maximum(y, 0.0).astype(o_ref.dtype)[None]


def _deconv_bn_proj_kernel(raw_ref, sc_ref, sh_ref, res_ref, wp_ref, disp_ref,
                           o_ref):
    """conv6 epilogue with the final 1x1 conv fused:
       c6 = relu(raw*scale + shift + redir1)
       out = relu(cur_disp + c6 @ w_res)          (c6 never goes to HBM)."""
    raw = raw_ref[...][0].astype(jnp.float32)
    res = res_ref[...][0].astype(jnp.float32)
    y = jnp.maximum(raw * sc_ref[...] + sh_ref[...] + res, 0.0)
    r = jnp.dot(y.astype(jnp.bfloat16), wp_ref[...],
                preferred_element_type=jnp.float32)
    o_ref[...] = jnp.maximum(disp_ref[...][0] + r, 0.0).astype(o_ref.dtype)[None]


# ----------------------------------------------------------------------------
# Pallas wrappers
# ----------------------------------------------------------------------------
def fused_matmul_stats(patches, w2d):
    """(MP,Kpad)bf16 @ (Kpad,Npad)bf16 -> raw bf16, per-tile sum/sumsq fp32."""
    MP, Kpad = patches.shape
    Npad = w2d.shape[1]
    TM = _pick_tm(MP)
    nm = MP // TM
    flops = 2 * MP * Kpad * Npad
    bytes_accessed = (MP * Kpad + Kpad * Npad + MP * Npad) * 2 + 2 * nm * Npad * 4
    return pl.pallas_call(
        _matmul_stats_kernel,
        grid=(nm,),
        in_specs=[
            pl.BlockSpec((TM, Kpad), lambda i: (i, 0)),
            pl.BlockSpec((Kpad, Npad), lambda i: (0, 0)),
        ],
        out_specs=(
            pl.BlockSpec((TM, Npad), lambda i: (i, 0)),
            pl.BlockSpec((1, 1, Npad), lambda i: (i, 0, 0)),
            pl.BlockSpec((1, 1, Npad), lambda i: (i, 0, 0)),
        ),
        out_shape=(
            jax.ShapeDtypeStruct((MP, Npad), jnp.bfloat16),
            jax.ShapeDtypeStruct((nm, 1, Npad), jnp.float32),
            jax.ShapeDtypeStruct((nm, 1, Npad), jnp.float32),
        ),
        compiler_params=pltpu.CompilerParams(
            dimension_semantics=("parallel",), vmem_limit_bytes=VMEM_LIMIT),
        cost_estimate=pl.CostEstimate(flops=flops, transcendentals=0,
                                      bytes_accessed=bytes_accessed),
    )(patches, w2d)


def bn_relu(raw, scale, shift):
    MP, Npad = raw.shape
    TM = _pick_tm(MP)
    nm = MP // TM
    return pl.pallas_call(
        _bn_relu_kernel,
        grid=(nm,),
        in_specs=[
            pl.BlockSpec((TM, Npad), lambda i: (i, 0)),
            pl.BlockSpec((1, Npad), lambda i: (0, 0)),
            pl.BlockSpec((1, Npad), lambda i: (0, 0)),
        ],
        out_specs=pl.BlockSpec((TM, Npad), lambda i: (i, 0)),
        out_shape=jax.ShapeDtypeStruct((MP, Npad), jnp.bfloat16),
        compiler_params=pltpu.CompilerParams(
            dimension_semantics=("parallel",), vmem_limit_bytes=VMEM_LIMIT),
    )(raw, scale.reshape(1, Npad), shift.reshape(1, Npad))


def matmul_1x1(x2d, w2d):
    MP, K = x2d.shape
    Npad = w2d.shape[1]
    TM = _pick_tm(MP)
    nm = MP // TM
    flops = 2 * MP * K * Npad
    bytes_accessed = (MP * K + K * Npad + MP * Npad) * 2
    return pl.pallas_call(
        _matmul_kernel,
        grid=(nm,),
        in_specs=[
            pl.BlockSpec((TM, K), lambda i: (i, 0)),
            pl.BlockSpec((K, Npad), lambda i: (0, 0)),
        ],
        out_specs=pl.BlockSpec((TM, Npad), lambda i: (i, 0)),
        out_shape=jax.ShapeDtypeStruct((MP, Npad), jnp.bfloat16),
        compiler_params=pltpu.CompilerParams(
            dimension_semantics=("parallel",), vmem_limit_bytes=VMEM_LIMIT),
        cost_estimate=pl.CostEstimate(flops=flops, transcendentals=0,
                                      bytes_accessed=bytes_accessed),
    )(x2d, w2d)


def deconv_matmul_stats(patches, w4):
    """4 polyphases in one call: grid (tiles, 4), shared patch tile."""
    MP, Kpad = patches.shape
    Npad = w4.shape[2]
    TM = _pick_tm(MP)
    nm = MP // TM
    flops = 2 * 4 * MP * Kpad * Npad
    bytes_accessed = (MP * Kpad + 4 * nm * Kpad * Npad + 4 * MP * Npad) * 2 \
        + 2 * nm * Npad * 4
    return pl.pallas_call(
        _deconv_stats_kernel,
        grid=(nm, 4),
        in_specs=[
            pl.BlockSpec((TM, Kpad), lambda i, p: (i, 0)),
            pl.BlockSpec((1, Kpad, Npad), lambda i, p: (p, 0, 0)),
        ],
        out_specs=(
            pl.BlockSpec((1, TM, Npad), lambda i, p: (p, i, 0)),
            pl.BlockSpec((1, 1, Npad), lambda i, p: (i, 0, 0)),
            pl.BlockSpec((1, 1, Npad), lambda i, p: (i, 0, 0)),
        ),
        out_shape=(
            jax.ShapeDtypeStruct((4, MP, Npad), jnp.bfloat16),
            jax.ShapeDtypeStruct((nm, 1, Npad), jnp.float32),
            jax.ShapeDtypeStruct((nm, 1, Npad), jnp.float32),
        ),
        compiler_params=pltpu.CompilerParams(
            dimension_semantics=("parallel", "arbitrary"),
            vmem_limit_bytes=VMEM_LIMIT),
        cost_estimate=pl.CostEstimate(flops=flops, transcendentals=0,
                                      bytes_accessed=bytes_accessed),
    )(patches, w4)


def deconv_bn_residual(raw4, scale, shift, res4):
    _, MP, Npad = raw4.shape
    TM = _pick_tm(MP)
    nm = MP // TM
    return pl.pallas_call(
        _deconv_bn_kernel,
        grid=(nm, 4),
        in_specs=[
            pl.BlockSpec((1, TM, Npad), lambda i, p: (p, i, 0)),
            pl.BlockSpec((1, Npad), lambda i, p: (0, 0)),
            pl.BlockSpec((1, Npad), lambda i, p: (0, 0)),
            pl.BlockSpec((1, TM, Npad), lambda i, p: (p, i, 0)),
        ],
        out_specs=pl.BlockSpec((1, TM, Npad), lambda i, p: (p, i, 0)),
        out_shape=jax.ShapeDtypeStruct((4, MP, Npad), jnp.bfloat16),
        compiler_params=pltpu.CompilerParams(
            dimension_semantics=("parallel", "parallel"),
            vmem_limit_bytes=VMEM_LIMIT),
    )(raw4, scale.reshape(1, Npad), shift.reshape(1, Npad), res4)


def deconv_bn_residual_proj(raw4, scale, shift, res4, wp, disp4):
    _, MP, Npad = raw4.shape
    Pout = wp.shape[1]
    TM = _pick_tm(MP)
    nm = MP // TM
    return pl.pallas_call(
        _deconv_bn_proj_kernel,
        grid=(nm, 4),
        in_specs=[
            pl.BlockSpec((1, TM, Npad), lambda i, p: (p, i, 0)),
            pl.BlockSpec((1, Npad), lambda i, p: (0, 0)),
            pl.BlockSpec((1, Npad), lambda i, p: (0, 0)),
            pl.BlockSpec((1, TM, Npad), lambda i, p: (p, i, 0)),
            pl.BlockSpec((Npad, Pout), lambda i, p: (0, 0)),
            pl.BlockSpec((1, TM, Pout), lambda i, p: (p, i, 0)),
        ],
        out_specs=pl.BlockSpec((1, TM, Pout), lambda i, p: (p, i, 0)),
        out_shape=jax.ShapeDtypeStruct((4, MP, Pout), jnp.float32),
        compiler_params=pltpu.CompilerParams(
            dimension_semantics=("parallel", "parallel"),
            vmem_limit_bytes=VMEM_LIMIT),
    )(raw4, scale.reshape(1, Npad), shift.reshape(1, Npad), res4, wp, disp4)


# ----------------------------------------------------------------------------
# Glue (plain JAX): im2col, padding, BN scale/shift, layer wrappers
# ----------------------------------------------------------------------------
def _im2col(x_nhwc, ksize, stride, pad):
    B, H, W, C = x_nhwc.shape
    xp = jnp.pad(x_nhwc, ((0, 0), (pad, pad), (pad, pad), (0, 0)))
    Ho = (H + 2 * pad - ksize) // stride + 1
    Wo = (W + 2 * pad - ksize) // stride + 1
    cols = []
    for kh in range(ksize):
        for kw in range(ksize):
            cols.append(xp[:,
                           kh:kh + (Ho - 1) * stride + 1:stride,
                           kw:kw + (Wo - 1) * stride + 1:stride, :])
    patches = jnp.concatenate(cols, axis=-1)   # (B,Ho,Wo,k*k*C), (kh,kw,cin)
    return patches.reshape(B * Ho * Wo, ksize * ksize * C), (B, Ho, Wo)


def _bn_scale_shift(s1, s2, count, gamma, beta, Npad):
    # TODO(synk): one-pass E[x^2]-E[x]^2 in fp32; a Welford/chunked combine
    # would be safer when activation means are large.
    Cout = gamma.shape[0]
    ssum = jnp.sum(s1.reshape(-1, Npad), axis=0)
    ssq = jnp.sum(s2.reshape(-1, Npad), axis=0)
    mean = ssum / count
    var = jnp.maximum(ssq / count - mean * mean, 0.0)
    g = jnp.pad(gamma, (0, Npad - Cout))      # padded lanes: gamma=0 -> 0 out
    b = jnp.pad(beta, (0, Npad - Cout))
    scale = g * jax.lax.rsqrt(var + BN_EPS)
    shift = b - mean * scale
    return scale.astype(jnp.float32), shift.astype(jnp.float32)


def conv_bn_relu(x_nhwc, w_oihw, gamma, beta, *, stride, pad):
    """Conv2d (no bias) + BatchNorm2d (batch stats, biased var) + ReLU."""
    Cout, Cin, kh, kw = w_oihw.shape
    K = kh * kw * Cin
    Kpad = _round_up(K, LANE)
    Npad = _round_up(Cout, LANE)
    w2d = jnp.transpose(w_oihw, (2, 3, 1, 0)).reshape(K, Cout)
    w2d = jnp.pad(w2d, ((0, Kpad - K), (0, Npad - Cout))).astype(jnp.bfloat16)
    patches, (B, Ho, Wo) = _im2col(x_nhwc.astype(jnp.bfloat16), kh, stride, pad)
    M = B * Ho * Wo
    MP = _pad_m(M)
    patches = jnp.pad(patches, ((0, MP - M), (0, Kpad - K)))
    raw, s1, s2 = fused_matmul_stats(patches, w2d)
    scale, shift = _bn_scale_shift(s1, s2, M, gamma, beta, Npad)
    out = bn_relu(raw, scale, shift)
    return out[:M, :Cout].reshape(B, Ho, Wo, Cout)


def conv1x1(x_nhwc, w_oihw):
    """1x1 Conv2d (no bias, no BN), bf16 output."""
    B, H, W, Cin = x_nhwc.shape
    Cout = w_oihw.shape[0]
    Npad = _round_up(Cout, LANE)
    M = B * H * W
    MP = _pad_m(M)
    x2d = jnp.pad(x_nhwc.astype(jnp.bfloat16).reshape(M, Cin),
                  ((0, MP - M), (0, 0)))
    w2d = jnp.pad(w_oihw.reshape(Cout, Cin).T,
                  ((0, 0), (0, Npad - Cout))).astype(jnp.bfloat16)
    out = matmul_1x1(x2d, w2d)
    return out[:M, :Cout].reshape(B, H, W, Cout)


def deconv_bn_add_relu(x_nhwc, w_iohw, gamma, beta, res_nhwc,
                       final_w=None, final_res=None):
    """ConvTranspose2d(3x3,s=2,p=1,op=1,no bias) + BN + residual add + ReLU.

    Polyphase decomposition: every output phase (p,q) only reads the 2x2
    input window xp[r:r+2, c:c+2, :], so the 4 phases share one K=4*Cin
    patch matrix and differ only in a (Kpad,Npad) weight (unused taps = 0).
    If final_w/final_res are given, the final 1x1 `res` conv, cur_disp add
    and ReLU are fused into the BN epilogue (conv6 never hits HBM).
    """
    B, H, W, Cin = x_nhwc.shape
    Cout = w_iohw.shape[1]
    Npad = _round_up(Cout, LANE)
    K = 4 * Cin
    Kpad = _round_up(K, LANE)

    xp = jnp.pad(x_nhwc.astype(jnp.bfloat16), ((0, 0), (0, 1), (0, 1), (0, 0)))
    cols = [xp[:, dih:dih + H, diw:diw + W, :]
            for dih in (0, 1) for diw in (0, 1)]
    M4 = B * H * W
    MP = _pad_m(M4)
    patches = jnp.concatenate(cols, axis=-1).reshape(M4, K)
    patches = jnp.pad(patches, ((0, MP - M4), (0, Kpad - K)))

    # output row 2r+p pulls kernel row kh from input row r+dih:
    kh_of = {0: {0: 1}, 1: {0: 2, 1: 0}}
    w_phase = []
    for p in (0, 1):
        for q in (0, 1):
            blocks = []
            for dih in (0, 1):
                for diw in (0, 1):
                    kh = kh_of[p].get(dih)
                    kw = kh_of[q].get(diw)
                    if kh is None or kw is None:
                        blocks.append(jnp.zeros((Cin, Cout), w_iohw.dtype))
                    else:
                        blocks.append(w_iohw[:, :, kh, kw])      # (Cin, Cout)
            w_phase.append(jnp.concatenate(blocks, axis=0))      # (4*Cin, Cout)
    w4 = jnp.stack(w_phase, axis=0)
    w4 = jnp.pad(w4, ((0, 0), (0, Kpad - K), (0, Npad - Cout))).astype(jnp.bfloat16)

    raw4, s1, s2 = deconv_matmul_stats(patches, w4)
    # BN stats over the full (B,2H,2W) output = all 4 phases combined.
    scale, shift = _bn_scale_shift(s1, s2, 4 * M4, gamma, beta, Npad)

    res_ph = [res_nhwc[:, p::2, q::2, :].reshape(M4, Cout)
              for p in (0, 1) for q in (0, 1)]
    res4 = jnp.stack(res_ph, axis=0).astype(jnp.bfloat16)
    res4 = jnp.pad(res4, ((0, 0), (0, MP - M4), (0, Npad - Cout)))

    if final_w is None:
        out4 = deconv_bn_residual(raw4, scale, shift, res4)
        out4 = out4[:, :M4, :Cout]
        C_last = Cout
    else:
        Cp = final_w.shape[0]                         # = 1
        Pout = _round_up(Cp, LANE)
        wp = final_w.reshape(Cp, Cout).T              # (Cout, Cp)
        wp = jnp.pad(wp, ((0, Npad - Cout), (0, Pout - Cp))).astype(jnp.bfloat16)
        disp_ph = [final_res[:, p::2, q::2, :].reshape(M4, Cp)
                   for p in (0, 1) for q in (0, 1)]
        disp4 = jnp.stack(disp_ph, axis=0).astype(jnp.float32)
        disp4 = jnp.pad(disp4, ((0, 0), (0, MP - M4), (0, Pout - Cp)))
        out4 = deconv_bn_residual_proj(raw4, scale, shift, res4, wp, disp4)
        out4 = out4[:, :M4, :Cp]
        C_last = Cp

    # reassemble phases: out[b, 2r+p, 2c+q, :] = out4[2p+q][(b,r,c), :]
    y = out4.reshape(2, 2, B, H, W, C_last)
    y = jnp.transpose(y, (2, 3, 0, 4, 1, 5)).reshape(B, 2 * H, 2 * W, C_last)
    return y


# ----------------------------------------------------------------------------
# Parameters (deterministic synthetic init)
# ----------------------------------------------------------------------------
def init_params(key, input_layers, cost_volume_disp, hidden_dim):
    h = hidden_dim
    in_cat = input_layers + h + 1
    w_specs = {
        'cvp_w': (h, cost_volume_disp, 3, 3),
        'c1_w': (2 * h, in_cat, 3, 3),
        'c2_w': (2 * h, 2 * h, 3, 3),
        'c3_w': (4 * h, 2 * h, 3, 3),
        'c4_w': (4 * h, 4 * h, 3, 3),
        'c5_w': (4 * h, 2 * h, 3, 3),   # ConvTranspose2d: (Cin, Cout, kh, kw)
        'c6_w': (2 * h, h, 3, 3),       # ConvTranspose2d: (Cin, Cout, kh, kw)
        'redir1_w': (h, in_cat, 1, 1),
        'redir2_w': (2 * h, 2 * h, 1, 1),
        'res_w': (1, h, 1, 1),
    }
    bn_specs = {'cvp': h, 'c1': 2 * h, 'c2': 2 * h, 'c3': 4 * h,
                'c4': 4 * h, 'c5': 2 * h, 'c6': h}
    keys = iter(jax.random.split(key, len(w_specs) + 2 * len(bn_specs)))
    params = {}
    for name, shp in w_specs.items():
        params[name] = 0.1 * jax.random.normal(next(keys), shp, jnp.float32)
    for name, c in bn_specs.items():
        params[name + '_g'] = 1.0 + 0.1 * jax.random.normal(next(keys), (c,), jnp.float32)
        params[name + '_b'] = 0.1 * jax.random.normal(next(keys), (c,), jnp.float32)
    return params


# ----------------------------------------------------------------------------
# Forward pass (matches PyTorch res_disparity_refinement.forward)
# ----------------------------------------------------------------------------
def res_disparity_refinement_forward(params, local_cost_volume, cur_disp, feat):
    # TODO(synk): training-mode BN running_mean/var state updates are not
    # reproduced (forward output uses batch statistics, as nn.BatchNorm2d
    # does in training mode).
    cost_volume_width = local_cost_volume.shape[-1]
    cur_disp_width = cur_disp.shape[-1]
    scale = cost_volume_width // cur_disp_width
    if scale != 1:
        # Glue: bilinear upsample (align_corners=False semantics) in JAX.
        Nb, Cd, Hd, Wd = cur_disp.shape
        cur_disp = jax.image.resize(
            cur_disp, (Nb, Cd, Hd * scale, Wd * scale), method='bilinear') * scale

    # NCHW -> NHWC (internal layout); activations stream as bf16.
    lcv = jnp.transpose(local_cost_volume, (0, 2, 3, 1)).astype(jnp.bfloat16)
    feat_h = jnp.transpose(feat, (0, 2, 3, 1)).astype(jnp.bfloat16)
    disp_h = jnp.transpose(cur_disp, (0, 2, 3, 1)).astype(jnp.float32)

    agg = conv_bn_relu(lcv, params['cvp_w'], params['cvp_g'], params['cvp_b'],
                       stride=1, pad=1)
    cat = jnp.concatenate([agg, feat_h, disp_h.astype(jnp.bfloat16)], axis=-1)

    c1 = conv_bn_relu(cat, params['c1_w'], params['c1_g'], params['c1_b'],
                      stride=2, pad=1)
    c2 = conv_bn_relu(c1, params['c2_w'], params['c2_g'], params['c2_b'],
                      stride=1, pad=1)
    c3 = conv_bn_relu(c2, params['c3_w'], params['c3_g'], params['c3_b'],
                      stride=2, pad=1)
    c4 = conv_bn_relu(c3, params['c4_w'], params['c4_g'], params['c4_b'],
                      stride=1, pad=1)

    # conv5 = relu(BN(deconv(c4)) + redir2(c2))  — add+relu fused in pass 2
    r2 = conv1x1(c2, params['redir2_w'])
    c5 = deconv_bn_add_relu(c4, params['c5_w'], params['c5_g'], params['c5_b'], r2)

    # conv6 = relu(BN(deconv(c5)) + redir1(cat)); res = res_w(conv6);
    # out = relu(cur_disp + res) — res conv + add + relu fused into pass 2.
    r1 = conv1x1(cat, params['redir1_w'])
    out = deconv_bn_add_relu(c5, params['c6_w'], params['c6_g'], params['c6_b'],
                             r1, final_w=params['res_w'], final_res=disp_h)
    return jnp.transpose(out, (0, 3, 1, 2)).astype(jnp.float32)   # NCHW


# ----------------------------------------------------------------------------
if __name__ == "__main__":
    key = jax.random.PRNGKey(0)
    B, H, W = 2, 16, 16
    input_layers, cost_volume_disp, hidden_dim = 8, 8, 16

    k1, k2, k3, kp = jax.random.split(key, 4)
    local_cost_volume = jax.random.normal(k1, (B, cost_volume_disp, H, W), jnp.float32)
    cur_disp = jax.nn.relu(jax.random.normal(k2, (B, 1, H, W), jnp.float32))
    feat = jax.random.normal(k3, (B, input_layers, H, W), jnp.float32)

    params = init_params(kp, input_layers, cost_volume_disp, hidden_dim)

    fwd = jax.jit(res_disparity_refinement_forward)
    out = fwd(params, local_cost_volume, cur_disp, feat)
    jax.block_until_ready(out)
    assert out.shape == (B, 1, H, W)
    print("KERNEL_OK")
</pallas_src>

<mosaic_0001>
module attributes {stable_mosaic.version = 11 : i64} {
  func.func @_matmul_stats_kernel(%arg0: i32, %arg1: memref<512x128xbf16, #tpu.memory_space<vmem>>, %arg2: memref<128x128xbf16, #tpu.memory_space<vmem>>, %arg3: memref<512x128xbf16, #tpu.memory_space<vmem>>, %arg4: memref<1x1x128xf32, #tpu.memory_space<vmem>>, %arg5: memref<1x1x128xf32, #tpu.memory_space<vmem>>) attributes {dimension_semantics = [#tpu.dimension_semantics<parallel>], iteration_bounds = array<i64: 1>, scalar_prefetch = 0 : i64, scratch_operands = 0 : i64, tpu.core_type = #tpu.core_type<tc>, window_params = [{transform_indices = @transform_0, window_bounds = array<i64: 512, 128>}, {pipeline_mode = #tpu.pipeline_mode<synchronous>, transform_indices = @transform_1, window_bounds = array<i64: 128, 128>}, {transform_indices = @transform_2, window_bounds = array<i64: 512, 128>}, {transform_indices = @transform_3, window_bounds = array<i64: 1, 1, 128>}, {transform_indices = @transform_4, window_bounds = array<i64: 1, 1, 128>}]} {
    %c0 = arith.constant 0 : index
    %c0_0 = arith.constant 0 : index
    %0 = vector.load %arg1[%c0, %c0_0] : memref<512x128xbf16, #tpu.memory_space<vmem>>, vector<512x128xbf16>
    %c0_1 = arith.constant 0 : index
    %c0_2 = arith.constant 0 : index
    %1 = vector.load %arg2[%c0_1, %c0_2] : memref<128x128xbf16, #tpu.memory_space<vmem>>, vector<128x128xbf16>
    %cst = arith.constant dense<0.000000e+00> : vector<512x128xf32>
    %2 = tpu.matmul %0, %1, %cst {dimension_numbers = #tpu.dot_dimension_numbers<[1], [0], [0], [1], [0, 0, 1, 1], [], []>} : vector<512x128xbf16>, vector<128x128xbf16>, vector<512x128xf32> -> vector<512x128xf32>
    %3 = arith.truncf %2 : vector<512x128xf32> to vector<512x128xbf16>
    %c0_3 = arith.constant 0 : index
    %c0_4 = arith.constant 0 : index
    %4 = vector.load %arg3[%c0_3, %c0_4] : memref<512x128xbf16, #tpu.memory_space<vmem>>, vector<512x128xbf16>
    tpu.vector_store %arg3[%c0_3, %c0_4], %3 {strides = array<i32>} : memref<512x128xbf16, #tpu.memory_space<vmem>>, vector<512x128xbf16>,
    %cst_5 = arith.constant dense<0.000000e+00> : vector<128xf32>
    %5 = vector.multi_reduction <add>, %2, %cst_5 [0] : vector<512x128xf32> to vector<128xf32>
    %6 = vector.shape_cast %5 : vector<128xf32> to vector<1x128xf32>
    %7 = vector.shape_cast %6 : vector<1x128xf32> to vector<1x1x128xf32>
    %c0_6 = arith.constant 0 : index
    %c0_7 = arith.constant 0 : index
    %c0_8 = arith.constant 0 : index
    %8 = vector.load %arg4[%c0_6, %c0_7, %c0_8] : memref<1x1x128xf32, #tpu.memory_space<vmem>>, vector<1x1x128xf32>
    tpu.vector_store %arg4[%c0_6, %c0_7, %c0_8], %7 {strides = array<i32>} : memref<1x1x128xf32, #tpu.memory_space<vmem>>, vector<1x1x128xf32>,
    %9 = arith.mulf %2, %2 : vector<512x128xf32>
    %cst_9 = arith.constant dense<0.000000e+00> : vector<128xf32>
    %10 = vector.multi_reduction <add>, %9, %cst_9 [0] : vector<512x128xf32> to vector<128xf32>
    %11 = vector.shape_cast %10 : vector<128xf32> to vector<1x128xf32>
    %12 = vector.shape_cast %11 : vector<1x128xf32> to vector<1x1x128xf32>
    %c0_10 = arith.constant 0 : index
    %c0_11 = arith.constant 0 : index
    %c0_12 = arith.constant 0 : index
    %13 = vector.load %arg5[%c0_10, %c0_11, %c0_12] : memref<1x1x128xf32, #tpu.memory_space<vmem>>, vector<1x1x128xf32>
    tpu.vector_store %arg5[%c0_10, %c0_11, %c0_12], %12 {strides = array<i32>} : memref<1x1x128xf32, #tpu.memory_space<vmem>>, vector<1x1x128xf32>,
    return
  }
  func.func @transform_0(%arg0: i32) -> (i32, i32) {
    %c0_i32 = arith.constant 0 : i32
    %c0_i32_0 = arith.constant 0 : i32
    return %arg0, %c0_i32 : i32, i32
  }
  func.func @transform_1(%arg0: i32) -> (i32, i32) {
    %c0_i32 = arith.constant 0 : i32
    %c0_i32_0 = arith.constant 0 : i32
    %c0_i32_1 = arith.constant 0 : i32
    return %c0_i32, %c0_i32_0 : i32, i32
  }
  func.func @transform_2(%arg0: i32) -> (i32, i32) {
    %c0_i32 = arith.constant 0 : i32
    %c0_i32_0 = arith.constant 0 : i32
    return %arg0, %c0_i32 : i32, i32
  }
  func.func @transform_3(%arg0: i32) -> (i32, i32, i32) {
    %c0_i32 = arith.constant 0 : i32
    %c0_i32_0 = arith.constant 0 : i32
    %c0_i32_1 = arith.constant 0 : i32
    return %arg0, %c0_i32, %c0_i32_0 : i32, i32, i32
  }
  func.func @transform_4(%arg0: i32) -> (i32, i32, i32) {
    %c0_i32 = arith.constant 0 : i32
    %c0_i32_0 = arith.constant 0 : i32
    %c0_i32_1 = arith.constant 0 : i32
    return %arg0, %c0_i32, %c0_i32_0 : i32, i32, i32
  }
}

module attributes {stable_mosaic.version = 11 : i64} {
  func.func @_bn_relu_kernel(%arg0: i32, %arg1: memref<512x128xbf16, #tpu.memory_space<vmem>>, %arg2: memref<1x128xf32, #tpu.memory_space<vmem>>, %arg3: memref<1x128xf32, #tpu.memory_space<vmem>>, %arg4: memref<512x128xbf16, #tpu.memory_space<vmem>>) attributes {dimension_semantics = [#tpu.dimension_semantics<parallel>], iteration_bounds = array<i64: 1>, scalar_prefetch = 0 : i64, scratch_operands = 0 : i64, tpu.core_type = #tpu.core_type<tc>, window_params = [{transform_indices = @transform_0, window_bounds = array<i64: 512, 128>}, {pipeline_mode = #tpu.pipeline_mode<synchronous>, transform_indices = @transform_1, window_bounds = array<i64: 1, 128>}, {pipeline_mode = #tpu.pipeline_mode<synchronous>, transform_indices = @transform_2, window_bounds = array<i64: 1, 128>}, {transform_indices = @transform_3, window_bounds = array<i64: 512, 128>}]} {
    %c0 = arith.constant 0 : index
    %c0_0 = arith.constant 0 : index
    %0 = vector.load %arg1[%c0, %c0_0] : memref<512x128xbf16, #tpu.memory_space<vmem>>, vector<512x128xbf16>
    %1 = arith.extf %0 : vector<512x128xbf16> to vector<512x128xf32>
    %c0_1 = arith.constant 0 : index
    %c0_2 = arith.constant 0 : index
    %2 = vector.load %arg2[%c0_1, %c0_2] : memref<1x128xf32, #tpu.memory_space<vmem>>, vector<1x128xf32>
    %3 = vector.broadcast %2 : vector<1x128xf32> to vector<512x128xf32>
    %4 = arith.mulf %1, %3 : vector<512x128xf32>
    %c0_3 = arith.constant 0 : index
    %c0_4 = arith.constant 0 : index
    %5 = vector.load %arg3[%c0_3, %c0_4] : memref<1x128xf32, #tpu.memory_space<vmem>>, vector<1x128xf32>
    %6 = vector.broadcast %5 : vector<1x128xf32> to vector<512x128xf32>
    %7 = arith.addf %4, %6 : vector<512x128xf32>
    %cst = arith.constant 0.000000e+00 : f32
    %8 = vector.broadcast %cst : f32 to vector<512x128xf32>
    %9 = arith.maximumf %7, %8 : vector<512x128xf32>
    %10 = arith.truncf %9 : vector<512x128xf32> to vector<512x128xbf16>
    %c0_5 = arith.constant 0 : index
    %c0_6 = arith.constant 0 : index
    %11 = vector.load %arg4[%c0_5, %c0_6] : memref<512x128xbf16, #tpu.memory_space<vmem>>, vector<512x128xbf16>
    tpu.vector_store %arg4[%c0_5, %c0_6], %10 {strides = array<i32>} : memref<512x128xbf16, #tpu.memory_space<vmem>>, vector<512x128xbf16>,
    return
  }
  func.func @transform_0(%arg0: i32) -> (i32, i32) {
    %c0_i32 = arith.constant 0 : i32
    %c0_i32_0 = arith.constant 0 : i32
    return %arg0, %c0_i32 : i32, i32
  }
  func.func @transform_1(%arg0: i32) -> (i32, i32) {
    %c0_i32 = arith.constant 0 : i32
    %c0_i32_0 = arith.constant 0 : i32
    %c0_i32_1 = arith.constant 0 : i32
    return %c0_i32, %c0_i32_0 : i32, i32
  }
  func.func @transform_2(%arg0: i32) -> (i32, i32) {
    %c0_i32 = arith.constant 0 : i32
    %c0_i32_0 = arith.constant 0 : i32
    %c0_i32_1 = arith.constant 0 : i32
    return %c0_i32, %c0_i32_0 : i32, i32
  }
  func.func @transform_3(%arg0: i32) -> (i32, i32) {
    %c0_i32 = arith.constant 0 : i32
    %c0_i32_0 = arith.constant 0 : i32
    return %arg0, %c0_i32 : i32, i32
  }
}

module attributes {stable_mosaic.version = 11 : i64} {
  func.func @_matmul_kernel(%arg0: i32, %arg1: memref<512x25xbf16, #tpu.memory_space<vmem>>, %arg2: memref<25x128xbf16, #tpu.memory_space<vmem>>, %arg3: memref<512x128xbf16, #tpu.memory_space<vmem>>) attributes {dimension_semantics = [#tpu.dimension_semantics<parallel>], iteration_bounds = array<i64: 1>, scalar_prefetch = 0 : i64, scratch_operands = 0 : i64, tpu.core_type = #tpu.core_type<tc>, window_params = [{transform_indices = @transform_0, window_bounds = array<i64: 512, 25>}, {pipeline_mode = #tpu.pipeline_mode<synchronous>, transform_indices = @transform_1, window_bounds = array<i64: 25, 128>}, {transform_indices = @transform_2, window_bounds = array<i64: 512, 128>}]} {
    %c0 = arith.constant 0 : index
    %c0_0 = arith.constant 0 : index
    %0 = vector.load %arg1[%c0, %c0_0] : memref<512x25xbf16, #tpu.memory_space<vmem>>, vector<512x25xbf16>
    %c0_1 = arith.constant 0 : index
    %c0_2 = arith.constant 0 : index
    %1 = vector.load %arg2[%c0_1, %c0_2] : memref<25x128xbf16, #tpu.memory_space<vmem>>, vector<25x128xbf16>
    %cst = arith.constant dense<0.000000e+00> : vector<512x128xf32>
    %2 = tpu.matmul %0, %1, %cst {dimension_numbers = #tpu.dot_dimension_numbers<[1], [0], [0], [1], [0, 0, 1, 1], [], []>} : vector<512x25xbf16>, vector<25x128xbf16>, vector<512x128xf32> -> vector<512x128xf32>
    %3 = arith.truncf %2 : vector<512x128xf32> to vector<512x128xbf16>
    %c0_3 = arith.constant 0 : index
    %c0_4 = arith.constant 0 : index
    %4 = vector.load %arg3[%c0_3, %c0_4] : memref<512x128xbf16, #tpu.memory_space<vmem>>, vector<512x128xbf16>
    tpu.vector_store %arg3[%c0_3, %c0_4], %3 {strides = array<i32>} : memref<512x128xbf16, #tpu.memory_space<vmem>>, vector<512x128xbf16>,
    return
  }
  func.func @transform_0(%arg0: i32) -> (i32, i32) {
    %c0_i32 = arith.constant 0 : i32
    %c0_i32_0 = arith.constant 0 : i32
    return %arg0, %c0_i32 : i32, i32
  }
  func.func @transform_1(%arg0: i32) -> (i32, i32) {
    %c0_i32 = arith.constant 0 : i32
    %c0_i32_0 = arith.constant 0 : i32
    %c0_i32_1 = arith.constant 0 : i32
    return %c0_i32, %c0_i32_0 : i32, i32
  }
  func.func @transform_2(%arg0: i32) -> (i32, i32) {
    %c0_i32 = arith.constant 0 : i32
    %c0_i32_0 = arith.constant 0 : i32
    return %arg0, %c0_i32 : i32, i32
  }
}

module attributes {stable_mosaic.version = 11 : i64} {
  func.func @_matmul_stats_kernel(%arg0: i32, %arg1: memref<128x256xbf16, #tpu.memory_space<vmem>>, %arg2: memref<256x128xbf16, #tpu.memory_space<vmem>>, %arg3: memref<128x128xbf16, #tpu.memory_space<vmem>>, %arg4: memref<1x1x128xf32, #tpu.memory_space<vmem>>, %arg5: memref<1x1x128xf32, #tpu.memory_space<vmem>>) attributes {dimension_semantics = [#tpu.dimension_semantics<parallel>], iteration_bounds = array<i64: 1>, scalar_prefetch = 0 : i64, scratch_operands = 0 : i64, tpu.core_type = #tpu.core_type<tc>, window_params = [{transform_indices = @transform_0, window_bounds = array<i64: 128, 256>}, {pipeline_mode = #tpu.pipeline_mode<synchronous>, transform_indices = @transform_1, window_bounds = array<i64: 256, 128>}, {transform_indices = @transform_2, window_bounds = array<i64: 128, 128>}, {transform_indices = @transform_3, window_bounds = array<i64: 1, 1, 128>}, {transform_indices = @transform_4, window_bounds = array<i64: 1, 1, 128>}]} {
    %c0 = arith.constant 0 : index
    %c0_0 = arith.constant 0 : index
    %0 = vector.load %arg1[%c0, %c0_0] : memref<128x256xbf16, #tpu.memory_space<vmem>>, vector<128x256xbf16>
    %c0_1 = arith.constant 0 : index
    %c0_2 = arith.constant 0 : index
    %1 = vector.load %arg2[%c0_1, %c0_2] : memref<256x128xbf16, #tpu.memory_space<vmem>>, vector<256x128xbf16>
    %cst = arith.constant dense<0.000000e+00> : vector<128x128xf32>
    %2 = tpu.matmul %0, %1, %cst {dimension_numbers = #tpu.dot_dimension_numbers<[1], [0], [0], [1], [0, 0, 1, 1], [], []>} : vector<128x256xbf16>, vector<256x128xbf16>, vector<128x128xf32> -> vector<128x128xf32>
    %3 = arith.truncf %2 : vector<128x128xf32> to vector<128x128xbf16>
    %c0_3 = arith.constant 0 : index
    %c0_4 = arith.constant 0 : index
    %4 = vector.load %arg3[%c0_3, %c0_4] : memref<128x128xbf16, #tpu.memory_space<vmem>>, vector<128x128xbf16>
    tpu.vector_store %arg3[%c0_3, %c0_4], %3 {strides = array<i32>} : memref<128x128xbf16, #tpu.memory_space<vmem>>, vector<128x128xbf16>,
    %cst_5 = arith.constant dense<0.000000e+00> : vector<128xf32>
    %5 = vector.multi_reduction <add>, %2, %cst_5 [0] : vector<128x128xf32> to vector<128xf32>
    %6 = vector.shape_cast %5 : vector<128xf32> to vector<1x128xf32>
    %7 = vector.shape_cast %6 : vector<1x128xf32> to vector<1x1x128xf32>
    %c0_6 = arith.constant 0 : index
    %c0_7 = arith.constant 0 : index
    %c0_8 = arith.constant 0 : index
    %8 = vector.load %arg4[%c0_6, %c0_7, %c0_8] : memref<1x1x128xf32, #tpu.memory_space<vmem>>, vector<1x1x128xf32>
    tpu.vector_store %arg4[%c0_6, %c0_7, %c0_8], %7 {strides = array<i32>} : memref<1x1x128xf32, #tpu.memory_space<vmem>>, vector<1x1x128xf32>,
    %9 = arith.mulf %2, %2 : vector<128x128xf32>
    %cst_9 = arith.constant dense<0.000000e+00> : vector<128xf32>
    %10 = vector.multi_reduction <add>, %9, %cst_9 [0] : vector<128x128xf32> to vector<128xf32>
    %11 = vector.shape_cast %10 : vector<128xf32> to vector<1x128xf32>
    %12 = vector.shape_cast %11 : vector<1x128xf32> to vector<1x1x128xf32>
    %c0_10 = arith.constant 0 : index
    %c0_11 = arith.constant 0 : index
    %c0_12 = arith.constant 0 : index
    %13 = vector.load %arg5[%c0_10, %c0_11, %c0_12] : memref<1x1x128xf32, #tpu.memory_space<vmem>>, vector<1x1x128xf32>
    tpu.vector_store %arg5[%c0_10, %c0_11, %c0_12], %12 {strides = array<i32>} : memref<1x1x128xf32, #tpu.memory_space<vmem>>, vector<1x1x128xf32>,
    return
  }
  func.func @transform_0(%arg0: i32) -> (i32, i32) {
    %c0_i32 = arith.constant 0 : i32
    %c0_i32_0 = arith.constant 0 : i32
    return %arg0, %c0_i32 : i32, i32
  }
  func.func @transform_1(%arg0: i32) -> (i32, i32) {
    %c0_i32 = arith.constant 0 : i32
    %c0_i32_0 = arith.constant 0 : i32
    %c0_i32_1 = arith.constant 0 : i32
    return %c0_i32, %c0_i32_0 : i32, i32
  }
  func.func @transform_2(%arg0: i32) -> (i32, i32) {
    %c0_i32 = arith.constant 0 : i32
    %c0_i32_0 = arith.constant 0 : i32
    return %arg0, %c0_i32 : i32, i32
  }
  func.func @transform_3(%arg0: i32) -> (i32, i32, i32) {
    %c0_i32 = arith.constant 0 : i32
    %c0_i32_0 = arith.constant 0 : i32
    %c0_i32_1 = arith.constant 0 : i32
    return %arg0, %c0_i32, %c0_i32_0 : i32, i32, i32
  }
  func.func @transform_4(%arg0: i32) -> (i32, i32, i32) {
    %c0_i32 = arith.constant 0 : i32
    %c0_i32_0 = arith.constant 0 : i32
    %c0_i32_1 = arith.constant 0 : i32
    return %arg0, %c0_i32, %c0_i32_0 : i32, i32, i32
  }
}

module attributes {stable_mosaic.version = 11 : i64} {
  func.func @_bn_relu_kernel(%arg0: i32, %arg1: memref<128x128xbf16, #tpu.memory_space<vmem>>, %arg2: memref<1x128xf32, #tpu.memory_space<vmem>>, %arg3: memref<1x128xf32, #tpu.memory_space<vmem>>, %arg4: memref<128x128xbf16, #tpu.memory_space<vmem>>) attributes {dimension_semantics = [#tpu.dimension_semantics<parallel>], iteration_bounds = array<i64: 1>, scalar_prefetch = 0 : i64, scratch_operands = 0 : i64, tpu.core_type = #tpu.core_type<tc>, window_params = [{transform_indices = @transform_0, window_bounds = array<i64: 128, 128>}, {pipeline_mode = #tpu.pipeline_mode<synchronous>, transform_indices = @transform_1, window_bounds = array<i64: 1, 128>}, {pipeline_mode = #tpu.pipeline_mode<synchronous>, transform_indices = @transform_2, window_bounds = array<i64: 1, 128>}, {transform_indices = @transform_3, window_bounds = array<i64: 128, 128>}]} {
    %c0 = arith.constant 0 : index
    %c0_0 = arith.constant 0 : index
    %0 = vector.load %arg1[%c0, %c0_0] : memref<128x128xbf16, #tpu.memory_space<vmem>>, vector<128x128xbf16>
    %1 = arith.extf %0 : vector<128x128xbf16> to vector<128x128xf32>
    %c0_1 = arith.constant 0 : index
    %c0_2 = arith.constant 0 : index
    %2 = vector.load %arg2[%c0_1, %c0_2] : memref<1x128xf32, #tpu.memory_space<vmem>>, vector<1x128xf32>
    %3 = vector.broadcast %2 : vector<1x128xf32> to vector<128x128xf32>
    %4 = arith.mulf %1, %3 : vector<128x128xf32>
    %c0_3 = arith.constant 0 : index
    %c0_4 = arith.constant 0 : index
    %5 = vector.load %arg3[%c0_3, %c0_4] : memref<1x128xf32, #tpu.memory_space<vmem>>, vector<1x128xf32>
    %6 = vector.broadcast %5 : vector<1x128xf32> to vector<128x128xf32>
    %7 = arith.addf %4, %6 : vector<128x128xf32>
    %cst = arith.constant 0.000000e+00 : f32
    %8 = vector.broadcast %cst : f32 to vector<128x128xf32>
    %9 = arith.maximumf %7, %8 : vector<128x128xf32>
    %10 = arith.truncf %9 : vector<128x128xf32> to vector<128x128xbf16>
    %c0_5 = arith.constant 0 : index
    %c0_6 = arith.constant 0 : index
    %11 = vector.load %arg4[%c0_5, %c0_6] : memref<128x128xbf16, #tpu.memory_space<vmem>>, vector<128x128xbf16>
    tpu.vector_store %arg4[%c0_5, %c0_6], %10 {strides = array<i32>} : memref<128x128xbf16, #tpu.memory_space<vmem>>, vector<128x128xbf16>,
    return
  }
  func.func @transform_0(%arg0: i32) -> (i32, i32) {
    %c0_i32 = arith.constant 0 : i32
    %c0_i32_0 = arith.constant 0 : i32
    return %arg0, %c0_i32 : i32, i32
  }
  func.func @transform_1(%arg0: i32) -> (i32, i32) {
    %c0_i32 = arith.constant 0 : i32
    %c0_i32_0 = arith.constant 0 : i32
    %c0_i32_1 = arith.constant 0 : i32
    return %c0_i32, %c0_i32_0 : i32, i32
  }
  func.func @transform_2(%arg0: i32) -> (i32, i32) {
    %c0_i32 = arith.constant 0 : i32
    %c0_i32_0 = arith.constant 0 : i32
    %c0_i32_1 = arith.constant 0 : i32
    return %c0_i32, %c0_i32_0 : i32, i32
  }
  func.func @transform_3(%arg0: i32) -> (i32, i32) {
    %c0_i32 = arith.constant 0 : i32
    %c0_i32_0 = arith.constant 0 : i32
    return %arg0, %c0_i32 : i32, i32
  }
}

module attributes {stable_mosaic.version = 11 : i64} {
  func.func @_matmul_stats_kernel(%arg0: i32, %arg1: memref<128x384xbf16, #tpu.memory_space<vmem>>, %arg2: memref<384x128xbf16, #tpu.memory_space<vmem>>, %arg3: memref<128x128xbf16, #tpu.memory_space<vmem>>, %arg4: memref<1x1x128xf32, #tpu.memory_space<vmem>>, %arg5: memref<1x1x128xf32, #tpu.memory_space<vmem>>) attributes {dimension_semantics = [#tpu.dimension_semantics<parallel>], iteration_bounds = array<i64: 1>, scalar_prefetch = 0 : i64, scratch_operands = 0 : i64, tpu.core_type = #tpu.core_type<tc>, window_params = [{transform_indices = @transform_0, window_bounds = array<i64: 128, 384>}, {pipeline_mode = #tpu.pipeline_mode<synchronous>, transform_indices = @transform_1, window_bounds = array<i64: 384, 128>}, {transform_indices = @transform_2, window_bounds = array<i64: 128, 128>}, {transform_indices = @transform_3, window_bounds = array<i64: 1, 1, 128>}, {transform_indices = @transform_4, window_bounds = array<i64: 1, 1, 128>}]} {
    %c0 = arith.constant 0 : index
    %c0_0 = arith.constant 0 : index
    %0 = vector.load %arg1[%c0, %c0_0] : memref<128x384xbf16, #tpu.memory_space<vmem>>, vector<128x384xbf16>
    %c0_1 = arith.constant 0 : index
    %c0_2 = arith.constant 0 : index
    %1 = vector.load %arg2[%c0_1, %c0_2] : memref<384x128xbf16, #tpu.memory_space<vmem>>, vector<384x128xbf16>
    %cst = arith.constant dense<0.000000e+00> : vector<128x128xf32>
    %2 = tpu.matmul %0, %1, %cst {dimension_numbers = #tpu.dot_dimension_numbers<[1], [0], [0], [1], [0, 0, 1, 1], [], []>} : vector<128x384xbf16>, vector<384x128xbf16>, vector<128x128xf32> -> vector<128x128xf32>
    %3 = arith.truncf %2 : vector<128x128xf32> to vector<128x128xbf16>
    %c0_3 = arith.constant 0 : index
    %c0_4 = arith.constant 0 : index
    %4 = vector.load %arg3[%c0_3, %c0_4] : memref<128x128xbf16, #tpu.memory_space<vmem>>, vector<128x128xbf16>
    tpu.vector_store %arg3[%c0_3, %c0_4], %3 {strides = array<i32>} : memref<128x128xbf16, #tpu.memory_space<vmem>>, vector<128x128xbf16>,
    %cst_5 = arith.constant dense<0.000000e+00> : vector<128xf32>
    %5 = vector.multi_reduction <add>, %2, %cst_5 [0] : vector<128x128xf32> to vector<128xf32>
    %6 = vector.shape_cast %5 : vector<128xf32> to vector<1x128xf32>
    %7 = vector.shape_cast %6 : vector<1x128xf32> to vector<1x1x128xf32>
    %c0_6 = arith.constant 0 : index
    %c0_7 = arith.constant 0 : index
    %c0_8 = arith.constant 0 : index
    %8 = vector.load %arg4[%c0_6, %c0_7, %c0_8] : memref<1x1x128xf32, #tpu.memory_space<vmem>>, vector<1x1x128xf32>
    tpu.vector_store %arg4[%c0_6, %c0_7, %c0_8], %7 {strides = array<i32>} : memref<1x1x128xf32, #tpu.memory_space<vmem>>, vector<1x1x128xf32>,
    %9 = arith.mulf %2, %2 : vector<128x128xf32>
    %cst_9 = arith.constant dense<0.000000e+00> : vector<128xf32>
    %10 = vector.multi_reduction <add>, %9, %cst_9 [0] : vector<128x128xf32> to vector<128xf32>
    %11 = vector.shape_cast %10 : vector<128xf32> to vector<1x128xf32>
    %12 = vector.shape_cast %11 : vector<1x128xf32> to vector<1x1x128xf32>
    %c0_10 = arith.constant 0 : index
    %c0_11 = arith.constant 0 : index
    %c0_12 = arith.constant 0 : index
    %13 = vector.load %arg5[%c0_10, %c0_11, %c0_12] : memref<1x1x128xf32, #tpu.memory_space<vmem>>, vector<1x1x128xf32>
    tpu.vector_store %arg5[%c0_10, %c0_11, %c0_12], %12 {strides = array<i32>} : memref<1x1x128xf32, #tpu.memory_space<vmem>>, vector<1x1x128xf32>,
    return
  }
  func.func @transform_0(%arg0: i32) -> (i32, i32) {
    %c0_i32 = arith.constant 0 : i32
    %c0_i32_0 = arith.constant 0 : i32
    return %arg0, %c0_i32 : i32, i32
  }
  func.func @transform_1(%arg0: i32) -> (i32, i32) {
    %c0_i32 = arith.constant 0 : i32
    %c0_i32_0 = arith.constant 0 : i32
    %c0_i32_1 = arith.constant 0 : i32
    return %c0_i32, %c0_i32_0 : i32, i32
  }
  func.func @transform_2(%arg0: i32) -> (i32, i32) {
    %c0_i32 = arith.constant 0 : i32
    %c0_i32_0 = arith.constant 0 : i32
    return %arg0, %c0_i32 : i32, i32
  }
  func.func @transform_3(%arg0: i32) -> (i32, i32, i32) {
    %c0_i32 = arith.constant 0 : i32
    %c0_i32_0 = arith.constant 0 : i32
    %c0_i32_1 = arith.constant 0 : i32
    return %arg0, %c0_i32, %c0_i32_0 : i32, i32, i32
  }
  func.func @transform_4(%arg0: i32) -> (i32, i32, i32) {
    %c0_i32 = arith.constant 0 : i32
    %c0_i32_0 = arith.constant 0 : i32
    %c0_i32_1 = arith.constant 0 : i32
    return %arg0, %c0_i32, %c0_i32_0 : i32, i32, i32
  }
}

module attributes {stable_mosaic.version = 11 : i64} {
  func.func @_matmul_kernel(%arg0: i32, %arg1: memref<128x32xbf16, #tpu.memory_space<vmem>>, %arg2: memref<32x128xbf16, #tpu.memory_space<vmem>>, %arg3: memref<128x128xbf16, #tpu.memory_space<vmem>>) attributes {dimension_semantics = [#tpu.dimension_semantics<parallel>], iteration_bounds = array<i64: 1>, scalar_prefetch = 0 : i64, scratch_operands = 0 : i64, tpu.core_type = #tpu.core_type<tc>, window_params = [{transform_indices = @transform_0, window_bounds = array<i64: 128, 32>}, {pipeline_mode = #tpu.pipeline_mode<synchronous>, transform_indices = @transform_1, window_bounds = array<i64: 32, 128>}, {transform_indices = @transform_2, window_bounds = array<i64: 128, 128>}]} {
    %c0 = arith.constant 0 : index
    %c0_0 = arith.constant 0 : index
    %0 = vector.load %arg1[%c0, %c0_0] : memref<128x32xbf16, #tpu.memory_space<vmem>>, vector<128x32xbf16>
    %c0_1 = arith.constant 0 : index
    %c0_2 = arith.constant 0 : index
    %1 = vector.load %arg2[%c0_1, %c0_2] : memref<32x128xbf16, #tpu.memory_space<vmem>>, vector<32x128xbf16>
    %cst = arith.constant dense<0.000000e+00> : vector<128x128xf32>
    %2 = tpu.matmul %0, %1, %cst {dimension_numbers = #tpu.dot_dimension_numbers<[1], [0], [0], [1], [0, 0, 1, 1], [], []>} : vector<128x32xbf16>, vector<32x128xbf16>, vector<128x128xf32> -> vector<128x128xf32>
    %3 = arith.truncf %2 : vector<128x128xf32> to vector<128x128xbf16>
    %c0_3 = arith.constant 0 : index
    %c0_4 = arith.constant 0 : index
    %4 = vector.load %arg3[%c0_3, %c0_4] : memref<128x128xbf16, #tpu.memory_space<vmem>>, vector<128x128xbf16>
    tpu.vector_store %arg3[%c0_3, %c0_4], %3 {strides = array<i32>} : memref<128x128xbf16, #tpu.memory_space<vmem>>, vector<128x128xbf16>,
    return
  }
  func.func @transform_0(%arg0: i32) -> (i32, i32) {
    %c0_i32 = arith.constant 0 : i32
    %c0_i32_0 = arith.constant 0 : i32
    return %arg0, %c0_i32 : i32, i32
  }
  func.func @transform_1(%arg0: i32) -> (i32, i32) {
    %c0_i32 = arith.constant 0 : i32
    %c0_i32_0 = arith.constant 0 : i32
    %c0_i32_1 = arith.constant 0 : i32
    return %c0_i32, %c0_i32_0 : i32, i32
  }
  func.func @transform_2(%arg0: i32) -> (i32, i32) {
    %c0_i32 = arith.constant 0 : i32
    %c0_i32_0 = arith.constant 0 : i32
    return %arg0, %c0_i32 : i32, i32
  }
}

module attributes {stable_mosaic.version = 11 : i64} {
  func.func @_matmul_stats_kernel(%arg0: i32, %arg1: memref<128x640xbf16, #tpu.memory_space<vmem>>, %arg2: memref<640x128xbf16, #tpu.memory_space<vmem>>, %arg3: memref<128x128xbf16, #tpu.memory_space<vmem>>, %arg4: memref<1x1x128xf32, #tpu.memory_space<vmem>>, %arg5: memref<1x1x128xf32, #tpu.memory_space<vmem>>) attributes {dimension_semantics = [#tpu.dimension_semantics<parallel>], iteration_bounds = array<i64: 1>, scalar_prefetch = 0 : i64, scratch_operands = 0 : i64, tpu.core_type = #tpu.core_type<tc>, window_params = [{transform_indices = @transform_0, window_bounds = array<i64: 128, 640>}, {pipeline_mode = #tpu.pipeline_mode<synchronous>, transform_indices = @transform_1, window_bounds = array<i64: 640, 128>}, {transform_indices = @transform_2, window_bounds = array<i64: 128, 128>}, {transform_indices = @transform_3, window_bounds = array<i64: 1, 1, 128>}, {transform_indices = @transform_4, window_bounds = array<i64: 1, 1, 128>}]} {
    %c0 = arith.constant 0 : index
    %c0_0 = arith.constant 0 : index
    %0 = vector.load %arg1[%c0, %c0_0] : memref<128x640xbf16, #tpu.memory_space<vmem>>, vector<128x640xbf16>
    %c0_1 = arith.constant 0 : index
    %c0_2 = arith.constant 0 : index
    %1 = vector.load %arg2[%c0_1, %c0_2] : memref<640x128xbf16, #tpu.memory_space<vmem>>, vector<640x128xbf16>
    %cst = arith.constant dense<0.000000e+00> : vector<128x128xf32>
    %2 = tpu.matmul %0, %1, %cst {dimension_numbers = #tpu.dot_dimension_numbers<[1], [0], [0], [1], [0, 0, 1, 1], [], []>} : vector<128x640xbf16>, vector<640x128xbf16>, vector<128x128xf32> -> vector<128x128xf32>
    %3 = arith.truncf %2 : vector<128x128xf32> to vector<128x128xbf16>
    %c0_3 = arith.constant 0 : index
    %c0_4 = arith.constant 0 : index
    %4 = vector.load %arg3[%c0_3, %c0_4] : memref<128x128xbf16, #tpu.memory_space<vmem>>, vector<128x128xbf16>
    tpu.vector_store %arg3[%c0_3, %c0_4], %3 {strides = array<i32>} : memref<128x128xbf16, #tpu.memory_space<vmem>>, vector<128x128xbf16>,
    %cst_5 = arith.constant dense<0.000000e+00> : vector<128xf32>
    %5 = vector.multi_reduction <add>, %2, %cst_5 [0] : vector<128x128xf32> to vector<128xf32>
    %6 = vector.shape_cast %5 : vector<128xf32> to vector<1x128xf32>
    %7 = vector.shape_cast %6 : vector<1x128xf32> to vector<1x1x128xf32>
    %c0_6 = arith.constant 0 : index
    %c0_7 = arith.constant 0 : index
    %c0_8 = arith.constant 0 : index
    %8 = vector.load %arg4[%c0_6, %c0_7, %c0_8] : memref<1x1x128xf32, #tpu.memory_space<vmem>>, vector<1x1x128xf32>
    tpu.vector_store %arg4[%c0_6, %c0_7, %c0_8], %7 {strides = array<i32>} : memref<1x1x128xf32, #tpu.memory_space<vmem>>, vector<1x1x128xf32>,
    %9 = arith.mulf %2, %2 : vector<128x128xf32>
    %cst_9 = arith.constant dense<0.000000e+00> : vector<128xf32>
    %10 = vector.multi_reduction <add>, %9, %cst_9 [0] : vector<128x128xf32> to vector<128xf32>
    %11 = vector.shape_cast %10 : vector<128xf32> to vector<1x128xf32>
    %12 = vector.shape_cast %11 : vector<1x128xf32> to vector<1x1x128xf32>
    %c0_10 = arith.constant 0 : index
    %c0_11 = arith.constant 0 : index
    %c0_12 = arith.constant 0 : index
    %13 = vector.load %arg5[%c0_10, %c0_11, %c0_12] : memref<1x1x128xf32, #tpu.memory_space<vmem>>, vector<1x1x128xf32>
    tpu.vector_store %arg5[%c0_10, %c0_11, %c0_12], %12 {strides = array<i32>} : memref<1x1x128xf32, #tpu.memory_space<vmem>>, vector<1x1x128xf32>,
    return
  }
  func.func @transform_0(%arg0: i32) -> (i32, i32) {
    %c0_i32 = arith.constant 0 : i32
    %c0_i32_0 = arith.constant 0 : i32
    return %arg0, %c0_i32 : i32, i32
  }
  func.func @transform_1(%arg0: i32) -> (i32, i32) {
    %c0_i32 = arith.constant 0 : i32
    %c0_i32_0 = arith.constant 0 : i32
    %c0_i32_1 = arith.constant 0 : i32
    return %c0_i32, %c0_i32_0 : i32, i32
  }
  func.func @transform_2(%arg0: i32) -> (i32, i32) {
    %c0_i32 = arith.constant 0 : i32
    %c0_i32_0 = arith.constant 0 : i32
    return %arg0, %c0_i32 : i32, i32
  }
  func.func @transform_3(%arg0: i32) -> (i32, i32, i32) {
    %c0_i32 = arith.constant 0 : i32
    %c0_i32_0 = arith.constant 0 : i32
    %c0_i32_1 = arith.constant 0 : i32
    return %arg0, %c0_i32, %c0_i32_0 : i32, i32, i32
  }
  func.func @transform_4(%arg0: i32) -> (i32, i32, i32) {
    %c0_i32 = arith.constant 0 : i32
    %c0_i32_0 = arith.constant 0 : i32
    %c0_i32_1 = arith.constant 0 : i32
    return %arg0, %c0_i32, %c0_i32_0 : i32, i32, i32
  }
}

module attributes {stable_mosaic.version = 11 : i64} {
  func.func @_deconv_stats_kernel(%arg0: i32, %arg1: i32, %arg2: memref<128x256xbf16, #tpu.memory_space<vmem>>, %arg3: memref<1x256x128xbf16, #tpu.memory_space<vmem>>, %arg4: memref<1x128x128xbf16, #tpu.memory_space<vmem>>, %arg5: memref<1x1x128xf32, #tpu.memory_space<vmem>>, %arg6: memref<1x1x128xf32, #tpu.memory_space<vmem>>) attributes {dimension_semantics = [#tpu.dimension_semantics<parallel>, #tpu.dimension_semantics<arbitrary>], iteration_bounds = array<i64: 1, 4>, scalar_prefetch = 0 : i64, scratch_operands = 0 : i64, tpu.core_type = #tpu.core_type<tc>, window_params = [{transform_indices = @transform_0, window_bounds = array<i64: 128, 256>}, {transform_indices = @transform_1, window_bounds = array<i64: 1, 256, 128>}, {transform_indices = @transform_2, window_bounds = array<i64: 1, 128, 128>}, {transform_indices = @transform_3, window_bounds = array<i64: 1, 1, 128>}, {transform_indices = @transform_4, window_bounds = array<i64: 1, 1, 128>}]} {
    %c0 = arith.constant 0 : index
    %c0_0 = arith.constant 0 : index
    %c0_1 = arith.constant 0 : index
    %0 = vector.load %arg3[%c0, %c0_0, %c0_1] : memref<1x256x128xbf16, #tpu.memory_space<vmem>>, vector<1x256x128xbf16>
    %1 = vector.shape_cast %0 : vector<1x256x128xbf16> to vector<256x128xbf16>
    %c0_2 = arith.constant 0 : index
    %c0_3 = arith.constant 0 : index
    %2 = vector.load %arg2[%c0_2, %c0_3] : memref<128x256xbf16, #tpu.memory_space<vmem>>, vector<128x256xbf16>
    %cst = arith.constant dense<0.000000e+00> : vector<128x128xf32>
    %3 = tpu.matmul %2, %1, %cst {dimension_numbers = #tpu.dot_dimension_numbers<[1], [0], [0], [1], [0, 0, 1, 1], [], []>} : vector<128x256xbf16>, vector<256x128xbf16>, vector<128x128xf32> -> vector<128x128xf32>
    %4 = arith.truncf %3 : vector<128x128xf32> to vector<128x128xbf16>
    %5 = vector.shape_cast %4 : vector<128x128xbf16> to vector<1x128x128xbf16>
    %c0_4 = arith.constant 0 : index
    %c0_5 = arith.constant 0 : index
    %c0_6 = arith.constant 0 : index
    %6 = vector.load %arg4[%c0_4, %c0_5, %c0_6] : memref<1x128x128xbf16, #tpu.memory_space<vmem>>, vector<1x128x128xbf16>
    tpu.vector_store %arg4[%c0_4, %c0_5, %c0_6], %5 {strides = array<i32>} : memref<1x128x128xbf16, #tpu.memory_space<vmem>>, vector<1x128x128xbf16>,
    %c0_i32 = arith.constant 0 : i32
    %7 = arith.cmpi eq, %arg1, %c0_i32 : i32
    %8 = arith.extui %7 : i1 to i32
    %c0_i32_7 = arith.constant 0 : i32
    %9 = arith.cmpi ne, %8, %c0_i32_7 : i32
    scf.if %9 {
      %cst_22 = arith.constant 0.000000e+00 : f32
      %23 = vector.broadcast %cst_22 : f32 to vector<1x1x128xf32>
      %c0_23 = arith.constant 0 : index
      %c0_24 = arith.constant 0 : index
      %c0_25 = arith.constant 0 : index
      %24 = vector.load %arg5[%c0_23, %c0_24, %c0_25] : memref<1x1x128xf32, #tpu.memory_space<vmem>>, vector<1x1x128xf32>
      tpu.vector_store %arg5[%c0_23, %c0_24, %c0_25], %23 {strides = array<i32>} : memref<1x1x128xf32, #tpu.memory_space<vmem>>, vector<1x1x128xf32>,
      %cst_26 = arith.constant 0.000000e+00 : f32
      %25 = vector.broadcast %cst_26 : f32 to vector<1x1x128xf32>
      %c0_27 = arith.constant 0 : index
      %c0_28 = arith.constant 0 : index
      %c0_29 = arith.constant 0 : index
      %26 = vector.load %arg6[%c0_27, %c0_28, %c0_29] : memref<1x1x128xf32, #tpu.memory_space<vmem>>, vector<1x1x128xf32>
      tpu.vector_store %arg6[%c0_27, %c0_28, %c0_29], %25 {strides = array<i32>} : memref<1x1x128xf32, #tpu.memory_space<vmem>>, vector<1x1x128xf32>,
    } else {
    }
    %c0_8 = arith.constant 0 : index
    %c0_9 = arith.constant 0 : index
    %c0_10 = arith.constant 0 : index
    %10 = vector.load %arg5[%c0_8, %c0_9, %c0_10] : memref<1x1x128xf32, #tpu.memory_space<vmem>>, vector<1x1x128xf32>
    %cst_11 = arith.constant dense<0.000000e+00> : vector<128xf32>
    %11 = vector.multi_reduction <add>, %3, %cst_11 [0] : vector<128x128xf32> to vector<128xf32>
    %12 = vector.shape_cast %11 : vector<128xf32> to vector<1x128xf32>
    %13 = vector.shape_cast %12 : vector<1x128xf32> to vector<1x1x128xf32>
    %14 = arith.addf %10, %13 : vector<1x1x128xf32>
    %c0_12 = arith.constant 0 : index
    %c0_13 = arith.constant 0 : index
    %c0_14 = arith.constant 0 : index
    %15 = vector.load %arg5[%c0_12, %c0_13, %c0_14] : memref<1x1x128xf32, #tpu.memory_space<vmem>>, vector<1x1x128xf32>
    tpu.vector_store %arg5[%c0_12, %c0_13, %c0_14], %14 {strides = array<i32>} : memref<1x1x128xf32, #tpu.memory_space<vmem>>, vector<1x1x128xf32>,
    %c0_15 = arith.constant 0 : index
    %c0_16 = arith.constant 0 : index
    %c0_17 = arith.constant 0 : index
    %16 = vector.load %arg6[%c0_15, %c0_16, %c0_17] : memref<1x1x128xf32, #tpu.memory_space<vmem>>, vector<1x1x128xf32>
    %17 = arith.mulf %3, %3 : vector<128x128xf32>
    %cst_18 = arith.constant dense<0.000000e+00> : vector<128xf32>
    %18 = vector.multi_reduction <add>, %17, %cst_18 [0] : vector<128x128xf32> to vector<128xf32>
    %19 = vector.shape_cast %18 : vector<128xf32> to vector<1x128xf32>
    %20 = vector.shape_cast %19 : vector<1x128xf32> to vector<1x1x128xf32>
    %21 = arith.addf %16, %20 : vector<1x1x128xf32>
    %c0_19 = arith.constant 0 : index
    %c0_20 = arith.constant 0 : index
    %c0_21 = arith.constant 0 : index
    %22 = vector.load %arg6[%c0_19, %c0_20, %c0_21] : memref<1x1x128xf32, #tpu.memory_space<vmem>>, vector<1x1x128xf32>
    tpu.vector_store %arg6[%c0_19, %c0_20, %c0_21], %21 {strides = array<i32>} : memref<1x1x128xf32, #tpu.memory_space<vmem>>, vector<1x1x128xf32>,
    return
  }
  func.func @transform_0(%arg0: i32, %arg1: i32) -> (i32, i32) {
    %c0_i32 = arith.constant 0 : i32
    %c0_i32_0 = arith.constant 0 : i32
    return %arg0, %c0_i32 : i32, i32
  }
  func.func @transform_1(%arg0: i32, %arg1: i32) -> (i32, i32, i32) {
    %c0_i32 = arith.constant 0 : i32
    %c0_i32_0 = arith.constant 0 : i32
    %c0_i32_1 = arith.constant 0 : i32
    return %arg1, %c0_i32, %c0_i32_0 : i32, i32, i32
  }
  func.func @transform_2(%arg0: i32, %arg1: i32) -> (i32, i32, i32) {
    %c0_i32 = arith.constant 0 : i32
    %c0_i32_0 = arith.constant 0 : i32
    return %arg1, %arg0, %c0_i32 : i32, i32, i32
  }
  func.func @transform_3(%arg0: i32, %arg1: i32) -> (i32, i32, i32) {
    %c0_i32 = arith.constant 0 : i32
    %c0_i32_0 = arith.constant 0 : i32
    %c0_i32_1 = arith.constant 0 : i32
    return %arg0, %c0_i32, %c0_i32_0 : i32, i32, i32
  }
  func.func @transform_4(%arg0: i32, %arg1: i32) -> (i32, i32, i32) {
    %c0_i32 = arith.constant 0 : i32
    %c0_i32_0 = arith.constant 0 : i32
    %c0_i32_1 = arith.constant 0 : i32
    return %arg0, %c0_i32, %c0_i32_0 : i32, i32, i32
  }
}

module attributes {stable_mosaic.version = 11 : i64} {
  func.func @_deconv_bn_kernel(%arg0: i32, %arg1: i32, %arg2: memref<1x128x128xbf16, #tpu.memory_space<vmem>>, %arg3: memref<1x128xf32, #tpu.memory_space<vmem>>, %arg4: memref<1x128xf32, #tpu.memory_space<vmem>>, %arg5: memref<1x128x128xbf16, #tpu.memory_space<vmem>>, %arg6: memref<1x128x128xbf16, #tpu.memory_space<vmem>>) attributes {dimension_semantics = [#tpu.dimension_semantics<parallel>, #tpu.dimension_semantics<parallel>], iteration_bounds = array<i64: 1, 4>, scalar_prefetch = 0 : i64, scratch_operands = 0 : i64, tpu.core_type = #tpu.core_type<tc>, window_params = [{transform_indices = @transform_0, window_bounds = array<i64: 1, 128, 128>}, {pipeline_mode = #tpu.pipeline_mode<synchronous>, transform_indices = @transform_1, window_bounds = array<i64: 1, 128>}, {pipeline_mode = #tpu.pipeline_mode<synchronous>, transform_indices = @transform_2, window_bounds = array<i64: 1, 128>}, {transform_indices = @transform_3, window_bounds = array<i64: 1, 128, 128>}, {transform_indices = @transform_4, window_bounds = array<i64: 1, 128, 128>}]} {
    %c0 = arith.constant 0 : index
    %c0_0 = arith.constant 0 : index
    %c0_1 = arith.constant 0 : index
    %0 = vector.load %arg2[%c0, %c0_0, %c0_1] : memref<1x128x128xbf16, #tpu.memory_space<vmem>>, vector<1x128x128xbf16>
    %1 = vector.shape_cast %0 : vector<1x128x128xbf16> to vector<128x128xbf16>
    %2 = arith.extf %1 : vector<128x128xbf16> to vector<128x128xf32>
    %c0_2 = arith.constant 0 : index
    %c0_3 = arith.constant 0 : index
    %c0_4 = arith.constant 0 : index
    %3 = vector.load %arg5[%c0_2, %c0_3, %c0_4] : memref<1x128x128xbf16, #tpu.memory_space<vmem>>, vector<1x128x128xbf16>
    %4 = vector.shape_cast %3 : vector<1x128x128xbf16> to vector<128x128xbf16>
    %5 = arith.extf %4 : vector<128x128xbf16> to vector<128x128xf32>
    %c0_5 = arith.constant 0 : index
    %c0_6 = arith.constant 0 : index
    %6 = vector.load %arg3[%c0_5, %c0_6] : memref<1x128xf32, #tpu.memory_space<vmem>>, vector<1x128xf32>
    %7 = vector.broadcast %6 : vector<1x128xf32> to vector<128x128xf32>
    %8 = arith.mulf %2, %7 : vector<128x128xf32>
    %c0_7 = arith.constant 0 : index
    %c0_8 = arith.constant 0 : index
    %9 = vector.load %arg4[%c0_7, %c0_8] : memref<1x128xf32, #tpu.memory_space<vmem>>, vector<1x128xf32>
    %10 = vector.broadcast %9 : vector<1x128xf32> to vector<128x128xf32>
    %11 = arith.addf %8, %10 : vector<128x128xf32>
    %12 = arith.addf %11, %5 : vector<128x128xf32>
    %cst = arith.constant 0.000000e+00 : f32
    %13 = vector.broadcast %cst : f32 to vector<128x128xf32>
    %14 = arith.maximumf %12, %13 : vector<128x128xf32>
    %15 = arith.truncf %14 : vector<128x128xf32> to vector<128x128xbf16>
    %16 = vector.shape_cast %15 : vector<128x128xbf16> to vector<1x128x128xbf16>
    %c0_9 = arith.constant 0 : index
    %c0_10 = arith.constant 0 : index
    %c0_11 = arith.constant 0 : index
    %17 = vector.load %arg6[%c0_9, %c0_10, %c0_11] : memref<1x128x128xbf16, #tpu.memory_space<vmem>>, vector<1x128x128xbf16>
    tpu.vector_store %arg6[%c0_9, %c0_10, %c0_11], %16 {strides = array<i32>} : memref<1x128x128xbf16, #tpu.memory_space<vmem>>, vector<1x128x128xbf16>,
    return
  }
  func.func @transform_0(%arg0: i32, %arg1: i32) -> (i32, i32, i32) {
    %c0_i32 = arith.constant 0 : i32
    %c0_i32_0 = arith.constant 0 : i32
    return %arg1, %arg0, %c0_i32 : i32, i32, i32
  }
  func.func @transform_1(%arg0: i32, %arg1: i32) -> (i32, i32) {
    %c0_i32 = arith.constant 0 : i32
    %c0_i32_0 = arith.constant 0 : i32
    %c0_i32_1 = arith.constant 0 : i32
    return %c0_i32, %c0_i32_0 : i32, i32
  }
  func.func @transform_2(%arg0: i32, %arg1: i32) -> (i32, i32) {
    %c0_i32 = arith.constant 0 : i32
    %c0_i32_0 = arith.constant 0 : i32
    %c0_i32_1 = arith.constant 0 : i32
    return %c0_i32, %c0_i32_0 : i32, i32
  }
  func.func @transform_3(%arg0: i32, %arg1: i32) -> (i32, i32, i32) {
    %c0_i32 = arith.constant 0 : i32
    %c0_i32_0 = arith.constant 0 : i32
    return %arg1, %arg0, %c0_i32 : i32, i32, i32
  }
  func.func @transform_4(%arg0: i32, %arg1: i32) -> (i32, i32, i32) {
    %c0_i32 = arith.constant 0 : i32
    %c0_i32_0 = arith.constant 0 : i32
    return %arg1, %arg0, %c0_i32 : i32, i32, i32
  }
}

module attributes {stable_mosaic.version = 11 : i64} {
  func.func @_deconv_stats_kernel(%arg0: i32, %arg1: i32, %arg2: memref<128x128xbf16, #tpu.memory_space<vmem>>, %arg3: memref<1x128x128xbf16, #tpu.memory_space<vmem>>, %arg4: memref<1x128x128xbf16, #tpu.memory_space<vmem>>, %arg5: memref<1x1x128xf32, #tpu.memory_space<vmem>>, %arg6: memref<1x1x128xf32, #tpu.memory_space<vmem>>) attributes {dimension_semantics = [#tpu.dimension_semantics<parallel>, #tpu.dimension_semantics<arbitrary>], iteration_bounds = array<i64: 1, 4>, scalar_prefetch = 0 : i64, scratch_operands = 0 : i64, tpu.core_type = #tpu.core_type<tc>, window_params = [{transform_indices = @transform_0, window_bounds = array<i64: 128, 128>}, {transform_indices = @transform_1, window_bounds = array<i64: 1, 128, 128>}, {transform_indices = @transform_2, window_bounds = array<i64: 1, 128, 128>}, {transform_indices = @transform_3, window_bounds = array<i64: 1, 1, 128>}, {transform_indices = @transform_4, window_bounds = array<i64: 1, 1, 128>}]} {
    %c0 = arith.constant 0 : index
    %c0_0 = arith.constant 0 : index
    %c0_1 = arith.constant 0 : index
    %0 = vector.load %arg3[%c0, %c0_0, %c0_1] : memref<1x128x128xbf16, #tpu.memory_space<vmem>>, vector<1x128x128xbf16>
    %1 = vector.shape_cast %0 : vector<1x128x128xbf16> to vector<128x128xbf16>
    %c0_2 = arith.constant 0 : index
    %c0_3 = arith.constant 0 : index
    %2 = vector.load %arg2[%c0_2, %c0_3] : memref<128x128xbf16, #tpu.memory_space<vmem>>, vector<128x128xbf16>
    %cst = arith.constant dense<0.000000e+00> : vector<128x128xf32>
    %3 = tpu.matmul %2, %1, %cst {dimension_numbers = #tpu.dot_dimension_numbers<[1], [0], [0], [1], [0, 0, 1, 1], [], []>} : vector<128x128xbf16>, vector<128x128xbf16>, vector<128x128xf32> -> vector<128x128xf32>
    %4 = arith.truncf %3 : vector<128x128xf32> to vector<128x128xbf16>
    %5 = vector.shape_cast %4 : vector<128x128xbf16> to vector<1x128x128xbf16>
    %c0_4 = arith.constant 0 : index
    %c0_5 = arith.constant 0 : index
    %c0_6 = arith.constant 0 : index
    %6 = vector.load %arg4[%c0_4, %c0_5, %c0_6] : memref<1x128x128xbf16, #tpu.memory_space<vmem>>, vector<1x128x128xbf16>
    tpu.vector_store %arg4[%c0_4, %c0_5, %c0_6], %5 {strides = array<i32>} : memref<1x128x128xbf16, #tpu.memory_space<vmem>>, vector<1x128x128xbf16>,
    %c0_i32 = arith.constant 0 : i32
    %7 = arith.cmpi eq, %arg1, %c0_i32 : i32
    %8 = arith.extui %7 : i1 to i32
    %c0_i32_7 = arith.constant 0 : i32
    %9 = arith.cmpi ne, %8, %c0_i32_7 : i32
    scf.if %9 {
      %cst_22 = arith.constant 0.000000e+00 : f32
      %23 = vector.broadcast %cst_22 : f32 to vector<1x1x128xf32>
      %c0_23 = arith.constant 0 : index
      %c0_24 = arith.constant 0 : index
      %c0_25 = arith.constant 0 : index
      %24 = vector.load %arg5[%c0_23, %c0_24, %c0_25] : memref<1x1x128xf32, #tpu.memory_space<vmem>>, vector<1x1x128xf32>
      tpu.vector_store %arg5[%c0_23, %c0_24, %c0_25], %23 {strides = array<i32>} : memref<1x1x128xf32, #tpu.memory_space<vmem>>, vector<1x1x128xf32>,
      %cst_26 = arith.constant 0.000000e+00 : f32
      %25 = vector.broadcast %cst_26 : f32 to vector<1x1x128xf32>
      %c0_27 = arith.constant 0 : index
      %c0_28 = arith.constant 0 : index
      %c0_29 = arith.constant 0 : index
      %26 = vector.load %arg6[%c0_27, %c0_28, %c0_29] : memref<1x1x128xf32, #tpu.memory_space<vmem>>, vector<1x1x128xf32>
      tpu.vector_store %arg6[%c0_27, %c0_28, %c0_29], %25 {strides = array<i32>} : memref<1x1x128xf32, #tpu.memory_space<vmem>>, vector<1x1x128xf32>,
    } else {
    }
    %c0_8 = arith.constant 0 : index
    %c0_9 = arith.constant 0 : index
    %c0_10 = arith.constant 0 : index
    %10 = vector.load %arg5[%c0_8, %c0_9, %c0_10] : memref<1x1x128xf32, #tpu.memory_space<vmem>>, vector<1x1x128xf32>
    %cst_11 = arith.constant dense<0.000000e+00> : vector<128xf32>
    %11 = vector.multi_reduction <add>, %3, %cst_11 [0] : vector<128x128xf32> to vector<128xf32>
    %12 = vector.shape_cast %11 : vector<128xf32> to vector<1x128xf32>
    %13 = vector.shape_cast %12 : vector<1x128xf32> to vector<1x1x128xf32>
    %14 = arith.addf %10, %13 : vector<1x1x128xf32>
    %c0_12 = arith.constant 0 : index
    %c0_13 = arith.constant 0 : index
    %c0_14 = arith.constant 0 : index
    %15 = vector.load %arg5[%c0_12, %c0_13, %c0_14] : memref<1x1x128xf32, #tpu.memory_space<vmem>>, vector<1x1x128xf32>
    tpu.vector_store %arg5[%c0_12, %c0_13, %c0_14], %14 {strides = array<i32>} : memref<1x1x128xf32, #tpu.memory_space<vmem>>, vector<1x1x128xf32>,
    %c0_15 = arith.constant 0 : index
    %c0_16 = arith.constant 0 : index
    %c0_17 = arith.constant 0 : index
    %16 = vector.load %arg6[%c0_15, %c0_16, %c0_17] : memref<1x1x128xf32, #tpu.memory_space<vmem>>, vector<1x1x128xf32>
    %17 = arith.mulf %3, %3 : vector<128x128xf32>
    %cst_18 = arith.constant dense<0.000000e+00> : vector<128xf32>
    %18 = vector.multi_reduction <add>, %17, %cst_18 [0] : vector<128x128xf32> to vector<128xf32>
    %19 = vector.shape_cast %18 : vector<128xf32> to vector<1x128xf32>
    %20 = vector.shape_cast %19 : vector<1x128xf32> to vector<1x1x128xf32>
    %21 = arith.addf %16, %20 : vector<1x1x128xf32>
    %c0_19 = arith.constant 0 : index
    %c0_20 = arith.constant 0 : index
    %c0_21 = arith.constant 0 : index
    %22 = vector.load %arg6[%c0_19, %c0_20, %c0_21] : memref<1x1x128xf32, #tpu.memory_space<vmem>>, vector<1x1x128xf32>
    tpu.vector_store %arg6[%c0_19, %c0_20, %c0_21], %21 {strides = array<i32>} : memref<1x1x128xf32, #tpu.memory_space<vmem>>, vector<1x1x128xf32>,
    return
  }
  func.func @transform_0(%arg0: i32, %arg1: i32) -> (i32, i32) {
    %c0_i32 = arith.constant 0 : i32
    %c0_i32_0 = arith.constant 0 : i32
    return %arg0, %c0_i32 : i32, i32
  }
  func.func @transform_1(%arg0: i32, %arg1: i32) -> (i32, i32, i32) {
    %c0_i32 = arith.constant 0 : i32
    %c0_i32_0 = arith.constant 0 : i32
    %c0_i32_1 = arith.constant 0 : i32
    return %arg1, %c0_i32, %c0_i32_0 : i32, i32, i32
  }
  func.func @transform_2(%arg0: i32, %arg1: i32) -> (i32, i32, i32) {
    %c0_i32 = arith.constant 0 : i32
    %c0_i32_0 = arith.constant 0 : i32
    return %arg1, %arg0, %c0_i32 : i32, i32, i32
  }
  func.func @transform_3(%arg0: i32, %arg1: i32) -> (i32, i32, i32) {
    %c0_i32 = arith.constant 0 : i32
    %c0_i32_0 = arith.constant 0 : i32
    %c0_i32_1 = arith.constant 0 : i32
    return %arg0, %c0_i32, %c0_i32_0 : i32, i32, i32
  }
  func.func @transform_4(%arg0: i32, %arg1: i32) -> (i32, i32, i32) {
    %c0_i32 = arith.constant 0 : i32
    %c0_i32_0 = arith.constant 0 : i32
    %c0_i32_1 = arith.constant 0 : i32
    return %arg0, %c0_i32, %c0_i32_0 : i32, i32, i32
  }
}

module attributes {stable_mosaic.version = 11 : i64} {
  func.func @_deconv_bn_proj_kernel(%arg0: i32, %arg1: i32, %arg2: memref<1x128x128xbf16, #tpu.memory_space<vmem>>, %arg3: memref<1x128xf32, #tpu.memory_space<vmem>>, %arg4: memref<1x128xf32, #tpu.memory_space<vmem>>, %arg5: memref<1x128x128xbf16, #tpu.memory_space<vmem>>, %arg6: memref<128x128xbf16, #tpu.memory_space<vmem>>, %arg7: memref<1x128x128xf32, #tpu.memory_space<vmem>>, %arg8: memref<1x128x128xf32, #tpu.memory_space<vmem>>) attributes {dimension_semantics = [#tpu.dimension_semantics<parallel>, #tpu.dimension_semantics<parallel>], iteration_bounds = array<i64: 1, 4>, scalar_prefetch = 0 : i64, scratch_operands = 0 : i64, tpu.core_type = #tpu.core_type<tc>, window_params = [{transform_indices = @transform_0, window_bounds = array<i64: 1, 128, 128>}, {pipeline_mode = #tpu.pipeline_mode<synchronous>, transform_indices = @transform_1, window_bounds = array<i64: 1, 128>}, {pipeline_mode = #tpu.pipeline_mode<synchronous>, transform_indices = @transform_2, window_bounds = array<i64: 1, 128>}, {transform_indices = @transform_3, window_bounds = array<i64: 1, 128, 128>}, {pipeline_mode = #tpu.pipeline_mode<synchronous>, transform_indices = @transform_4, window_bounds = array<i64: 128, 128>}, {transform_indices = @transform_5, window_bounds = array<i64: 1, 128, 128>}, {transform_indices = @transform_6, window_bounds = array<i64: 1, 128, 128>}]} {
    %c0 = arith.constant 0 : index
    %c0_0 = arith.constant 0 : index
    %c0_1 = arith.constant 0 : index
    %0 = vector.load %arg2[%c0, %c0_0, %c0_1] : memref<1x128x128xbf16, #tpu.memory_space<vmem>>, vector<1x128x128xbf16>
    %1 = vector.shape_cast %0 : vector<1x128x128xbf16> to vector<128x128xbf16>
    %2 = arith.extf %1 : vector<128x128xbf16> to vector<128x128xf32>
    %c0_2 = arith.constant 0 : index
    %c0_3 = arith.constant 0 : index
    %c0_4 = arith.constant 0 : index
    %3 = vector.load %arg5[%c0_2, %c0_3, %c0_4] : memref<1x128x128xbf16, #tpu.memory_space<vmem>>, vector<1x128x128xbf16>
    %4 = vector.shape_cast %3 : vector<1x128x128xbf16> to vector<128x128xbf16>
    %5 = arith.extf %4 : vector<128x128xbf16> to vector<128x128xf32>
    %c0_5 = arith.constant 0 : index
    %c0_6 = arith.constant 0 : index
    %6 = vector.load %arg3[%c0_5, %c0_6] : memref<1x128xf32, #tpu.memory_space<vmem>>, vector<1x128xf32>
    %7 = vector.broadcast %6 : vector<1x128xf32> to vector<128x128xf32>
    %8 = arith.mulf %2, %7 : vector<128x128xf32>
    %c0_7 = arith.constant 0 : index
    %c0_8 = arith.constant 0 : index
    %9 = vector.load %arg4[%c0_7, %c0_8] : memref<1x128xf32, #tpu.memory_space<vmem>>, vector<1x128xf32>
    %10 = vector.broadcast %9 : vector<1x128xf32> to vector<128x128xf32>
    %11 = arith.addf %8, %10 : vector<128x128xf32>
    %12 = arith.addf %11, %5 : vector<128x128xf32>
    %cst = arith.constant 0.000000e+00 : f32
    %13 = vector.broadcast %cst : f32 to vector<128x128xf32>
    %14 = arith.maximumf %12, %13 : vector<128x128xf32>
    %15 = arith.truncf %14 : vector<128x128xf32> to vector<128x128xbf16>
    %c0_9 = arith.constant 0 : index
    %c0_10 = arith.constant 0 : index
    %16 = vector.load %arg6[%c0_9, %c0_10] : memref<128x128xbf16, #tpu.memory_space<vmem>>, vector<128x128xbf16>
    %cst_11 = arith.constant dense<0.000000e+00> : vector<128x128xf32>
    %17 = tpu.matmul %15, %16, %cst_11 {dimension_numbers = #tpu.dot_dimension_numbers<[1], [0], [0], [1], [0, 0, 1, 1], [], []>} : vector<128x128xbf16>, vector<128x128xbf16>, vector<128x128xf32> -> vector<128x128xf32>
    %c0_12 = arith.constant 0 : index
    %c0_13 = arith.constant 0 : index
    %c0_14 = arith.constant 0 : index
    %18 = vector.load %arg7[%c0_12, %c0_13, %c0_14] : memref<1x128x128xf32, #tpu.memory_space<vmem>>, vector<1x128x128xf32>
    %19 = vector.shape_cast %18 : vector<1x128x128xf32> to vector<128x128xf32>
    %20 = arith.addf %19, %17 : vector<128x128xf32>
    %cst_15 = arith.constant 0.000000e+00 : f32
    %21 = vector.broadcast %cst_15 : f32 to vector<128x128xf32>
    %22 = arith.maximumf %20, %21 : vector<128x128xf32>
    %23 = vector.shape_cast %22 : vector<128x128xf32> to vector<1x128x128xf32>
    %c0_16 = arith.constant 0 : index
    %c0_17 = arith.constant 0 : index
    %c0_18 = arith.constant 0 : index
    %24 = vector.load %arg8[%c0_16, %c0_17, %c0_18] : memref<1x128x128xf32, #tpu.memory_space<vmem>>, vector<1x128x128xf32>
    tpu.vector_store %arg8[%c0_16, %c0_17, %c0_18], %23 {strides = array<i32>} : memref<1x128x128xf32, #tpu.memory_space<vmem>>, vector<1x128x128xf32>,
    return
  }
  func.func @transform_0(%arg0: i32, %arg1: i32) -> (i32, i32, i32) {
    %c0_i32 = arith.constant 0 : i32
    %c0_i32_0 = arith.constant 0 : i32
    return %arg1, %arg0, %c0_i32 : i32, i32, i32
  }
  func.func @transform_1(%arg0: i32, %arg1: i32) -> (i32, i32) {
    %c0_i32 = arith.constant 0 : i32
    %c0_i32_0 = arith.constant 0 : i32
    %c0_i32_1 = arith.constant 0 : i32
    return %c0_i32, %c0_i32_0 : i32, i32
  }
  func.func @transform_2(%arg0: i32, %arg1: i32) -> (i32, i32) {
    %c0_i32 = arith.constant 0 : i32
    %c0_i32_0 = arith.constant 0 : i32
    %c0_i32_1 = arith.constant 0 : i32
    return %c0_i32, %c0_i32_0 : i32, i32
  }
  func.func @transform_3(%arg0: i32, %arg1: i32) -> (i32, i32, i32) {
    %c0_i32 = arith.constant 0 : i32
    %c0_i32_0 = arith.constant 0 : i32
    return %arg1, %arg0, %c0_i32 : i32, i32, i32
  }
  func.func @transform_4(%arg0: i32, %arg1: i32) -> (i32, i32) {
    %c0_i32 = arith.constant 0 : i32
    %c0_i32_0 = arith.constant 0 : i32
    %c0_i32_1 = arith.constant 0 : i32
    return %c0_i32, %c0_i32_0 : i32, i32
  }
  func.func @transform_5(%arg0: i32, %arg1: i32) -> (i32, i32, i32) {
    %c0_i32 = arith.constant 0 : i32
    %c0_i32_0 = arith.constant 0 : i32
    return %arg1, %arg0, %c0_i32 : i32, i32, i32
  }
  func.func @transform_6(%arg0: i32, %arg1: i32) -> (i32, i32, i32) {
    %c0_i32 = arith.constant 0 : i32
    %c0_i32_0 = arith.constant 0 : i32
    return %arg1, %arg0, %c0_i32 : i32, i32, i32
  }
}

</mosaic_0001>

<bundles_post_ra>
// kernel: res_disparity_refinement_forward.17
= control target key start
LH: loop header
LB: loop body
LE: loop exit
PB: predicated region body
PF: predicated region fallthrough
CT: control target
= control target key end

     0   :  { %s1502_s0 = inlined_call_operand.vmem [shape: bf16[512,128], index: 0, kind: input, shape index: {}]   ;;  %s1503_s1 = inlined_call_operand.vmem [shape: f32[1,128], index: 1, kind: input, shape index: {}]   ;;  %s1504_s2 = inlined_call_operand.vmem [shape: f32[1,128], index: 2, kind: input, shape index: {}]   ;;  %s1505_s3 = inlined_call_operand.vmem [shape: bf16[512,128], index: 3, kind: output, shape index: {}]  }
   0x1   :  { %v803_v0 = vld [vmem:[%s1502_s0] sm:$0xff]   ;;  %v1090_v4 = vld [vmem:[%s1502_s0 + $0x8] sm:$0xff]   ;;  %v1091_v5 = vld [vmem:[%s1502_s0 + $0x10] sm:$0xff]  }
   0x2   :  { %v1178_v1 = vld [vmem:[%s1503_s1] ss:$0 sm:$0xff]  ;;  %v804_v2 = vunpack.c.l.bf16 %v803_v0  ;;  %v805_v3 = vunpack.c.h.bf16 %v803_v0  ;;  %v1092_v6 = vld [vmem:[%s1502_s0 + $0x18] sm:$0xff]   ;;  %v808_v8 = vunpack.c.l.bf16 %v1090_v4  ;;  %v809_v9 = vunpack.c.h.bf16 %v1090_v4  ;;  %v1094_v33 = vld [vmem:[%s1502_s0 + $0x28] sm:$0xff]  }
   0x3   :  { %v1192_v7 = vld [vmem:[%s1504_s2] ss:$0 sm:$0xff]  ;;  %v812_v10 = vunpack.c.l.bf16 %v1091_v5  ;;  %v813_v11 = vunpack.c.h.bf16 %v1091_v5  ;;  %v816_v14 = vunpack.c.l.bf16 %v1092_v6  ;;  %v817_v15 = vunpack.c.h.bf16 %v1092_v6  ;;  %v1095_v38 = vld [vmem:[%s1502_s0 + $0x30] sm:$0xff]   ;;  %v1096_v43 = vld [vmem:[%s1502_s0 + $0x38] sm:$0xff]  }
   0x4   :  { %v149_v12 = vmul.f32 %v804_v2, %v1178_v1  ;;  %v150_v13 = vmul.f32 %v805_v3, %v1178_v1  ;;  %v151_v16 = vmul.f32 %v808_v8, %v1178_v1  ;;  %v152_v17 = vmul.f32 %v809_v9, %v1178_v1  ;;  %v1093_v28 = vld [vmem:[%s1502_s0 + $0x20] sm:$0xff]  }
   0x5   :  { %v153_v18 = vmul.f32 %v812_v10, %v1178_v1  ;;  %v154_v19 = vmul.f32 %v813_v11, %v1178_v1  ;;  %v155_v22 = vmul.f32 %v816_v14, %v1178_v1  ;;  %v156_v23 = vmul.f32 %v817_v15, %v1178_v1  ;;  %v1097_v0 = vld [vmem:[%s1502_s0 + $0x40] sm:$0xff]   ;;  %v1098_v11 = vld [vmem:[%s1502_s0 + $0x48] sm:$0xff]  }
   0x6   :  { %v220_v20 = vadd.f32 %v1192_v7, %v149_v12  ;;  %v221_v21 = vadd.f32 %v1192_v7, %v150_v13  ;;  %v222_v24 = vadd.f32 %v1192_v7, %v151_v16  ;;  %v223_v25 = vadd.f32 %v1192_v7, %v152_v17  ;;  %v1099_v16 = vld [vmem:[%s1502_s0 + $0x50] sm:$0xff]  }
   0x7   :  { %v224_v26 = vadd.f32 %v1192_v7, %v153_v18  ;;  %v225_v27 = vadd.f32 %v1192_v7, %v154_v19  ;;  %v226_v31 = vadd.f32 %v1192_v7, %v155_v22  ;;  %v227_v32 = vadd.f32 %v1192_v7, %v156_v23 }
   0x8   :  { %v284_v29 = vmax.f32 %v220_v20, 0.0  ;;  %v285_v30 = vmax.f32 %v221_v21, 0.0  ;;  %v286_v34 = vmax.f32 %v222_v24, 0.0  ;;  %v287_v35 = vmax.f32 %v223_v25, 0.0  ;;  %v1100_v25 = vld [vmem:[%s1502_s0 + $0x58] sm:$0xff]  }
   0x9   :  { %v288_v36 = vmax.f32 %v224_v26, 0.0  ;;  %v289_v37 = vmax.f32 %v225_v27, 0.0  ;;  %v290_v40 = vmax.f32 %v226_v31, 0.0  ;;  %v291_v41 = vmax.f32 %v227_v32, 0.0 }
   0xa   :  { %v933_v39 = vpack.c.bf16 %v285_v30, %v284_v29  ;;  %v820_v42 = vunpack.c.l.bf16 %v1093_v28  ;;  %v938_v44 = vpack.c.bf16 %v287_v35, %v286_v34  ;;  %v821_v46 = vunpack.c.h.bf16 %v1093_v28 }
   0xb   :  { %v943_v45 = vpack.c.bf16 %v289_v37, %v288_v36  ;;  %v824_v47 = vunpack.c.l.bf16 %v1094_v33  ;;  %v948_v48 = vpack.c.bf16 %v291_v41, %v290_v40  ;;  %v825_v50 = vunpack.c.h.bf16 %v1094_v33 }
   0xc   :  { %934 = vst [vmem:[%s1505_s3] sm:$0xff] %v933_v39   ;;  %v157_v49 = vmul.f32 %v820_v42, %v1178_v1  ;;  %v828_v51 = vunpack.c.l.bf16 %v1095_v38  ;;  %1121 = vst [vmem:[%s1505_s3 + $0x8] sm:$0xff] %v938_v44   ;;  %v158_v52 = vmul.f32 %v821_v46, %v1178_v1  ;;  %v829_v54 = vunpack.c.h.bf16 %v1095_v38  ;;  %v1101_v38 = vld [vmem:[%s1502_s0 + $0x60] sm:$0xff]  }
   0xd   :  { %1122 = vst [vmem:[%s1505_s3 + $0x10] sm:$0xff] %v943_v45   ;;  %v159_v53 = vmul.f32 %v824_v47, %v1178_v1  ;;  %v832_v55 = vunpack.c.l.bf16 %v1096_v43  ;;  %1123 = vst [vmem:[%s1505_s3 + $0x18] sm:$0xff] %v948_v48   ;;  %v160_v57 = vmul.f32 %v825_v50, %v1178_v1  ;;  %v833_v59 = vunpack.c.h.bf16 %v1096_v43 }
   0xe   :  { %v228_v56 = vadd.f32 %v1192_v7, %v157_v49  ;;  %v161_v58 = vmul.f32 %v828_v51, %v1178_v1  ;;  %v229_v60 = vadd.f32 %v1192_v7, %v158_v52  ;;  %v162_v62 = vmul.f32 %v829_v54, %v1178_v1  ;;  %v1102_v51 = vld [vmem:[%s1502_s0 + $0x68] sm:$0xff]  }
   0xf   :  { %v230_v61 = vadd.f32 %v1192_v7, %v159_v53  ;;  %v163_v63 = vmul.f32 %v832_v55, %v1178_v1  ;;  %v231_v3 = vadd.f32 %v1192_v7, %v160_v57  ;;  %v164_v5 = vmul.f32 %v833_v59, %v1178_v1 }
  0x10   :  { %v292_v2 = vmax.f32 %v228_v56, 0.0  ;;  %v232_v4 = vadd.f32 %v1192_v7, %v161_v58  ;;  %v293_v6 = vmax.f32 %v229_v60, 0.0  ;;  %v233_v9 = vadd.f32 %v1192_v7, %v162_v62  ;;  %v1103_v60 = vld [vmem:[%s1502_s0 + $0x70] sm:$0xff]  }
  0x11   :  { %v294_v8 = vmax.f32 %v230_v61, 0.0  ;;  %v234_v10 = vadd.f32 %v1192_v7, %v163_v63  ;;  %v295_v12 = vmax.f32 %v231_v3, 0.0  ;;  %v235_v14 = vadd.f32 %v1192_v7, %v164_v5 }
  0x12   :  { %v296_v13 = vmax.f32 %v232_v4, 0.0  ;;  %v836_v15 = vunpack.c.l.bf16 %v1097_v0  ;;  %v953_v17 = vpack.c.bf16 %v293_v6, %v292_v2  ;;  %v297_v18 = vmax.f32 %v233_v9, 0.0  ;;  %v1104_v2 = vld [vmem:[%s1502_s0 + $0x78] sm:$0xff]  }
  0x13   :  { %v298_v19 = vmax.f32 %v234_v10, 0.0  ;;  %v837_v20 = vunpack.c.h.bf16 %v1097_v0  ;;  %v958_v21 = vpack.c.bf16 %v295_v12, %v294_v8  ;;  %v299_v22 = vmax.f32 %v235_v14, 0.0  ;;  %v1105_v12 = vld [vmem:[%s1502_s0 + $0x80] sm:$0xff]  }
  0x14   :  { %v165_v23 = vmul.f32 %v836_v15, %v1178_v1  ;;  %v840_v24 = vunpack.c.l.bf16 %v1098_v11  ;;  %1124 = vst [vmem:[%s1505_s3 + $0x20] sm:$0xff] %v953_v17   ;;  %v963_v26 = vpack.c.bf16 %v297_v18, %v296_v13  ;;  %v841_v28 = vunpack.c.h.bf16 %v1098_v11 }
  0x15   :  { %v166_v27 = vmul.f32 %v837_v20, %v1178_v1  ;;  %v844_v29 = vunpack.c.l.bf16 %v1099_v16  ;;  %1125 = vst [vmem:[%s1505_s3 + $0x28] sm:$0xff] %v958_v21   ;;  %v968_v30 = vpack.c.bf16 %v299_v22, %v298_v19  ;;  %v845_v33 = vunpack.c.h.bf16 %v1099_v16 }
  0x16   :  { %v236_v31 = vadd.f32 %v1192_v7, %v165_v23  ;;  %v167_v32 = vmul.f32 %v840_v24, %v1178_v1  ;;  %1126 = vst [vmem:[%s1505_s3 + $0x30] sm:$0xff] %v963_v26   ;;  %v168_v35 = vmul.f32 %v841_v28, %v1178_v1  ;;  %v848_v37 = vunpack.c.l.bf16 %v1100_v25 }
  0x17   :  { %v237_v34 = vadd.f32 %v1192_v7, %v166_v27  ;;  %v169_v36 = vmul.f32 %v844_v29, %v1178_v1  ;;  %1127 = vst [vmem:[%s1505_s3 + $0x38] sm:$0xff] %v968_v30   ;;  %v170_v41 = vmul.f32 %v845_v33, %v1178_v1  ;;  %v849_v42 = vunpack.c.h.bf16 %v1100_v25  ;;  %v1106_v29 = vld [vmem:[%s1502_s0 + $0x88] sm:$0xff]  }
  0x18   :  { %v300_v39 = vmax.f32 %v236_v31, 0.0  ;;  %v238_v40 = vadd.f32 %v1192_v7, %v167_v32  ;;  %v239_v44 = vadd.f32 %v1192_v7, %v168_v35  ;;  %v171_v46 = vmul.f32 %v848_v37, %v1178_v1 }
  0x19   :  { %v301_v43 = vmax.f32 %v237_v34, 0.0  ;;  %v240_v45 = vadd.f32 %v1192_v7, %v169_v36  ;;  %v241_v48 = vadd.f32 %v1192_v7, %v170_v41  ;;  %v172_v49 = vmul.f32 %v849_v42, %v1178_v1  ;;  %v1107_v34 = vld [vmem:[%s1502_s0 + $0x90] sm:$0xff]  }
  0x1a   :  { %v302_v47 = vmax.f32 %v238_v40, 0.0  ;;  %v852_v50 = vunpack.c.l.bf16 %v1101_v38  ;;  %v303_v53 = vmax.f32 %v239_v44, 0.0  ;;  %v242_v55 = vadd.f32 %v1192_v7, %v171_v46 }
  0x1b   :  { %v973_v52 = vpack.c.bf16 %v301_v43, %v300_v39  ;;  %v304_v54 = vmax.f32 %v240_v45, 0.0  ;;  %v305_v56 = vmax.f32 %v241_v48, 0.0  ;;  %v243_v57 = vadd.f32 %v1192_v7, %v172_v49  ;;  %v1108_v43 = vld [vmem:[%s1502_s0 + $0x98] sm:$0xff]  }
  0x1c   :  { %v853_v58 = vunpack.c.h.bf16 %v1101_v38  ;;  %v173_v59 = vmul.f32 %v852_v50, %v1178_v1  ;;  %v978_v61 = vpack.c.bf16 %v303_v53, %v302_v47  ;;  %v306_v62 = vmax.f32 %v242_v55, 0.0 }
  0x1d   :  { %1128 = vst [vmem:[%s1505_s3 + $0x40] sm:$0xff] %v973_v52   ;;  %v856_v63 = vunpack.c.l.bf16 %v1102_v51  ;;  %v857_v0 = vunpack.c.h.bf16 %v1102_v51  ;;  %v983_v3 = vpack.c.bf16 %v305_v56, %v304_v54  ;;  %v307_v4 = vmax.f32 %v243_v57, 0.0  ;;  %v1109_v56 = vld [vmem:[%s1502_s0 + $0xa0] sm:$0xff]  }
  0x1e   :  { %v174_v5 = vmul.f32 %v853_v58, %v1178_v1  ;;  %v244_v6 = vadd.f32 %v1192_v7, %v173_v59  ;;  %1129 = vst [vmem:[%s1505_s3 + $0x48] sm:$0xff] %v978_v61   ;;  %v860_v10 = vunpack.c.l.bf16 %v1103_v60  ;;  %v861_v11 = vunpack.c.h.bf16 %v1103_v60 }
  0x1f   :  { %v175_v8 = vmul.f32 %v856_v63, %v1178_v1  ;;  %v176_v9 = vmul.f32 %v857_v0, %v1178_v1  ;;  %1130 = vst [vmem:[%s1505_s3 + $0x50] sm:$0xff] %v983_v3   ;;  %v988_v13 = vpack.c.bf16 %v307_v4, %v306_v62  ;;  %v864_v16 = vunpack.c.l.bf16 %v1104_v2 }
  0x20   :  { %v245_v14 = vadd.f32 %v1192_v7, %v174_v5  ;;  %v308_v15 = vmax.f32 %v244_v6, 0.0  ;;  %v177_v19 = vmul.f32 %v860_v10, %v1178_v1  ;;  %v178_v20 = vmul.f32 %v861_v11, %v1178_v1 }
  0x21   :  { %v246_v17 = vadd.f32 %v1192_v7, %v175_v8  ;;  %v247_v18 = vadd.f32 %v1192_v7, %v176_v9  ;;  %1131 = vst [vmem:[%s1505_s3 + $0x58] sm:$0xff] %v988_v13   ;;  %v865_v22 = vunpack.c.h.bf16 %v1104_v2  ;;  %v179_v23 = vmul.f32 %v864_v16, %v1178_v1  ;;  %v1110_v2 = vld [vmem:[%s1502_s0 + $0xa8] sm:$0xff]   ;;  %v1111_v16 = vld [vmem:[%s1502_s0 + $0xb0] sm:$0xff]  }
  0x22   :  { %v309_v21 = vmax.f32 %v245_v14, 0.0  ;;  %v868_v24 = vunpack.c.l.bf16 %v1105_v12  ;;  %v248_v27 = vadd.f32 %v1192_v7, %v177_v19  ;;  %v249_v28 = vadd.f32 %v1192_v7, %v178_v20 }
  0x23   :  { %v310_v25 = vmax.f32 %v246_v17, 0.0  ;;  %v311_v26 = vmax.f32 %v247_v18, 0.0  ;;  %v180_v31 = vmul.f32 %v865_v22, %v1178_v1  ;;  %v250_v32 = vadd.f32 %v1192_v7, %v179_v23 }
  0x24   :  { %v993_v30 = vpack.c.bf16 %v309_v21, %v308_v15  ;;  %v869_v33 = vunpack.c.h.bf16 %v1105_v12  ;;  %v312_v36 = vmax.f32 %v248_v27, 0.0  ;;  %v313_v37 = vmax.f32 %v249_v28, 0.0  ;;  %v1112_v21 = vld [vmem:[%s1502_s0 + $0xb8] sm:$0xff]  }
  0x25   :  { %v998_v35 = vpack.c.bf16 %v311_v26, %v310_v25  ;;  %v181_v38 = vmul.f32 %v868_v24, %v1178_v1  ;;  %v251_v39 = vadd.f32 %v1192_v7, %v180_v31  ;;  %v314_v40 = vmax.f32 %v250_v32, 0.0 }
  0x26   :  { %1132 = vst [vmem:[%s1505_s3 + $0x60] sm:$0xff] %v993_v30   ;;  %v182_v41 = vmul.f32 %v869_v33, %v1178_v1  ;;  %v872_v42 = vunpack.c.l.bf16 %v1106_v29  ;;  %v1003_v44 = vpack.c.bf16 %v313_v37, %v312_v36  ;;  %v873_v46 = vunpack.c.h.bf16 %v1106_v29 }
  0x27   :  { %1133 = vst [vmem:[%s1505_s3 + $0x68] sm:$0xff] %v998_v35   ;;  %v252_v45 = vadd.f32 %v1192_v7, %v181_v38  ;;  %v876_v47 = vunpack.c.l.bf16 %v1107_v34  ;;  %v315_v48 = vmax.f32 %v251_v39, 0.0  ;;  %v877_v51 = vunpack.c.h.bf16 %v1107_v34  ;;  %v1113_v34 = vld [vmem:[%s1502_s0 + $0xc0] sm:$0xff]  }
  0x28   :  { %v253_v49 = vadd.f32 %v1192_v7, %v182_v41  ;;  %v183_v50 = vmul.f32 %v872_v42, %v1178_v1  ;;  %1134 = vst [vmem:[%s1505_s3 + $0x70] sm:$0xff] %v1003_v44   ;;  %v184_v53 = vmul.f32 %v873_v46, %v1178_v1  ;;  %v880_v55 = vunpack.c.l.bf16 %v1108_v43 }
  0x29   :  { %v316_v52 = vmax.f32 %v252_v45, 0.0  ;;  %v185_v54 = vmul.f32 %v876_v47, %v1178_v1  ;;  %v1008_v57 = vpack.c.bf16 %v315_v48, %v314_v40  ;;  %v186_v60 = vmul.f32 %v877_v51, %v1178_v1  ;;  %v1114_v47 = vld [vmem:[%s1502_s0 + $0xc8] sm:$0xff]  }
  0x2a   :  { %v317_v58 = vmax.f32 %v253_v49, 0.0  ;;  %v254_v59 = vadd.f32 %v1192_v7, %v183_v50  ;;  %v255_v61 = vadd.f32 %v1192_v7, %v184_v53  ;;  %v881_v63 = vunpack.c.h.bf16 %v1108_v43 }
  0x2b   :  { %v256_v62 = vadd.f32 %v1192_v7, %v185_v54  ;;  %v187_v0 = vmul.f32 %v880_v55, %v1178_v1  ;;  %1135 = vst [vmem:[%s1505_s3 + $0x78] sm:$0xff] %v1008_v57   ;;  %v257_v5 = vadd.f32 %v1192_v7, %v186_v60  ;;  %v884_v6 = vunpack.c.l.bf16 %v1109_v56 }
  0x2c   :  { %v1013_v3 = vpack.c.bf16 %v317_v58, %v316_v52  ;;  %v318_v4 = vmax.f32 %v254_v59, 0.0  ;;  %v319_v8 = vmax.f32 %v255_v61, 0.0  ;;  %v188_v10 = vmul.f32 %v881_v63, %v1178_v1  ;;  %v1115_v52 = vld [vmem:[%s1502_s0 + $0xd0] sm:$0xff]   ;;  %v1116_v61 = vld [vmem:[%s1502_s0 + $0xd8] sm:$0xff]  }
  0x2d   :  { %v320_v9 = vmax.f32 %v256_v62, 0.0  ;;  %v258_v11 = vadd.f32 %v1192_v7, %v187_v0  ;;  %v321_v12 = vmax.f32 %v257_v5, 0.0  ;;  %v885_v13 = vunpack.c.h.bf16 %v1109_v56 }
  0x2e   :  { %1136 = vst [vmem:[%s1505_s3 + $0x80] sm:$0xff] %v1013_v3   ;;  %v189_v14 = vmul.f32 %v884_v6, %v1178_v1  ;;  %v888_v15 = vunpack.c.l.bf16 %v1110_v2  ;;  %v1018_v17 = vpack.c.bf16 %v319_v8, %v318_v4  ;;  %v259_v18 = vadd.f32 %v1192_v7, %v188_v10 }
  0x2f   :  { %v322_v19 = vmax.f32 %v258_v11, 0.0  ;;  %v889_v20 = vunpack.c.h.bf16 %v1110_v2  ;;  %v1023_v22 = vpack.c.bf16 %v321_v12, %v320_v9  ;;  %v190_v23 = vmul.f32 %v885_v13, %v1178_v1  ;;  %v1117_v12 = vld [vmem:[%s1502_s0 + $0xe0] sm:$0xff]  }
  0x30   :  { %v260_v24 = vadd.f32 %v1192_v7, %v189_v14  ;;  %v191_v25 = vmul.f32 %v888_v15, %v1178_v1  ;;  %1137 = vst [vmem:[%s1505_s3 + $0x88] sm:$0xff] %v1018_v17   ;;  %v323_v26 = vmax.f32 %v259_v18, 0.0  ;;  %v892_v28 = vunpack.c.l.bf16 %v1111_v16 }
  0x31   :  { %v192_v27 = vmul.f32 %v889_v20, %v1178_v1  ;;  %v893_v29 = vunpack.c.h.bf16 %v1111_v16  ;;  %1138 = vst [vmem:[%s1505_s3 + $0x90] sm:$0xff] %v1023_v22   ;;  %v261_v30 = vadd.f32 %v1192_v7, %v190_v23  ;;  %v896_v33 = vunpack.c.l.bf16 %v1112_v21 }
  0x32   :  { %v324_v31 = vmax.f32 %v260_v24, 0.0  ;;  %v262_v32 = vadd.f32 %v1192_v7, %v191_v25  ;;  %v1028_v35 = vpack.c.bf16 %v323_v26, %v322_v19  ;;  %v193_v37 = vmul.f32 %v892_v28, %v1178_v1 }
  0x33   :  { %v263_v36 = vadd.f32 %v1192_v7, %v192_v27  ;;  %v194_v38 = vmul.f32 %v893_v29, %v1178_v1  ;;  %v325_v39 = vmax.f32 %v261_v30, 0.0  ;;  %v897_v41 = vunpack.c.h.bf16 %v1112_v21  ;;  %v1118_v21 = vld [vmem:[%s1502_s0 + $0xe8] sm:$0xff]  }
  0x34   :  { %v326_v40 = vmax.f32 %v262_v32, 0.0  ;;  %v195_v42 = vmul.f32 %v896_v33, %v1178_v1  ;;  %1139 = vst [vmem:[%s1505_s3 + $0x98] sm:$0xff] %v1028_v35   ;;  %v264_v44 = vadd.f32 %v1192_v7, %v193_v37  ;;  %v900_v46 = vunpack.c.l.bf16 %v1113_v34 }
  0x35   :  { %v327_v43 = vmax.f32 %v263_v36, 0.0  ;;  %v265_v45 = vadd.f32 %v1192_v7, %v194_v38  ;;  %v1033_v48 = vpack.c.bf16 %v325_v39, %v324_v31  ;;  %v196_v49 = vmul.f32 %v897_v41, %v1178_v1  ;;  %v1120_v39 = vld [vmem:[%s1502_s0 + $0xf8] sm:$0xff]  }
  0x36   :  { %v266_v50 = vadd.f32 %v1192_v7, %v195_v42  ;;  %v901_v51 = vunpack.c.h.bf16 %v1113_v34  ;;  %v328_v54 = vmax.f32 %v264_v44, 0.0  ;;  %v197_v56 = vmul.f32 %v900_v46, %v1178_v1  ;;  %v1119_v34 = vld [vmem:[%s1502_s0 + $0xf0] sm:$0xff]  }
  0x37   :  { %v1038_v53 = vpack.c.bf16 %v327_v43, %v326_v40  ;;  %v329_v55 = vmax.f32 %v265_v45, 0.0  ;;  %1140 = vst [vmem:[%s1505_s3 + $0xa0] sm:$0xff] %v1033_v48   ;;  %v267_v57 = vadd.f32 %v1192_v7, %v196_v49  ;;  %v904_v60 = vunpack.c.l.bf16 %v1114_v47 }
  0x38   :  { %v330_v58 = vmax.f32 %v266_v50, 0.0  ;;  %v198_v59 = vmul.f32 %v901_v51, %v1178_v1  ;;  %v268_v63 = vadd.f32 %v1192_v7, %v197_v56  ;;  %v905_v0 = vunpack.c.h.bf16 %v1114_v47 }
  0x39   :  { %1141 = vst [vmem:[%s1505_s3 + $0xa8] sm:$0xff] %v1038_v53   ;;  %v1043_v62 = vpack.c.bf16 %v329_v55, %v328_v54  ;;  %v908_v2 = vunpack.c.l.bf16 %v1115_v52  ;;  %v331_v3 = vmax.f32 %v267_v57, 0.0  ;;  %v199_v5 = vmul.f32 %v904_v60, %v1178_v1 }
  0x3a   :  { %v269_v4 = vadd.f32 %v1192_v7, %v198_v59  ;;  %v909_v6 = vunpack.c.h.bf16 %v1115_v52  ;;  %v332_v8 = vmax.f32 %v268_v63, 0.0  ;;  %v200_v9 = vmul.f32 %v905_v0, %v1178_v1 }
  0x3b   :  { %1142 = vst [vmem:[%s1505_s3 + $0xb0] sm:$0xff] %v1043_v62   ;;  %v201_v10 = vmul.f32 %v908_v2, %v1178_v1  ;;  %v912_v11 = vunpack.c.l.bf16 %v1116_v61  ;;  %v1048_v13 = vpack.c.bf16 %v331_v3, %v330_v58  ;;  %v270_v15 = vadd.f32 %v1192_v7, %v199_v5 }
  0x3c   :  { %v333_v14 = vmax.f32 %v269_v4, 0.0  ;;  %v202_v16 = vmul.f32 %v909_v6, %v1178_v1  ;;  %v271_v17 = vadd.f32 %v1192_v7, %v200_v9  ;;  %v913_v19 = vunpack.c.h.bf16 %v1116_v61 }
  0x3d   :  { %v272_v18 = vadd.f32 %v1192_v7, %v201_v10  ;;  %v203_v20 = vmul.f32 %v912_v11, %v1178_v1  ;;  %1143 = vst [vmem:[%s1505_s3 + $0xb8] sm:$0xff] %v1048_v13   ;;  %v334_v23 = vmax.f32 %v270_v15, 0.0  ;;  %v916_v25 = vunpack.c.l.bf16 %v1117_v12 }
  0x3e   :  { %v1053_v22 = vpack.c.bf16 %v333_v14, %v332_v8  ;;  %v273_v24 = vadd.f32 %v1192_v7, %v202_v16  ;;  %v335_v26 = vmax.f32 %v271_v17, 0.0  ;;  %v204_v28 = vmul.f32 %v913_v19, %v1178_v1 }
  0x3f   :  { %v336_v27 = vmax.f32 %v272_v18, 0.0  ;;  %v274_v29 = vadd.f32 %v1192_v7, %v203_v20  ;;  %v917_v31 = vunpack.c.h.bf16 %v1117_v12  ;;  %v205_v32 = vmul.f32 %v916_v25, %v1178_v1 }
  0x40   :  { %1144 = vst [vmem:[%s1505_s3 + $0xc0] sm:$0xff] %v1053_v22   ;;  %v337_v30 = vmax.f32 %v273_v24, 0.0  ;;  %v920_v33 = vunpack.c.l.bf16 %v1118_v21  ;;  %v1058_v35 = vpack.c.bf16 %v335_v26, %v334_v23  ;;  %v275_v36 = vadd.f32 %v1192_v7, %v204_v28 }
  0x41   :  { %v338_v37 = vmax.f32 %v274_v29, 0.0  ;;  %v921_v38 = vunpack.c.h.bf16 %v1118_v21  ;;  %v206_v41 = vmul.f32 %v917_v31, %v1178_v1  ;;  %v276_v42 = vadd.f32 %v1192_v7, %v205_v32 }
  0x42   :  { %v1063_v40 = vpack.c.bf16 %v337_v30, %v336_v27  ;;  %v207_v43 = vmul.f32 %v920_v33, %v1178_v1  ;;  %1145 = vst [vmem:[%s1505_s3 + $0xc8] sm:$0xff] %v1058_v35   ;;  %v339_v44 = vmax.f32 %v275_v36, 0.0  ;;  %v924_v46 = vunpack.c.l.bf16 %v1119_v34 }
  0x43   :  { %v208_v45 = vmul.f32 %v921_v38, %v1178_v1  ;;  %v925_v47 = vunpack.c.h.bf16 %v1119_v34  ;;  %v277_v48 = vadd.f32 %v1192_v7, %v206_v41  ;;  %v340_v49 = vmax.f32 %v276_v42, 0.0 }
  0x44   :  { %1146 = vst [vmem:[%s1505_s3 + $0xd0] sm:$0xff] %v1063_v40   ;;  %v278_v50 = vadd.f32 %v1192_v7, %v207_v43  ;;  %v928_v51 = vunpack.c.l.bf16 %v1120_v39  ;;  %v1068_v52 = vpack.c.bf16 %v339_v44, %v338_v37  ;;  %v209_v54 = vmul.f32 %v924_v46, %v1178_v1 }
  0x45   :  { %v279_v53 = vadd.f32 %v1192_v7, %v208_v45  ;;  %v210_v55 = vmul.f32 %v925_v47, %v1178_v1  ;;  %v341_v56 = vmax.f32 %v277_v48, 0.0  ;;  %v929_v58 = vunpack.c.h.bf16 %v1120_v39 }
  0x46   :  { %v342_v57 = vmax.f32 %v278_v50, 0.0  ;;  %v211_v59 = vmul.f32 %v928_v51, %v1178_v1  ;;  %1147 = vst [vmem:[%s1505_s3 + $0xd8] sm:$0xff] %v1068_v52   ;;  %v280_v61 = vadd.f32 %v1192_v7, %v209_v54 }
  0x47   :  { %v343_v60 = vmax.f32 %v279_v53, 0.0  ;;  %v281_v62 = vadd.f32 %v1192_v7, %v210_v55  ;;  %v1073_v63 = vpack.c.bf16 %v341_v56, %v340_v49  ;;  %v212_v0 = vmul.f32 %v929_v58, %v1178_v1 }
  0x48   :  { %v282_v2 = vadd.f32 %v1192_v7, %v211_v59  ;;  %v344_v4 = vmax.f32 %v280_v61, 0.0 }
  0x49   :  { %v1078_v3 = vpack.c.bf16 %v343_v60, %v342_v57  ;;  %v345_v5 = vmax.f32 %v281_v62, 0.0  ;;  %1148 = vst [vmem:[%s1505_s3 + $0xe0] sm:$0xff] %v1073_v63   ;;  %v283_v6 = vadd.f32 %v1192_v7, %v212_v0 }
  0x4a   :  { %v346_v8 = vmax.f32 %v282_v2, 0.0 }
  0x4b   :  { %1149 = vst [vmem:[%s1505_s3 + $0xe8] sm:$0xff] %v1078_v3   ;;  %v1083_v9 = vpack.c.bf16 %v345_v5, %v344_v4  ;;  %v347_v10 = vmax.f32 %v283_v6, 0.0 }
  0x4d   :  { %1150 = vst [vmem:[%s1505_s3 + $0xf0] sm:$0xff] %v1083_v9   ;;  %v1088_v1 = vpack.c.bf16 %v347_v10, %v346_v8 }
  0x4f   :  { %1151 = vst [vmem:[%s1505_s3 + $0xf8] sm:$0xff] %v1088_v1  }

// kernel: res_disparity_refinement_forward.16
= control target key start
LH: loop header
LB: loop body
LE: loop exit
PB: predicated region body
PF: predicated region fallthrough
CT: control target
= control target key end

     0   :  { %s2134_s1 = inlined_call_operand.vmem [shape: bf16[128,128], index: 1, kind: input, shape index: {}]   ;;  %s2135_s0 = inlined_call_operand.vmem [shape: bf16[512,128], index: 0, kind: input, shape index: {}]   ;;  %s2136_s2 = inlined_call_operand.vmem [shape: bf16[512,128], index: 2, kind: output, shape index: {0}]   ;;  %s2137_s3 = inlined_call_operand.vmem [shape: f32[1,1,128], index: 3, kind: output, shape index: {1}]   ;;  %s2138_s4 = inlined_call_operand.vmem [shape: f32[1,1,128], index: 4, kind: output, shape index: {2}]  }
   0x1   :  { %v1655_v0 = vld [vmem:[%s2134_s1] sm:$0xff]   ;;  %v1656_v1 = vld [vmem:[%s2134_s1 + $0x8] sm:$0xff]   ;;  %v1657_v2 = vld [vmem:[%s2134_s1 + $0x10] sm:$0xff]  }
   0x2   :  { %1559 = vmatprep.subr.bf16.mxu0 %v1655_v0  ;;  %1639 = vmatprep.subr.bf16.mxu1 %v1655_v0  ;;  %v1658_v3 = vld [vmem:[%s2134_s1 + $0x18] sm:$0xff]   ;;  %v1663_v4 = vld [vmem:[%s2135_s0] sm:$0xff]   ;;  %v1660_v6 = vld [vmem:[%s2134_s1 + $0x28] sm:$0xff]  }
   0x3   :  { %1560 = vmatpush3.bf16.msra.mxu0 %v1655_v0  ;;  %1647 = vmatpush3.bf16.msra.mxu1 %v1655_v0  ;;  %v1659_v5 = vld [vmem:[%s2134_s1 + $0x20] sm:$0xff]   ;;  %v1661_v7 = vld [vmem:[%s2134_s1 + $0x30] sm:$0xff]   ;;  %v1662_v8 = vld [vmem:[%s2134_s1 + $0x38] sm:$0xff]  }
   0x4   :  { %1561 = vmatprep.subr.bf16.mxu0 %v1656_v1  ;;  %1640 = vmatprep.subr.bf16.mxu1 %v1656_v1  ;;  %v1679_v9 = vld [vmem:[%s2135_s0 + $0x80] sm:$0xff]   ;;  %v1664_v10 = vld [vmem:[%s2135_s0 + $0x8] sm:$0xff]   ;;  %v1665_v11 = vld [vmem:[%s2135_s0 + $0x10] sm:$0xff]  }
   0x5   :  { %1575 = vmatprep.mubr.bf16.mxu0 %v1663_v4  ;;  %1607 = vmatprep.mubr.bf16.mxu1 %v1679_v9  ;;  %v1680_v12 = vld [vmem:[%s2135_s0 + $0x88] sm:$0xff]   ;;  %v1681_v13 = vld [vmem:[%s2135_s0 + $0x90] sm:$0xff]   ;;  %v1666_v14 = vld [vmem:[%s2135_s0 + $0x18] sm:$0xff]  }
   0x6   :  { %v1667_v15 = vld [vmem:[%s2135_s0 + $0x20] sm:$0xff]   ;;  %v1682_v16 = vld [vmem:[%s2135_s0 + $0x98] sm:$0xff]   ;;  %v1668_v18 = vld [vmem:[%s2135_s0 + $0x28] sm:$0xff]  }
   0x7   :  { %1562 = vmatpush3.bf16.msra.mxu0 %v1656_v1  ;;  %1648 = vmatpush3.bf16.msra.mxu1 %v1656_v1  ;;  %v1683_v17 = vld [vmem:[%s2135_s0 + $0xa0] sm:$0xff]   ;;  %v1684_v19 = vld [vmem:[%s2135_s0 + $0xa8] sm:$0xff]   ;;  %v1669_v20 = vld [vmem:[%s2135_s0 + $0x30] sm:$0xff]  }
   0x8   :  { %1563 = vmatprep.subr.bf16.mxu0 %v1657_v2  ;;  %1641 = vmatprep.subr.bf16.mxu1 %v1657_v2  ;;  %v1685_v21 = vld [vmem:[%s2135_s0 + $0xb0] sm:$0xff]   ;;  %v1670_v22 = vld [vmem:[%s2135_s0 + $0x38] sm:$0xff]   ;;  %v1671_v24 = vld [vmem:[%s2135_s0 + $0x40] sm:$0xff]  }
   0x9   :  { %v1686_v23 = vld [vmem:[%s2135_s0 + $0xb8] sm:$0xff]   ;;  %v1687_v25 = vld [vmem:[%s2135_s0 + $0xc0] sm:$0xff]   ;;  %v1672_v26 = vld [vmem:[%s2135_s0 + $0x48] sm:$0xff]  }
   0xa   :  { %v1688_v27 = vld [vmem:[%s2135_s0 + $0xc8] sm:$0xff]   ;;  %v1673_v28 = vld [vmem:[%s2135_s0 + $0x50] sm:$0xff]   ;;  %v1674_v30 = vld [vmem:[%s2135_s0 + $0x58] sm:$0xff]  }
   0xb   :  { %1564 = vmatpush3.bf16.msra.mxu0 %v1657_v2  ;;  %1649 = vmatpush3.bf16.msra.mxu1 %v1657_v2  ;;  %v1689_v29 = vld [vmem:[%s2135_s0 + $0xd0] sm:$0xff]   ;;  %v1690_v31 = vld [vmem:[%s2135_s0 + $0xd8] sm:$0xff]   ;;  %v1675_v32 = vld [vmem:[%s2135_s0 + $0x60] sm:$0xff]  }
   0xc   :  { %1565 = vmatprep.subr.bf16.mxu0 %v1658_v3  ;;  %1642 = vmatprep.subr.bf16.mxu1 %v1658_v3  ;;  %v1691_v33 = vld [vmem:[%s2135_s0 + $0xe0] sm:$0xff]   ;;  %v1676_v34 = vld [vmem:[%s2135_s0 + $0x68] sm:$0xff]   ;;  %v1677_v36 = vld [vmem:[%s2135_s0 + $0x70] sm:$0xff]  }
   0xd   :  { %v1692_v35 = vld [vmem:[%s2135_s0 + $0xe8] sm:$0xff]   ;;  %v1693_v37 = vld [vmem:[%s2135_s0 + $0xf0] sm:$0xff]   ;;  %v1678_v38 = vld [vmem:[%s2135_s0 + $0x78] sm:$0xff]  }
   0xe   :  { %v1694_v39 = vld [vmem:[%s2135_s0 + $0xf8] sm:$0xff]  }
   0xf   :  { %1566 = vmatpush3.bf16.msra.mxu0 %v1658_v3  ;;  %1650 = vmatpush3.bf16.msra.mxu1 %v1658_v3 }
  0x10   :  { %1567 = vmatprep.subr.bf16.mxu0 %v1659_v5  ;;  %1643 = vmatprep.subr.bf16.mxu1 %v1659_v5 }
  0x13   :  { %1568 = vmatpush3.bf16.msra.mxu0 %v1659_v5  ;;  %1651 = vmatpush3.bf16.msra.mxu1 %v1659_v5 }
  0x14   :  { %1569 = vmatprep.subr.bf16.mxu0 %v1660_v6  ;;  %1644 = vmatprep.subr.bf16.mxu1 %v1660_v6 }
  0x17   :  { %1570 = vmatpush3.bf16.msra.mxu0 %v1660_v6  ;;  %1652 = vmatpush3.bf16.msra.mxu1 %v1660_v6 }
  0x18   :  { %1571 = vmatprep.subr.bf16.mxu0 %v1661_v7  ;;  %1645 = vmatprep.subr.bf16.mxu1 %v1661_v7 }
  0x1b   :  { %1572 = vmatpush3.bf16.msra.mxu0 %v1661_v7  ;;  %1653 = vmatpush3.bf16.msra.mxu1 %v1661_v7 }
  0x1c   :  { %1573 = vmatprep.subr.bf16.mxu0 %v1662_v8  ;;  %1646 = vmatprep.subr.bf16.mxu1 %v1662_v8 }
  0x1f   :  { %1574 = vmatpush3.bf16.msra.mxu0 %v1662_v8  ;;  %1654 = vmatpush3.bf16.msra.mxu1 %v1662_v8 }
  0x22   :  { %1576 = vmatmul.mubr.bf16.vlgmr.msra.gmra.mrb[0].mxu0 %v1664_v10  ;;  %1608 = vmatmul.mubr.bf16.vlgmr.msra.gmra.mrb[0].mxu1 %v1680_v12 }
  0x23   :  { %1579 = vmatprep.mubr.bf16.mxu0 %v1665_v11  ;;  %1611 = vmatprep.mubr.bf16.mxu1 %v1681_v13 }
  0x2a   :  { %1580 = vmatmul.mubr.bf16.gmra.mrb[4].mxu0 %v1666_v14  ;;  %1612 = vmatmul.mubr.bf16.gmra.mrb[4].mxu1 %v1682_v16 }
  0x2b   :  { %1583 = vmatprep.mubr.bf16.mxu0 %v1667_v15  ;;  %1615 = vmatprep.mubr.bf16.mxu1 %v1683_v17 }
  0x32   :  { %1584 = vmatmul.mubr.bf16.gmra.mrb[8].mxu0 %v1668_v18  ;;  %1616 = vmatmul.mubr.bf16.gmra.mrb[8].mxu1 %v1684_v19 }
  0x33   :  { %1587 = vmatprep.mubr.bf16.mxu0 %v1669_v20  ;;  %1619 = vmatprep.mubr.bf16.mxu1 %v1685_v21 }
  0x3a   :  { %1588 = vmatmul.mubr.bf16.gmra.mrb[12].mxu0 %v1670_v22  ;;  %1620 = vmatmul.mubr.bf16.gmra.mrb[12].mxu1 %v1686_v23 }
  0x3b   :  { %1591 = vmatprep.mubr.bf16.mxu0 %v1671_v24  ;;  %1623 = vmatprep.mubr.bf16.mxu1 %v1687_v25 }
  0x42   :  { %1592 = vmatmul.mubr.bf16.gmra.mrb[16].mxu0 %v1672_v26  ;;  %1624 = vmatmul.mubr.bf16.gmra.mrb[16].mxu1 %v1688_v27 }
  0x43   :  { %1595 = vmatprep.mubr.bf16.mxu0 %v1673_v28  ;;  %1627 = vmatprep.mubr.bf16.mxu1 %v1689_v29 }
  0x4a   :  { %1596 = vmatmul.mubr.bf16.gmra.mrb[20].mxu0 %v1674_v30  ;;  %1628 = vmatmul.mubr.bf16.gmra.mrb[20].mxu1 %v1690_v31 }
  0x4b   :  { %1599 = vmatprep.mubr.bf16.mxu0 %v1675_v32  ;;  %1631 = vmatprep.mubr.bf16.mxu1 %v1691_v33 }
  0x52   :  { %1600 = vmatmul.mubr.bf16.gmra.mrb[24].mxu0 %v1676_v34  ;;  %1632 = vmatmul.mubr.bf16.gmra.mrb[24].mxu1 %v1692_v35 }
  0x53   :  { %1603 = vmatprep.mubr.bf16.mxu0 %v1677_v36  ;;  %1635 = vmatprep.mubr.bf16.mxu1 %v1693_v37 }
  0x5a   :  { %1604 = vmatmul.mubr.bf16.gmra.mrb[28].mxu0 %v1678_v38  ;;  %1636 = vmatmul.mubr.bf16.gmra.mrb[28].mxu1 %v1694_v39 }
  0xf5   :  { %v1577_v40 = vpop.f32.mrb[0].mxu0  ;;  %v1840_v41 = vpop.f32.mrb[0].mxu1 }
  0xf6   :  { %v369_v42 = vpop.f32.mrb[1].mxu0  ;;  %v1842_v43 = vpop.f32.mrb[1].mxu1  ;;  %v1016_v55 = vmul.f32 %v1577_v40, %v1577_v40 }
  0xf7   :  { %v1578_v44 = vpop.f32.mrb[2].mxu0  ;;  %v1844_v45 = vpop.f32.mrb[2].mxu1  ;;  %v1014_v46 = vmul.f32 %v369_v42, %v369_v42 }
  0xf8   :  { %v1336_v47 = vpack.c.bf16 %v1578_v44, %v1577_v40  ;;  %v372_v48 = vpop.f32.mrb[3].mxu0  ;;  %v1416_v49 = vpack.c.bf16 %v1844_v45, %v1840_v41  ;;  %v1848_v50 = vpop.f32.mrb[3].mxu1  ;;  %v1017_v58 = vmul.f32 %v1578_v44, %v1578_v44 }
  0xf9   :  { %v1331_v51 = vpack.c.bf16 %v372_v48, %v369_v42  ;;  %v944_v52 = vadd.f32 %v372_v48, %v369_v42  ;;  %v1015_v53 = vmul.f32 %v372_v48, %v372_v48  ;;  %v1411_v54 = vpack.c.bf16 %v1848_v50, %v1842_v43 }
  0xfa   :  { %1488 = vst [vmem:[%s2136_s2 + $0x8] sm:$0xff] %v1336_v47   ;;  %1504 = vst [vmem:[%s2136_s2 + $0x88] sm:$0xff] %v1416_v49  }
  0xfb   :  { %1332 = vst [vmem:[%s2136_s2] sm:$0xff] %v1331_v51   ;;  %v945_v56 = vadd.f32 %v1577_v40, %v944_v52  ;;  %v1078_v57 = vadd.f32 %v1015_v53, %v1014_v46  ;;  %1503 = vst [vmem:[%s2136_s2 + $0x80] sm:$0xff] %v1411_v54  }
  0xfd   :  { %v1079_v59 = vadd.f32 %v1078_v57, %v1016_v55  ;;  %v1581_v60 = vpop.f32.mrb[4].mxu0  ;;  %v946_v61 = vadd.f32 %v1578_v44, %v945_v56  ;;  %v1864_v62 = vpop.f32.mrb[4].mxu1 }
  0xfe   :  { %v385_v63 = vpop.f32.mrb[5].mxu0  ;;  %v1866_v0 = vpop.f32.mrb[5].mxu1  ;;  %v1020_v15 = vmul.f32 %v1581_v60, %v1581_v60 }
  0xff   :  { %v947_v1 = vadd.f32 %v946_v61, %v385_v63  ;;  %v1018_v2 = vmul.f32 %v385_v63, %v385_v63  ;;  %v1080_v3 = vadd.f32 %v1079_v59, %v1017_v58  ;;  %v1582_v4 = vpop.f32.mrb[6].mxu0  ;;  %v1868_v5 = vpop.f32.mrb[6].mxu1 }
 0x100   :  { %v1346_v6 = vpack.c.bf16 %v1582_v4, %v1581_v60  ;;  %v388_v7 = vpop.f32.mrb[7].mxu0  ;;  %v1426_v8 = vpack.c.bf16 %v1868_v5, %v1864_v62  ;;  %v1872_v9 = vpop.f32.mrb[7].mxu1  ;;  %v1021_v18 = vmul.f32 %v1582_v4, %v1582_v4 }
 0x101   :  { %v1081_v10 = vadd.f32 %v1080_v3, %v1018_v2  ;;  %v1341_v11 = vpack.c.bf16 %v388_v7, %v385_v63  ;;  %v948_v12 = vadd.f32 %v947_v1, %v388_v7  ;;  %v1019_v13 = vmul.f32 %v388_v7, %v388_v7 }
 0x102   :  { %1490 = vst [vmem:[%s2136_s2 + $0x18] sm:$0xff] %v1346_v6   ;;  %1506 = vst [vmem:[%s2136_s2 + $0x98] sm:$0xff] %v1426_v8   ;;  %v1421_v14 = vpack.c.bf16 %v1872_v9, %v1866_v0 }
 0x103   :  { %1489 = vst [vmem:[%s2136_s2 + $0x10] sm:$0xff] %v1341_v11   ;;  %v949_v16 = vadd.f32 %v1581_v60, %v948_v12  ;;  %v1082_v17 = vadd.f32 %v1081_v10, %v1019_v13 }
 0x104   :  { %1505 = vst [vmem:[%s2136_s2 + $0x90] sm:$0xff] %v1421_v14  }
 0x105   :  { %v1083_v19 = vadd.f32 %v1082_v17, %v1020_v15  ;;  %v1585_v20 = vpop.f32.mrb[8].mxu0  ;;  %v950_v21 = vadd.f32 %v1582_v4, %v949_v16  ;;  %v1888_v22 = vpop.f32.mrb[8].mxu1 }
 0x106   :  { %v401_v23 = vpop.f32.mrb[9].mxu0  ;;  %v1890_v24 = vpop.f32.mrb[9].mxu1  ;;  %v1024_v39 = vmul.f32 %v1585_v20, %v1585_v20 }
 0x107   :  { %v951_v25 = vadd.f32 %v950_v21, %v401_v23  ;;  %v1022_v26 = vmul.f32 %v401_v23, %v401_v23  ;;  %v1084_v27 = vadd.f32 %v1083_v19, %v1021_v18  ;;  %v1586_v28 = vpop.f32.mrb[10].mxu0  ;;  %v1892_v29 = vpop.f32.mrb[10].mxu1 }
 0x108   :  { %v1356_v30 = vpack.c.bf16 %v1586_v28, %v1585_v20  ;;  %v404_v31 = vpop.f32.mrb[11].mxu0  ;;  %v1436_v32 = vpack.c.bf16 %v1892_v29, %v1888_v22  ;;  %v1896_v33 = vpop.f32.mrb[11].mxu1  ;;  %v1025_v44 = vmul.f32 %v1586_v28, %v1586_v28 }
 0x109   :  { %v1085_v34 = vadd.f32 %v1084_v27, %v1022_v26  ;;  %v1351_v35 = vpack.c.bf16 %v404_v31, %v401_v23  ;;  %v952_v36 = vadd.f32 %v951_v25, %v404_v31  ;;  %v1023_v37 = vmul.f32 %v404_v31, %v404_v31 }
 0x10a   :  { %1492 = vst [vmem:[%s2136_s2 + $0x28] sm:$0xff] %v1356_v30   ;;  %1508 = vst [vmem:[%s2136_s2 + $0xa8] sm:$0xff] %v1436_v32   ;;  %v1431_v38 = vpack.c.bf16 %v1896_v33, %v1890_v24 }
 0x10b   :  { %1491 = vst [vmem:[%s2136_s2 + $0x20] sm:$0xff] %v1351_v35   ;;  %v953_v40 = vadd.f32 %v1585_v20, %v952_v36  ;;  %v1086_v42 = vadd.f32 %v1085_v34, %v1023_v37 }
 0x10c   :  { %1507 = vst [vmem:[%s2136_s2 + $0xa0] sm:$0xff] %v1431_v38  }
 0x10d   :  { %v1087_v46 = vadd.f32 %v1086_v42, %v1024_v39  ;;  %v1589_v47 = vpop.f32.mrb[12].mxu0  ;;  %v954_v48 = vadd.f32 %v1586_v28, %v953_v40  ;;  %v1912_v49 = vpop.f32.mrb[12].mxu1 }
 0x10e   :  { %v417_v51 = vpop.f32.mrb[13].mxu0  ;;  %v1914_v52 = vpop.f32.mrb[13].mxu1  ;;  %v1028_v6 = vmul.f32 %v1589_v47, %v1589_v47 }
 0x10f   :  { %v955_v53 = vadd.f32 %v954_v48, %v417_v51  ;;  %v1026_v54 = vmul.f32 %v417_v51, %v417_v51  ;;  %v1088_v55 = vadd.f32 %v1087_v46, %v1025_v44  ;;  %v1590_v56 = vpop.f32.mrb[14].mxu0  ;;  %v1916_v57 = vpop.f32.mrb[14].mxu1 }
 0x110   :  { %v1366_v58 = vpack.c.bf16 %v1590_v56, %v1589_v47  ;;  %v420_v59 = vpop.f32.mrb[15].mxu0  ;;  %v1446_v60 = vpack.c.bf16 %v1916_v57, %v1912_v49  ;;  %v1920_v61 = vpop.f32.mrb[15].mxu1  ;;  %v1029_v10 = vmul.f32 %v1590_v56, %v1590_v56 }
 0x111   :  { %v1089_v63 = vadd.f32 %v1088_v55, %v1026_v54  ;;  %v1361_v1 = vpack.c.bf16 %v420_v59, %v417_v51  ;;  %v956_v2 = vadd.f32 %v955_v53, %v420_v59  ;;  %v1027_v3 = vmul.f32 %v420_v59, %v420_v59 }
 0x112   :  { %1494 = vst [vmem:[%s2136_s2 + $0x38] sm:$0xff] %v1366_v58   ;;  %1510 = vst [vmem:[%s2136_s2 + $0xb8] sm:$0xff] %v1446_v60   ;;  %v1441_v4 = vpack.c.bf16 %v1920_v61, %v1914_v52 }
 0x113   :  { %1493 = vst [vmem:[%s2136_s2 + $0x30] sm:$0xff] %v1361_v1   ;;  %v957_v7 = vadd.f32 %v1589_v47, %v956_v2  ;;  %v1090_v8 = vadd.f32 %v1089_v63, %v1027_v3 }
 0x114   :  { %1509 = vst [vmem:[%s2136_s2 + $0xb0] sm:$0xff] %v1441_v4  }
 0x115   :  { %v1091_v11 = vadd.f32 %v1090_v8, %v1028_v6  ;;  %v1593_v12 = vpop.f32.mrb[16].mxu0  ;;  %v958_v13 = vadd.f32 %v1590_v56, %v957_v7  ;;  %v1936_v14 = vpop.f32.mrb[16].mxu1 }
 0x116   :  { %v433_v15 = vpop.f32.mrb[17].mxu0  ;;  %v1938_v16 = vpop.f32.mrb[17].mxu1  ;;  %v1032_v35 = vmul.f32 %v1593_v12, %v1593_v12 }
 0x117   :  { %v959_v17 = vadd.f32 %v958_v13, %v433_v15  ;;  %v1030_v18 = vmul.f32 %v433_v15, %v433_v15  ;;  %v1092_v19 = vadd.f32 %v1091_v11, %v1029_v10  ;;  %v1594_v20 = vpop.f32.mrb[18].mxu0  ;;  %v1940_v21 = vpop.f32.mrb[18].mxu1 }
 0x118   :  { %v1376_v23 = vpack.c.bf16 %v1594_v20, %v1593_v12  ;;  %v436_v25 = vpop.f32.mrb[19].mxu0  ;;  %v1456_v26 = vpack.c.bf16 %v1940_v21, %v1936_v14  ;;  %v1944_v27 = vpop.f32.mrb[19].mxu1  ;;  %v1033_v38 = vmul.f32 %v1594_v20, %v1594_v20 }
 0x119   :  { %v1093_v28 = vadd.f32 %v1092_v19, %v1030_v18  ;;  %v1371_v30 = vpack.c.bf16 %v436_v25, %v433_v15  ;;  %v960_v31 = vadd.f32 %v959_v17, %v436_v25  ;;  %v1031_v32 = vmul.f32 %v436_v25, %v436_v25 }
 0x11a   :  { %1496 = vst [vmem:[%s2136_s2 + $0x48] sm:$0xff] %v1376_v23   ;;  %1512 = vst [vmem:[%s2136_s2 + $0xc8] sm:$0xff] %v1456_v26   ;;  %v1451_v34 = vpack.c.bf16 %v1944_v27, %v1938_v16 }
 0x11b   :  { %1495 = vst [vmem:[%s2136_s2 + $0x40] sm:$0xff] %v1371_v30   ;;  %v961_v36 = vadd.f32 %v1593_v12, %v960_v31  ;;  %v1094_v37 = vadd.f32 %v1093_v28, %v1031_v32 }
 0x11c   :  { %1511 = vst [vmem:[%s2136_s2 + $0xc0] sm:$0xff] %v1451_v34  }
 0x11d   :  { %v1095_v39 = vadd.f32 %v1094_v37, %v1032_v35  ;;  %v1597_v40 = vpop.f32.mrb[20].mxu0  ;;  %v962_v42 = vadd.f32 %v1594_v20, %v961_v36  ;;  %v1960_v44 = vpop.f32.mrb[20].mxu1 }
 0x11e   :  { %v449_v46 = vpop.f32.mrb[21].mxu0  ;;  %v1962_v47 = vpop.f32.mrb[21].mxu1  ;;  %v1036_v6 = vmul.f32 %v1597_v40, %v1597_v40 }
 0x11f   :  { %v963_v48 = vadd.f32 %v962_v42, %v449_v46  ;;  %v1034_v51 = vmul.f32 %v449_v46, %v449_v46  ;;  %v1096_v53 = vadd.f32 %v1095_v39, %v1033_v38  ;;  %v1598_v54 = vpop.f32.mrb[22].mxu0  ;;  %v1964_v55 = vpop.f32.mrb[22].mxu1 }
 0x120   :  { %v1386_v56 = vpack.c.bf16 %v1598_v54, %v1597_v40  ;;  %v452_v58 = vpop.f32.mrb[23].mxu0  ;;  %v1466_v59 = vpack.c.bf16 %v1964_v55, %v1960_v44  ;;  %v1968_v60 = vpop.f32.mrb[23].mxu1  ;;  %v1037_v10 = vmul.f32 %v1598_v54, %v1598_v54 }
 0x121   :  { %v1097_v63 = vadd.f32 %v1096_v53, %v1034_v51  ;;  %v1381_v1 = vpack.c.bf16 %v452_v58, %v449_v46  ;;  %v964_v2 = vadd.f32 %v963_v48, %v452_v58  ;;  %v1035_v3 = vmul.f32 %v452_v58, %v452_v58 }
 0x122   :  { %1498 = vst [vmem:[%s2136_s2 + $0x58] sm:$0xff] %v1386_v56   ;;  %1514 = vst [vmem:[%s2136_s2 + $0xd8] sm:$0xff] %v1466_v59   ;;  %v1461_v4 = vpack.c.bf16 %v1968_v60, %v1962_v47 }
 0x123   :  { %1497 = vst [vmem:[%s2136_s2 + $0x50] sm:$0xff] %v1381_v1   ;;  %v965_v7 = vadd.f32 %v1597_v40, %v964_v2  ;;  %v1098_v8 = vadd.f32 %v1097_v63, %v1035_v3 }
 0x124   :  { %1513 = vst [vmem:[%s2136_s2 + $0xd0] sm:$0xff] %v1461_v4  }
 0x125   :  { %v1099_v11 = vadd.f32 %v1098_v8, %v1036_v6  ;;  %v1601_v12 = vpop.f32.mrb[24].mxu0  ;;  %v966_v13 = vadd.f32 %v1598_v54, %v965_v7  ;;  %v1984_v15 = vpop.f32.mrb[24].mxu1 }
 0x126   :  { %v465_v17 = vpop.f32.mrb[25].mxu0  ;;  %v1986_v18 = vpop.f32.mrb[25].mxu1  ;;  %v1040_v39 = vmul.f32 %v1601_v12, %v1601_v12 }
 0x127   :  { %v967_v19 = vadd.f32 %v966_v13, %v465_v17  ;;  %v1038_v20 = vmul.f32 %v465_v17, %v465_v17  ;;  %v1100_v23 = vadd.f32 %v1099_v11, %v1037_v10  ;;  %v1602_v25 = vpop.f32.mrb[26].mxu0  ;;  %v1988_v26 = vpop.f32.mrb[26].mxu1 }
 0x128   :  { %v1396_v28 = vpack.c.bf16 %v1602_v25, %v1601_v12  ;;  %v468_v30 = vpop.f32.mrb[27].mxu0  ;;  %v1476_v31 = vpack.c.bf16 %v1988_v26, %v1984_v15  ;;  %v1992_v32 = vpop.f32.mrb[27].mxu1  ;;  %v1041_v46 = vmul.f32 %v1602_v25, %v1602_v25 }
 0x129   :  { %v1101_v34 = vadd.f32 %v1100_v23, %v1038_v20  ;;  %v1391_v35 = vpack.c.bf16 %v468_v30, %v465_v17  ;;  %v968_v36 = vadd.f32 %v967_v19, %v468_v30  ;;  %v1039_v37 = vmul.f32 %v468_v30, %v468_v30 }
 0x12a   :  { %1500 = vst [vmem:[%s2136_s2 + $0x68] sm:$0xff] %v1396_v28   ;;  %1516 = vst [vmem:[%s2136_s2 + $0xe8] sm:$0xff] %v1476_v31   ;;  %v1471_v38 = vpack.c.bf16 %v1992_v32, %v1986_v18  ;;  %v1046_v31 = vmul.f32 %v1842_v43, %v1842_v43 }
 0x12b   :  { %1499 = vst [vmem:[%s2136_s2 + $0x60] sm:$0xff] %v1391_v35   ;;  %v969_v40 = vadd.f32 %v1601_v12, %v968_v36  ;;  %v1102_v42 = vadd.f32 %v1101_v34, %v1039_v37 }
 0x12c   :  { %1515 = vst [vmem:[%s2136_s2 + $0xe0] sm:$0xff] %v1471_v38   ;;  %v1047_v38 = vmul.f32 %v1848_v50, %v1848_v50 }
 0x12d   :  { %v1103_v48 = vadd.f32 %v1102_v42, %v1040_v39  ;;  %v1605_v51 = vpop.f32.mrb[28].mxu0  ;;  %v970_v53 = vadd.f32 %v1602_v25, %v969_v40  ;;  %v2008_v54 = vpop.f32.mrb[28].mxu1  ;;  %v1048_v39 = vmul.f32 %v1840_v41, %v1840_v41 }
 0x12e   :  { %v481_v56 = vpop.f32.mrb[29].mxu0  ;;  %v2010_v58 = vpop.f32.mrb[29].mxu1  ;;  %v1044_v19 = vmul.f32 %v1605_v51, %v1605_v51 }
 0x12f   :  { %v971_v59 = vadd.f32 %v970_v53, %v481_v56  ;;  %v1042_v63 = vmul.f32 %v481_v56, %v481_v56  ;;  %v1104_v1 = vadd.f32 %v1103_v48, %v1041_v46  ;;  %v1606_v2 = vpop.f32.mrb[30].mxu0  ;;  %v2012_v3 = vpop.f32.mrb[30].mxu1  ;;  %v1049_v46 = vmul.f32 %v1844_v45, %v1844_v45 }
 0x130   :  { %v1406_v4 = vpack.c.bf16 %v1606_v2, %v1605_v51  ;;  %v484_v6 = vpop.f32.mrb[31].mxu0  ;;  %v1486_v7 = vpack.c.bf16 %v2012_v3, %v2008_v54  ;;  %v2016_v8 = vpop.f32.mrb[31].mxu1  ;;  %v1045_v25 = vmul.f32 %v1606_v2, %v1606_v2 }
 0x131   :  { %v1105_v10 = vadd.f32 %v1104_v1, %v1042_v63  ;;  %v1401_v11 = vpack.c.bf16 %v484_v6, %v481_v56  ;;  %v972_v12 = vadd.f32 %v971_v59, %v484_v6  ;;  %v1043_v13 = vmul.f32 %v484_v6, %v484_v6 }
 0x132   :  { %1502 = vst [vmem:[%s2136_s2 + $0x78] sm:$0xff] %v1406_v4   ;;  %1518 = vst [vmem:[%s2136_s2 + $0xf8] sm:$0xff] %v1486_v7   ;;  %v1481_v17 = vpack.c.bf16 %v2016_v8, %v2010_v58  ;;  %v1051_v63 = vmul.f32 %v1872_v9, %v1872_v9 }
 0x133   :  { %1501 = vst [vmem:[%s2136_s2 + $0x70] sm:$0xff] %v1401_v11   ;;  %v973_v20 = vadd.f32 %v1605_v51, %v972_v12  ;;  %v1106_v23 = vadd.f32 %v1105_v10, %v1043_v13  ;;  %v1055_v12 = vmul.f32 %v1896_v33, %v1896_v33 }
 0x134   :  { %1517 = vst [vmem:[%s2136_s2 + $0xf0] sm:$0xff] %v1481_v17  }
 0x135   :  { %v1107_v28 = vadd.f32 %v1106_v23, %v1044_v19  ;;  %v974_v30 = vadd.f32 %v1606_v2, %v973_v20 }
 0x137   :  { %v975_v34 = vadd.f32 %v974_v30, %v1842_v43  ;;  %v1108_v35 = vadd.f32 %v1107_v28, %v1045_v25  ;;  %v1050_v43 = vmul.f32 %v1866_v0, %v1866_v0  ;;  %v1059_v30 = vmul.f32 %v1920_v61, %v1920_v61 }
 0x139   :  { %v1109_v36 = vadd.f32 %v1108_v35, %v1046_v31  ;;  %v976_v37 = vadd.f32 %v975_v34, %v1848_v50 }
 0x13b   :  { %v977_v40 = vadd.f32 %v1840_v41, %v976_v37  ;;  %v1110_v42 = vadd.f32 %v1109_v36, %v1047_v38  ;;  %v1052_v41 = vmul.f32 %v1864_v62, %v1864_v62 }
 0x13d   :  { %v1111_v48 = vadd.f32 %v1110_v42, %v1048_v39  ;;  %v978_v51 = vadd.f32 %v1844_v45, %v977_v40  ;;  %v1053_v45 = vmul.f32 %v1868_v5, %v1868_v5  ;;  %v1063_v40 = vmul.f32 %v1944_v27, %v1944_v27 }
 0x13f   :  { %v979_v53 = vadd.f32 %v978_v51, %v1866_v0  ;;  %v1112_v56 = vadd.f32 %v1111_v48, %v1049_v46  ;;  %v1054_v0 = vmul.f32 %v1890_v24, %v1890_v24 }
 0x141   :  { %v1113_v59 = vadd.f32 %v1112_v56, %v1050_v43  ;;  %v980_v50 = vadd.f32 %v979_v53, %v1872_v9 }
 0x143   :  { %v981_v1 = vadd.f32 %v1864_v62, %v980_v50  ;;  %v1114_v2 = vadd.f32 %v1113_v59, %v1051_v63  ;;  %v1056_v62 = vmul.f32 %v1888_v22, %v1888_v22  ;;  %v1067_v59 = vmul.f32 %v1968_v60, %v1968_v60 }
 0x145   :  { %v1115_v4 = vadd.f32 %v1114_v2, %v1052_v41  ;;  %v982_v6 = vadd.f32 %v1868_v5, %v981_v1  ;;  %v1057_v5 = vmul.f32 %v1892_v29, %v1892_v29 }
 0x147   :  { %v983_v7 = vadd.f32 %v982_v6, %v1890_v24  ;;  %v1116_v10 = vadd.f32 %v1115_v4, %v1053_v45  ;;  %v1058_v24 = vmul.f32 %v1914_v52, %v1914_v52  ;;  %v1071_v6 = vmul.f32 %v1992_v32, %v1992_v32 }
 0x149   :  { %v1117_v11 = vadd.f32 %v1116_v10, %v1054_v0  ;;  %v984_v9 = vadd.f32 %v983_v7, %v1896_v33 }
 0x14b   :  { %v985_v13 = vadd.f32 %v1888_v22, %v984_v9  ;;  %v1118_v17 = vadd.f32 %v1117_v11, %v1055_v12  ;;  %v1060_v22 = vmul.f32 %v1912_v49, %v1912_v49 }
 0x14d   :  { %v1119_v19 = vadd.f32 %v1118_v17, %v1056_v62  ;;  %v986_v20 = vadd.f32 %v1892_v29, %v985_v13  ;;  %v1061_v29 = vmul.f32 %v1916_v57, %v1916_v57  ;;  %v1075_v13 = vmul.f32 %v2016_v8, %v2016_v8 }
 0x14f   :  { %v987_v23 = vadd.f32 %v986_v20, %v1914_v52  ;;  %v1120_v25 = vadd.f32 %v1119_v19, %v1057_v5  ;;  %v1062_v52 = vmul.f32 %v1938_v16, %v1938_v16 }
 0x151   :  { %v1121_v28 = vadd.f32 %v1120_v25, %v1058_v24  ;;  %v988_v33 = vadd.f32 %v987_v23, %v1920_v61 }
 0x153   :  { %v989_v31 = vadd.f32 %v1912_v49, %v988_v33  ;;  %v1122_v34 = vadd.f32 %v1121_v28, %v1059_v30  ;;  %v1064_v49 = vmul.f32 %v1936_v14, %v1936_v14 }
 0x155   :  { %v1123_v35 = vadd.f32 %v1122_v34, %v1060_v22  ;;  %v990_v36 = vadd.f32 %v1916_v57, %v989_v31  ;;  %v1065_v57 = vmul.f32 %v1940_v21, %v1940_v21 }
 0x157   :  { %v991_v37 = vadd.f32 %v990_v36, %v1938_v16  ;;  %v1124_v38 = vadd.f32 %v1123_v35, %v1061_v29  ;;  %v1066_v16 = vmul.f32 %v1962_v47, %v1962_v47 }
 0x159   :  { %v1125_v39 = vadd.f32 %v1124_v38, %v1062_v52  ;;  %v992_v61 = vadd.f32 %v991_v37, %v1944_v27 }
 0x15b   :  { %v993_v42 = vadd.f32 %v1936_v14, %v992_v61  ;;  %v1126_v46 = vadd.f32 %v1125_v39, %v1063_v40  ;;  %v1068_v14 = vmul.f32 %v1960_v44, %v1960_v44 }
 0x15d   :  { %v1127_v48 = vadd.f32 %v1126_v46, %v1064_v49  ;;  %v994_v51 = vadd.f32 %v1940_v21, %v993_v42  ;;  %v1069_v21 = vmul.f32 %v1964_v55, %v1964_v55 }
 0x15f   :  { %v995_v43 = vadd.f32 %v994_v51, %v1962_v47  ;;  %v1128_v53 = vadd.f32 %v1127_v48, %v1065_v57  ;;  %v1070_v47 = vmul.f32 %v1986_v18, %v1986_v18 }
 0x161   :  { %v1129_v56 = vadd.f32 %v1128_v53, %v1066_v16  ;;  %v996_v27 = vadd.f32 %v995_v43, %v1968_v60 }
 0x163   :  { %v997_v50 = vadd.f32 %v1960_v44, %v996_v27  ;;  %v1130_v63 = vadd.f32 %v1129_v56, %v1067_v59  ;;  %v1072_v44 = vmul.f32 %v1984_v15, %v1984_v15 }
 0x165   :  { %v1131_v41 = vadd.f32 %v1130_v63, %v1068_v14  ;;  %v998_v1 = vadd.f32 %v1964_v55, %v997_v50  ;;  %v1073_v55 = vmul.f32 %v1988_v26, %v1988_v26 }
 0x167   :  { %v999_v2 = vadd.f32 %v998_v1, %v1986_v18  ;;  %v1132_v45 = vadd.f32 %v1131_v41, %v1069_v21  ;;  %v1074_v18 = vmul.f32 %v2010_v58, %v2010_v58 }
 0x169   :  { %v1133_v4 = vadd.f32 %v1132_v45, %v1070_v47  ;;  %v1000_v60 = vadd.f32 %v999_v2, %v1992_v32 }
 0x16b   :  { %v1001_v0 = vadd.f32 %v1984_v15, %v1000_v60  ;;  %v1134_v7 = vadd.f32 %v1133_v4, %v1071_v6  ;;  %v1076_v15 = vmul.f32 %v2008_v54, %v2008_v54 }
 0x16d   :  { %v1135_v10 = vadd.f32 %v1134_v7, %v1072_v44  ;;  %v1002_v11 = vadd.f32 %v1988_v26, %v1001_v0  ;;  %v1077_v26 = vmul.f32 %v2012_v3, %v2012_v3 }
 0x16f   :  { %v1003_v9 = vadd.f32 %v1002_v11, %v2010_v58  ;;  %v1136_v12 = vadd.f32 %v1135_v10, %v1073_v55 }
 0x171   :  { %v1137_v62 = vadd.f32 %v1136_v12, %v1074_v18  ;;  %v1004_v32 = vadd.f32 %v1003_v9, %v2016_v8 }
 0x173   :  { %v1005_v17 = vadd.f32 %v2008_v54, %v1004_v32  ;;  %v1138_v5 = vadd.f32 %v1137_v62, %v1075_v13 }
 0x175   :  { %v1006_v19 = vadd.f32 %v2012_v3, %v1005_v17  ;;  %v1139_v20 = vadd.f32 %v1138_v5, %v1076_v15 }
 0x177   :  { %v1007_v58 = vrot.slane %v1006_v19, 4  ;;  %v1140_v24 = vadd.f32 %v1139_v20, %v1077_v26 }
 0x179   :  { %v1008_v23 = vadd.f32 %v1007_v58, %v1006_v19  ;;  %v1141_v25 = vrot.slane %v1140_v24, 4 }
 0x17b   :  { %v1009_v28 = vrot.slane %v1008_v23, 2  ;;  %v1142_v33 = vadd.f32 %v1141_v25, %v1140_v24 }
 0x17d   :  { %v1010_v30 = vadd.f32 %v1009_v28, %v1008_v23  ;;  %v1143_v8 = vrot.slane %v1142_v33, 2 }
 0x17f   :  { %v1011_v22 = vrot.slane %v1010_v30, 1  ;;  %v1144_v31 = vadd.f32 %v1143_v8, %v1142_v33 }
 0x181   :  { %v1012_v34 = vadd.f32 %v1011_v22, %v1010_v30  ;;  %v1145_v29 = vrot.slane %v1144_v31, 1 }
 0x183   :  { %1013 = vst [vmem:[%s2137_s3] sm:$0x1] %v1012_v34  ;;  %v1146_v54 = vadd.f32 %v1145_v29, %v1144_v31 }
 0x185   :  { %1147 = vst [vmem:[%s2138_s4] sm:$0x1] %v1146_v54 }

// kernel: res_disparity_refinement_forward.29
= control target key start
LH: loop header
LB: loop body
LE: loop exit
PB: predicated region body
PF: predicated region fallthrough
CT: control target
= control target key end

     0   :  { %vm348_vm0 = vcmask 1043456   ;;  %vm349_vm1 = vcmask 1044480   ;;  %vm251_vm2 = vcmask 203776   ;;  %v1494_v1 = vmov 65535   ;;  %s1740_s1 = inlined_call_operand.vmem [shape: bf16[25,128], index: 1, kind: input, shape index: {}]   ;;  %s1741_s0 = inlined_call_operand.vmem [shape: bf16[512,25], index: 0, kind: input, shape index: {}]   ;;  %s1742_s2 = inlined_call_operand.vmem [shape: bf16[512,128], index: 2, kind: output, shape index: {}]  }
   0x1   :  { %v1460_v0 = vld [vmem:[%s1740_s1] sm:$0xff]   ;;  %v350_v2 = vsel %vm348_vm0, 4294967295, %v1494_v1  ;;  %v1461_v3 = vld [vmem:[%s1740_s1 + $0x8] sm:$0x1f]   ;;  %v1466_v10 = vld [vmem:[%s1741_s0 + $0x10] sm:$0xff]  }
   0x2   :  { %1387 = vmatprep.subr.bf16.mxu0 %v1460_v0  ;;  %1455 = vmatprep.subr.bf16.mxu1 %v1460_v0  ;;  %v351_v4 = vsel %vm349_vm1, %v350_v2, 0  ;;  %v1462_v5 = vld [vmem:[%s1741_s0] sm:$0xff]   ;;  %v1464_v8 = vld [vmem:[%s1741_s0 + $0x8] sm:$0xff]   ;;  %v1467_v11 = vld [vmem:[%s1741_s0 + $0x90] sm:$0xff]  }
   0x3   :  { %1388 = vmatpush3.bf16.msra.mxu0 %v1460_v0  ;;  %1457 = vmatpush3.bf16.msra.mxu1 %v1460_v0  ;;  %v353_v6 = vand.u32 %v1461_v3, %v351_v4  ;;  %v1463_v7 = vld [vmem:[%s1741_s0 + $0x80] sm:$0xff]   ;;  %v1465_v9 = vld [vmem:[%s1741_s0 + $0x88] sm:$0xff]   ;;  %v1468_v12 = vld [vmem:[%s1741_s0 + $0x18] sm:$0xff]  }
   0x4   :  { %1391 = vmatprep.mubr.msk.bf16.mxu0 %vm251_vm2, %v1462_v5  ;;  %1423 = vmatprep.mubr.msk.bf16.mxu1 %vm251_vm2, %v1463_v7  ;;  %v1469_v13 = vld [vmem:[%s1741_s0 + $0x98] sm:$0xff]   ;;  %v1470_v14 = vld [vmem:[%s1741_s0 + $0x20] sm:$0xff]   ;;  %v1472_v16 = vld [vmem:[%s1741_s0 + $0x28] sm:$0xff]  }
   0x5   :  { %1389 = vmatprep.subr.bf16.mxu0 %v353_v6  ;;  %1456 = vmatprep.subr.bf16.mxu1 %v353_v6  ;;  %v1471_v15 = vld [vmem:[%s1741_s0 + $0xa0] sm:$0xff]   ;;  %v1473_v17 = vld [vmem:[%s1741_s0 + $0xa8] sm:$0xff]   ;;  %v1474_v18 = vld [vmem:[%s1741_s0 + $0x30] sm:$0xff]  }
   0x6   :  { %v1475_v19 = vld [vmem:[%s1741_s0 + $0xb0] sm:$0xff]   ;;  %v1476_v20 = vld [vmem:[%s1741_s0 + $0x38] sm:$0xff]   ;;  %v1478_v22 = vld [vmem:[%s1741_s0 + $0x40] sm:$0xff]  }
   0x7   :  { %1390 = vmatpush3.bf16.msra.mxu0 %v353_v6  ;;  %1458 = vmatpush3.bf16.msra.mxu1 %v353_v6  ;;  %v1477_v21 = vld [vmem:[%s1741_s0 + $0xb8] sm:$0xff]   ;;  %v1479_v23 = vld [vmem:[%s1741_s0 + $0xc0] sm:$0xff]   ;;  %v1480_v24 = vld [vmem:[%s1741_s0 + $0x48] sm:$0xff]  }
   0x8   :  { %v1481_v25 = vld [vmem:[%s1741_s0 + $0xc8] sm:$0xff]   ;;  %v1482_v26 = vld [vmem:[%s1741_s0 + $0x50] sm:$0xff]   ;;  %v1484_v28 = vld [vmem:[%s1741_s0 + $0x58] sm:$0xff]  }
   0x9   :  { %v1483_v27 = vld [vmem:[%s1741_s0 + $0xd0] sm:$0xff]   ;;  %v1485_v29 = vld [vmem:[%s1741_s0 + $0xd8] sm:$0xff]   ;;  %v1486_v30 = vld [vmem:[%s1741_s0 + $0x60] sm:$0xff]  }
   0xa   :  { %1392 = vmatmul.mubr.msk.bf16.vlgmr.msra.gmra.mrb[0].mxu0 %vm251_vm2, %v1464_v8  ;;  %1424 = vmatmul.mubr.msk.bf16.vlgmr.msra.gmra.mrb[0].mxu1 %vm251_vm2, %v1465_v9  ;;  %v1487_v31 = vld [vmem:[%s1741_s0 + $0xe0] sm:$0xff]   ;;  %v1488_v32 = vld [vmem:[%s1741_s0 + $0x68] sm:$0xff]   ;;  %v1490_v34 = vld [vmem:[%s1741_s0 + $0x70] sm:$0xff]  }
   0xb   :  { %1395 = vmatprep.mubr.msk.bf16.mxu0 %vm251_vm2, %v1466_v10  ;;  %1427 = vmatprep.mubr.msk.bf16.mxu1 %vm251_vm2, %v1467_v11  ;;  %v1489_v33 = vld [vmem:[%s1741_s0 + $0xe8] sm:$0xff]   ;;  %v1491_v35 = vld [vmem:[%s1741_s0 + $0xf0] sm:$0xff]   ;;  %v1492_v36 = vld [vmem:[%s1741_s0 + $0x78] sm:$0xff]  }
   0xc   :  { %v1493_v37 = vld [vmem:[%s1741_s0 + $0xf8] sm:$0xff]  }
  0x12   :  { %1396 = vmatmul.mubr.msk.bf16.gmra.mrb[4].mxu0 %vm251_vm2, %v1468_v12  ;;  %1428 = vmatmul.mubr.msk.bf16.gmra.mrb[4].mxu1 %vm251_vm2, %v1469_v13 }
  0x13   :  { %1399 = vmatprep.mubr.msk.bf16.mxu0 %vm251_vm2, %v1470_v14  ;;  %1431 = vmatprep.mubr.msk.bf16.mxu1 %vm251_vm2, %v1471_v15 }
  0x1a   :  { %1400 = vmatmul.mubr.msk.bf16.gmra.mrb[8].mxu0 %vm251_vm2, %v1472_v16  ;;  %1432 = vmatmul.mubr.msk.bf16.gmra.mrb[8].mxu1 %vm251_vm2, %v1473_v17 }
  0x1b   :  { %1403 = vmatprep.mubr.msk.bf16.mxu0 %vm251_vm2, %v1474_v18  ;;  %1435 = vmatprep.mubr.msk.bf16.mxu1 %vm251_vm2, %v1475_v19 }
  0x22   :  { %1404 = vmatmul.mubr.msk.bf16.gmra.mrb[12].mxu0 %vm251_vm2, %v1476_v20  ;;  %1436 = vmatmul.mubr.msk.bf16.gmra.mrb[12].mxu1 %vm251_vm2, %v1477_v21 }
  0x23   :  { %1407 = vmatprep.mubr.msk.bf16.mxu0 %vm251_vm2, %v1478_v22  ;;  %1439 = vmatprep.mubr.msk.bf16.mxu1 %vm251_vm2, %v1479_v23 }
  0x2a   :  { %1408 = vmatmul.mubr.msk.bf16.gmra.mrb[16].mxu0 %vm251_vm2, %v1480_v24  ;;  %1440 = vmatmul.mubr.msk.bf16.gmra.mrb[16].mxu1 %vm251_vm2, %v1481_v25 }
  0x2b   :  { %1411 = vmatprep.mubr.msk.bf16.mxu0 %vm251_vm2, %v1482_v26  ;;  %1443 = vmatprep.mubr.msk.bf16.mxu1 %vm251_vm2, %v1483_v27 }
  0x32   :  { %1412 = vmatmul.mubr.msk.bf16.gmra.mrb[20].mxu0 %vm251_vm2, %v1484_v28  ;;  %1444 = vmatmul.mubr.msk.bf16.gmra.mrb[20].mxu1 %vm251_vm2, %v1485_v29 }
  0x33   :  { %1415 = vmatprep.mubr.msk.bf16.mxu0 %vm251_vm2, %v1486_v30  ;;  %1447 = vmatprep.mubr.msk.bf16.mxu1 %vm251_vm2, %v1487_v31 }
  0x3a   :  { %1416 = vmatmul.mubr.msk.bf16.gmra.mrb[24].mxu0 %vm251_vm2, %v1488_v32  ;;  %1448 = vmatmul.mubr.msk.bf16.gmra.mrb[24].mxu1 %vm251_vm2, %v1489_v33 }
  0x3b   :  { %1419 = vmatprep.mubr.msk.bf16.mxu0 %vm251_vm2, %v1490_v34  ;;  %1451 = vmatprep.mubr.msk.bf16.mxu1 %vm251_vm2, %v1491_v35 }
  0x42   :  { %1420 = vmatmul.mubr.msk.bf16.gmra.mrb[28].mxu0 %vm251_vm2, %v1492_v36  ;;  %1452 = vmatmul.mubr.msk.bf16.gmra.mrb[28].mxu1 %vm251_vm2, %v1493_v37 }
  0xdd   :  { %v1393_v38 = vpop.f32.mrb[0].mxu0  ;;  %v1425_v39 = vpop.f32.mrb[0].mxu1 }
  0xde   :  { %v389_v40 = vpop.f32.mrb[1].mxu0  ;;  %v517_v41 = vpop.f32.mrb[1].mxu1 }
  0xdf   :  { %v1394_v42 = vpop.f32.mrb[2].mxu0  ;;  %v1426_v43 = vpop.f32.mrb[2].mxu1 }
  0xe0   :  { %v1170_v44 = vpack.c.bf16 %v1394_v42, %v1393_v38  ;;  %v1250_v45 = vpack.c.bf16 %v1426_v43, %v1425_v39  ;;  %v392_v46 = vpop.f32.mrb[3].mxu0  ;;  %v520_v47 = vpop.f32.mrb[3].mxu1 }
  0xe1   :  { %v1165_v48 = vpack.c.bf16 %v392_v46, %v389_v40  ;;  %v1245_v49 = vpack.c.bf16 %v520_v47, %v517_v41 }
  0xe2   :  { %1322 = vst [vmem:[%s1742_s2 + $0x8] sm:$0xff] %v1170_v44   ;;  %1338 = vst [vmem:[%s1742_s2 + $0x88] sm:$0xff] %v1250_v45  }
  0xe3   :  { %1166 = vst [vmem:[%s1742_s2] sm:$0xff] %v1165_v48   ;;  %1337 = vst [vmem:[%s1742_s2 + $0x80] sm:$0xff] %v1245_v49  }
  0xe5   :  { %v1397_v50 = vpop.f32.mrb[4].mxu0  ;;  %v1429_v51 = vpop.f32.mrb[4].mxu1 }
  0xe6   :  { %v405_v52 = vpop.f32.mrb[5].mxu0  ;;  %v533_v53 = vpop.f32.mrb[5].mxu1 }
  0xe7   :  { %v1398_v54 = vpop.f32.mrb[6].mxu0  ;;  %v1430_v55 = vpop.f32.mrb[6].mxu1 }
  0xe8   :  { %v1180_v56 = vpack.c.bf16 %v1398_v54, %v1397_v50  ;;  %v1260_v57 = vpack.c.bf16 %v1430_v55, %v1429_v51  ;;  %v408_v58 = vpop.f32.mrb[7].mxu0  ;;  %v536_v59 = vpop.f32.mrb[7].mxu1 }
  0xe9   :  { %v1175_v60 = vpack.c.bf16 %v408_v58, %v405_v52  ;;  %v1255_v61 = vpack.c.bf16 %v536_v59, %v533_v53 }
  0xea   :  { %1324 = vst [vmem:[%s1742_s2 + $0x18] sm:$0xff] %v1180_v56   ;;  %1340 = vst [vmem:[%s1742_s2 + $0x98] sm:$0xff] %v1260_v57  }
  0xeb   :  { %1323 = vst [vmem:[%s1742_s2 + $0x10] sm:$0xff] %v1175_v60   ;;  %1339 = vst [vmem:[%s1742_s2 + $0x90] sm:$0xff] %v1255_v61  }
  0xed   :  { %v1401_v62 = vpop.f32.mrb[8].mxu0  ;;  %v1433_v63 = vpop.f32.mrb[8].mxu1 }
  0xee   :  { %v421_v0 = vpop.f32.mrb[9].mxu0  ;;  %v549_v1 = vpop.f32.mrb[9].mxu1 }
  0xef   :  { %v1402_v2 = vpop.f32.mrb[10].mxu0  ;;  %v1434_v3 = vpop.f32.mrb[10].mxu1 }
  0xf0   :  { %v1190_v4 = vpack.c.bf16 %v1402_v2, %v1401_v62  ;;  %v1270_v5 = vpack.c.bf16 %v1434_v3, %v1433_v63  ;;  %v424_v6 = vpop.f32.mrb[11].mxu0  ;;  %v552_v7 = vpop.f32.mrb[11].mxu1 }
  0xf1   :  { %v1185_v8 = vpack.c.bf16 %v424_v6, %v421_v0  ;;  %v1265_v9 = vpack.c.bf16 %v552_v7, %v549_v1 }
  0xf2   :  { %1326 = vst [vmem:[%s1742_s2 + $0x28] sm:$0xff] %v1190_v4   ;;  %1342 = vst [vmem:[%s1742_s2 + $0xa8] sm:$0xff] %v1270_v5  }
  0xf3   :  { %1325 = vst [vmem:[%s1742_s2 + $0x20] sm:$0xff] %v1185_v8   ;;  %1341 = vst [vmem:[%s1742_s2 + $0xa0] sm:$0xff] %v1265_v9  }
  0xf5   :  { %v1405_v10 = vpop.f32.mrb[12].mxu0  ;;  %v1437_v11 = vpop.f32.mrb[12].mxu1 }
  0xf6   :  { %v437_v12 = vpop.f32.mrb[13].mxu0  ;;  %v565_v13 = vpop.f32.mrb[13].mxu1 }
  0xf7   :  { %v1406_v14 = vpop.f32.mrb[14].mxu0  ;;  %v1438_v15 = vpop.f32.mrb[14].mxu1 }
  0xf8   :  { %v1200_v16 = vpack.c.bf16 %v1406_v14, %v1405_v10  ;;  %v1280_v17 = vpack.c.bf16 %v1438_v15, %v1437_v11  ;;  %v440_v18 = vpop.f32.mrb[15].mxu0  ;;  %v568_v19 = vpop.f32.mrb[15].mxu1 }
  0xf9   :  { %v1195_v20 = vpack.c.bf16 %v440_v18, %v437_v12  ;;  %v1275_v21 = vpack.c.bf16 %v568_v19, %v565_v13 }
  0xfa   :  { %1328 = vst [vmem:[%s1742_s2 + $0x38] sm:$0xff] %v1200_v16   ;;  %1344 = vst [vmem:[%s1742_s2 + $0xb8] sm:$0xff] %v1280_v17  }
  0xfb   :  { %1327 = vst [vmem:[%s1742_s2 + $0x30] sm:$0xff] %v1195_v20   ;;  %1343 = vst [vmem:[%s1742_s2 + $0xb0] sm:$0xff] %v1275_v21  }
  0xfd   :  { %v1409_v22 = vpop.f32.mrb[16].mxu0  ;;  %v1441_v23 = vpop.f32.mrb[16].mxu1 }
  0xfe   :  { %v453_v24 = vpop.f32.mrb[17].mxu0  ;;  %v581_v25 = vpop.f32.mrb[17].mxu1 }
  0xff   :  { %v1410_v26 = vpop.f32.mrb[18].mxu0  ;;  %v1442_v27 = vpop.f32.mrb[18].mxu1 }
 0x100   :  { %v1210_v28 = vpack.c.bf16 %v1410_v26, %v1409_v22  ;;  %v1290_v29 = vpack.c.bf16 %v1442_v27, %v1441_v23  ;;  %v456_v30 = vpop.f32.mrb[19].mxu0  ;;  %v584_v31 = vpop.f32.mrb[19].mxu1 }
 0x101   :  { %v1205_v32 = vpack.c.bf16 %v456_v30, %v453_v24  ;;  %v1285_v33 = vpack.c.bf16 %v584_v31, %v581_v25 }
 0x102   :  { %1330 = vst [vmem:[%s1742_s2 + $0x48] sm:$0xff] %v1210_v28   ;;  %1346 = vst [vmem:[%s1742_s2 + $0xc8] sm:$0xff] %v1290_v29  }
 0x103   :  { %1329 = vst [vmem:[%s1742_s2 + $0x40] sm:$0xff] %v1205_v32   ;;  %1345 = vst [vmem:[%s1742_s2 + $0xc0] sm:$0xff] %v1285_v33  }
 0x105   :  { %v1413_v34 = vpop.f32.mrb[20].mxu0  ;;  %v1445_v35 = vpop.f32.mrb[20].mxu1 }
 0x106   :  { %v469_v36 = vpop.f32.mrb[21].mxu0  ;;  %v597_v37 = vpop.f32.mrb[21].mxu1 }
 0x107   :  { %v1414_v38 = vpop.f32.mrb[22].mxu0  ;;  %v1446_v39 = vpop.f32.mrb[22].mxu1 }
 0x108   :  { %v1220_v40 = vpack.c.bf16 %v1414_v38, %v1413_v34  ;;  %v1300_v41 = vpack.c.bf16 %v1446_v39, %v1445_v35  ;;  %v472_v42 = vpop.f32.mrb[23].mxu0  ;;  %v600_v43 = vpop.f32.mrb[23].mxu1 }
 0x109   :  { %v1215_v44 = vpack.c.bf16 %v472_v42, %v469_v36  ;;  %v1295_v45 = vpack.c.bf16 %v600_v43, %v597_v37 }
 0x10a   :  { %1332 = vst [vmem:[%s1742_s2 + $0x58] sm:$0xff] %v1220_v40   ;;  %1348 = vst [vmem:[%s1742_s2 + $0xd8] sm:$0xff] %v1300_v41  }
 0x10b   :  { %1331 = vst [vmem:[%s1742_s2 + $0x50] sm:$0xff] %v1215_v44   ;;  %1347 = vst [vmem:[%s1742_s2 + $0xd0] sm:$0xff] %v1295_v45  }
 0x10d   :  { %v1417_v46 = vpop.f32.mrb[24].mxu0  ;;  %v1449_v47 = vpop.f32.mrb[24].mxu1 }
 0x10e   :  { %v485_v48 = vpop.f32.mrb[25].mxu0  ;;  %v613_v49 = vpop.f32.mrb[25].mxu1 }
 0x10f   :  { %v1418_v50 = vpop.f32.mrb[26].mxu0  ;;  %v1450_v51 = vpop.f32.mrb[26].mxu1 }
 0x110   :  { %v1230_v52 = vpack.c.bf16 %v1418_v50, %v1417_v46  ;;  %v1310_v53 = vpack.c.bf16 %v1450_v51, %v1449_v47  ;;  %v488_v54 = vpop.f32.mrb[27].mxu0  ;;  %v616_v55 = vpop.f32.mrb[27].mxu1 }
 0x111   :  { %v1225_v56 = vpack.c.bf16 %v488_v54, %v485_v48  ;;  %v1305_v57 = vpack.c.bf16 %v616_v55, %v613_v49 }
 0x112   :  { %1334 = vst [vmem:[%s1742_s2 + $0x68] sm:$0xff] %v1230_v52   ;;  %1350 = vst [vmem:[%s1742_s2 + $0xe8] sm:$0xff] %v1310_v53  }
 0x113   :  { %1333 = vst [vmem:[%s1742_s2 + $0x60] sm:$0xff] %v1225_v56   ;;  %1349 = vst [vmem:[%s1742_s2 + $0xe0] sm:$0xff] %v1305_v57  }
 0x115   :  { %v1421_v58 = vpop.f32.mrb[28].mxu0  ;;  %v1453_v59 = vpop.f32.mrb[28].mxu1 }
 0x116   :  { %v501_v60 = vpop.f32.mrb[29].mxu0  ;;  %v629_v61 = vpop.f32.mrb[29].mxu1 }
 0x117   :  { %v1422_v62 = vpop.f32.mrb[30].mxu0  ;;  %v1454_v63 = vpop.f32.mrb[30].mxu1 }
 0x118   :  { %v1240_v0 = vpack.c.bf16 %v1422_v62, %v1421_v58  ;;  %v1320_v1 = vpack.c.bf16 %v1454_v63, %v1453_v59  ;;  %v504_v2 = vpop.f32.mrb[31].mxu0  ;;  %v632_v3 = vpop.f32.mrb[31].mxu1 }
 0x119   :  { %v1235_v4 = vpack.c.bf16 %v504_v2, %v501_v60  ;;  %v1315_v5 = vpack.c.bf16 %v632_v3, %v629_v61 }
 0x11a   :  { %1336 = vst [vmem:[%s1742_s2 + $0x78] sm:$0xff] %v1240_v0   ;;  %1352 = vst [vmem:[%s1742_s2 + $0xf8] sm:$0xff] %v1320_v1  }
 0x11b   :  { %1335 = vst [vmem:[%s1742_s2 + $0x70] sm:$0xff] %v1235_v4   ;;  %1351 = vst [vmem:[%s1742_s2 + $0xf0] sm:$0xff] %v1315_v5  }

// kernel: res_disparity_refinement_forward.18
= control target key start
LH: loop header
LB: loop body
LE: loop exit
PB: predicated region body
PF: predicated region fallthrough
CT: control target
= control target key end

     0   :  { %s888_s1 = inlined_call_operand.vmem [shape: bf16[256,128], index: 1, kind: input, shape index: {}]   ;;  %s889_s0 = inlined_call_operand.vmem [shape: bf16[128,256], index: 0, kind: input, shape index: {}]   ;;  %s890_s2 = inlined_call_operand.vmem [shape: bf16[128,128], index: 2, kind: output, shape index: {0}]   ;;  %s891_s3 = inlined_call_operand.vmem [shape: f32[1,1,128], index: 3, kind: output, shape index: {1}]   ;;  %s892_s4 = inlined_call_operand.vmem [shape: f32[1,1,128], index: 4, kind: output, shape index: {2}]  }
   0x1   :  { %v679_v0 = vld [vmem:[%s888_s1 + $0x40] sm:$0xff]   ;;  %v681_v2 = vld [vmem:[%s888_s1 + $0x48] sm:$0xff]   ;;  %v683_v4 = vld [vmem:[%s888_s1 + $0x50] sm:$0xff]  }
   0x2   :  { %v680_v1 = vld [vmem:[%s888_s1] sm:$0xff]   ;;  %599 = vmatprep.subr.bf16.mxu0 %v679_v0  ;;  %663 = vmatprep.subr.bf16.mxu1 %v679_v0  ;;  %v682_v3 = vld [vmem:[%s888_s1 + $0x8] sm:$0xff]   ;;  %v684_v5 = vld [vmem:[%s888_s1 + $0x10] sm:$0xff]  }
   0x3   :  { %600 = vmatpush3.bf16.msra.mxu0 %v680_v1  ;;  %671 = vmatpush3.bf16.msra.mxu1 %v680_v1  ;;  %v685_v6 = vld [vmem:[%s888_s1 + $0x58] sm:$0xff]   ;;  %v687_v8 = vld [vmem:[%s888_s1 + $0x60] sm:$0xff]   ;;  %v689_v10 = vld [vmem:[%s888_s1 + $0x68] sm:$0xff]  }
   0x4   :  { %601 = vmatprep.subr.bf16.mxu0 %v681_v2  ;;  %664 = vmatprep.subr.bf16.mxu1 %v681_v2  ;;  %v686_v7 = vld [vmem:[%s888_s1 + $0x18] sm:$0xff]   ;;  %v688_v9 = vld [vmem:[%s888_s1 + $0x20] sm:$0xff]   ;;  %v690_v12 = vld [vmem:[%s888_s1 + $0x28] sm:$0xff]  }
   0x5   :  { %v697_v11 = vld [vmem:[%s889_s0 + $0x4] ss:$8 sps:$4 sm:$0xff]   ;;  %v691_v14 = vld [vmem:[%s888_s1 + $0x70] sm:$0xff]   ;;  %v693_v16 = vld [vmem:[%s888_s1 + $0x78] sm:$0xff]  }
   0x6   :  { %v703_v13 = vld [vmem:[%s889_s0 + $0x44] ss:$8 sps:$4 sm:$0xff]   ;;  %271 = vmatprep.mubr.bf16.mxu0 %v697_v11  ;;  %v692_v15 = vld [vmem:[%s888_s1 + $0x30] sm:$0xff]   ;;  %v694_v17 = vld [vmem:[%s888_s1 + $0x38] sm:$0xff]  }
   0x7   :  { %602 = vmatpush3.bf16.msra.mxu0 %v682_v3  ;;  %672 = vmatpush3.bf16.msra.mxu1 %v682_v3  ;;  %v695_v18 = vld [vmem:[%s889_s0] ss:$8 sps:$4 sm:$0xff]   ;;  %v698_v20 = vld [vmem:[%s889_s0 + $0x14] ss:$8 sps:$4 sm:$0xff]   ;;  %v700_v22 = vld [vmem:[%s889_s0 + $0x10] ss:$8 sps:$4 sm:$0xff]  }
   0x8   :  { %603 = vmatprep.subr.bf16.mxu0 %v683_v4  ;;  %665 = vmatprep.subr.bf16.mxu1 %v683_v4  ;;  %v701_v19 = vld [vmem:[%s889_s0 + $0x40] ss:$8 sps:$4 sm:$0xff]   ;;  %v707_v21 = vld [vmem:[%s889_s0 + $0x54] ss:$8 sps:$4 sm:$0xff]   ;;  %v709_v23 = vld [vmem:[%s889_s0 + $0x50] ss:$8 sps:$4 sm:$0xff]  }
   0x9   :  { %303 = vmatprep.mubr.bf16.mxu1 %v703_v13  ;;  %v704_v24 = vld [vmem:[%s889_s0 + $0x24] ss:$8 sps:$4 sm:$0xff]   ;;  %v706_v26 = vld [vmem:[%s889_s0 + $0x20] ss:$8 sps:$4 sm:$0xff]   ;;  %v710_v28 = vld [vmem:[%s889_s0 + $0x34] ss:$8 sps:$4 sm:$0xff]  }
   0xa   :  { %v713_v25 = vld [vmem:[%s889_s0 + $0x64] ss:$8 sps:$4 sm:$0xff]   ;;  %v715_v27 = vld [vmem:[%s889_s0 + $0x60] ss:$8 sps:$4 sm:$0xff]   ;;  %v716_v29 = vld [vmem:[%s889_s0 + $0x74] ss:$8 sps:$4 sm:$0xff]  }
   0xb   :  { %604 = vmatpush3.bf16.msra.mxu0 %v684_v5  ;;  %673 = vmatpush3.bf16.msra.mxu1 %v684_v5  ;;  %v712_v30 = vld [vmem:[%s889_s0 + $0x30] ss:$8 sps:$4 sm:$0xff]  }
   0xc   :  { %605 = vmatprep.subr.bf16.mxu0 %v685_v6  ;;  %666 = vmatprep.subr.bf16.mxu1 %v685_v6  ;;  %v718_v31 = vld [vmem:[%s889_s0 + $0x70] ss:$8 sps:$4 sm:$0xff]  }
   0xf   :  { %606 = vmatpush3.bf16.msra.mxu0 %v686_v7  ;;  %674 = vmatpush3.bf16.msra.mxu1 %v686_v7 }
  0x10   :  { %607 = vmatprep.subr.bf16.mxu0 %v687_v8  ;;  %667 = vmatprep.subr.bf16.mxu1 %v687_v8 }
  0x13   :  { %608 = vmatpush3.bf16.msra.mxu0 %v688_v9  ;;  %675 = vmatpush3.bf16.msra.mxu1 %v688_v9 }
  0x14   :  { %609 = vmatprep.subr.bf16.mxu0 %v689_v10  ;;  %668 = vmatprep.subr.bf16.mxu1 %v689_v10 }
  0x17   :  { %610 = vmatpush3.bf16.msra.mxu0 %v690_v12  ;;  %676 = vmatpush3.bf16.msra.mxu1 %v690_v12 }
  0x18   :  { %611 = vmatprep.subr.bf16.mxu0 %v691_v14  ;;  %669 = vmatprep.subr.bf16.mxu1 %v691_v14 }
  0x1b   :  { %612 = vmatpush3.bf16.msra.mxu0 %v692_v15  ;;  %677 = vmatpush3.bf16.msra.mxu1 %v692_v15 }
  0x1c   :  { %613 = vmatprep.subr.bf16.mxu0 %v693_v16  ;;  %670 = vmatprep.subr.bf16.mxu1 %v693_v16 }
  0x1f   :  { %614 = vmatpush3.bf16.msra.mxu0 %v694_v17  ;;  %678 = vmatpush3.bf16.msra.mxu1 %v694_v17 }
  0x22   :  { %272 = vmatmul.mubr.bf16.vlgmr.msra.gmra.mrb[0].mxu0 %v695_v18  ;;  %304 = vmatmul.mubr.bf16.vlgmr.msra.gmra.mrb[0].mxu1 %v701_v19 }
  0x23   :  { %279 = vmatprep.mubr.bf16.mxu0 %v698_v20  ;;  %311 = vmatprep.mubr.bf16.mxu1 %v707_v21 }
  0x2a   :  { %280 = vmatmul.mubr.bf16.gmra.mrb[4].mxu0 %v700_v22  ;;  %312 = vmatmul.mubr.bf16.gmra.mrb[4].mxu1 %v709_v23 }
  0x2b   :  { %287 = vmatprep.mubr.bf16.mxu0 %v704_v24  ;;  %319 = vmatprep.mubr.bf16.mxu1 %v713_v25 }
  0x32   :  { %288 = vmatmul.mubr.bf16.gmra.mrb[8].mxu0 %v706_v26  ;;  %320 = vmatmul.mubr.bf16.gmra.mrb[8].mxu1 %v715_v27 }
  0x33   :  { %295 = vmatprep.mubr.bf16.mxu0 %v710_v28  ;;  %327 = vmatprep.mubr.bf16.mxu1 %v716_v29 }
  0x3a   :  { %296 = vmatmul.mubr.bf16.gmra.mrb[12].mxu0 %v712_v30  ;;  %328 = vmatmul.mubr.bf16.gmra.mrb[12].mxu1 %v718_v31 }
  0xf5   :  { %v615_v32 = vpop.f32.mrb[0].mxu0  ;;  %v639_v33 = vpop.f32.mrb[0].mxu1 }
  0xf6   :  { %v616_v34 = vpop.f32.mrb[1].mxu0  ;;  %v640_v35 = vpop.f32.mrb[1].mxu1 }
  0xf7   :  { %v617_v36 = vadd.f32 %v616_v34, %v615_v32  ;;  %v618_v37 = vpop.f32.mrb[2].mxu0  ;;  %v840_v38 = vadd.f32 %v640_v35, %v639_v33  ;;  %v642_v39 = vpop.f32.mrb[2].mxu1 }
  0xf8   :  { %v619_v40 = vpop.f32.mrb[3].mxu0  ;;  %v643_v41 = vpop.f32.mrb[3].mxu1 }
  0xf9   :  { %v620_v42 = vadd.f32 %v619_v40, %v618_v37  ;;  %v842_v43 = vadd.f32 %v643_v41, %v642_v39  ;;  %v438_v44 = vmul.f32 %v617_v36, %v617_v36 }
  0xfb   :  { %v555_v45 = vpack.c.bf16 %v620_v42, %v617_v36  ;;  %v416_v46 = vadd.f32 %v620_v42, %v617_v36  ;;  %v439_v47 = vmul.f32 %v620_v42, %v620_v42  ;;  %v575_v48 = vpack.c.bf16 %v842_v43, %v840_v38 }
  0xfd   :  { %556 = vst [vmem:[%s890_s2] sm:$0xff] %v555_v45   ;;  %v454_v49 = vadd.f32 %v439_v47, %v438_v44  ;;  %v621_v50 = vpop.f32.mrb[4].mxu0  ;;  %595 = vst [vmem:[%s890_s2 + $0x20] sm:$0xff] %v575_v48   ;;  %v645_v51 = vpop.f32.mrb[4].mxu1  ;;  %v446_v47 = vmul.f32 %v840_v38, %v840_v38 }
  0xfe   :  { %v622_v52 = vpop.f32.mrb[5].mxu0  ;;  %v646_v53 = vpop.f32.mrb[5].mxu1 }
  0xff   :  { %v623_v54 = vadd.f32 %v622_v52, %v621_v50  ;;  %v624_v55 = vpop.f32.mrb[6].mxu0  ;;  %v852_v56 = vadd.f32 %v646_v53, %v645_v51  ;;  %v648_v57 = vpop.f32.mrb[6].mxu1  ;;  %v447_v50 = vmul.f32 %v842_v43, %v842_v43 }
 0x100   :  { %v625_v58 = vpop.f32.mrb[7].mxu0  ;;  %v649_v59 = vpop.f32.mrb[7].mxu1 }
 0x101   :  { %v417_v60 = vadd.f32 %v623_v54, %v416_v46  ;;  %v440_v61 = vmul.f32 %v623_v54, %v623_v54  ;;  %v626_v62 = vadd.f32 %v625_v58, %v624_v55  ;;  %v650_v63 = vadd.f32 %v649_v59, %v648_v57 }
 0x102   :  { %v448_v53 = vmul.f32 %v852_v56, %v852_v56 }
 0x103   :  { %v455_v0 = vadd.f32 %v454_v49, %v440_v61  ;;  %v560_v1 = vpack.c.bf16 %v626_v62, %v623_v54  ;;  %v418_v2 = vadd.f32 %v626_v62, %v417_v60  ;;  %v441_v3 = vmul.f32 %v626_v62, %v626_v62 }
 0x104   :  { %v580_v4 = vpack.c.bf16 %v650_v63, %v852_v56  ;;  %v449_v57 = vmul.f32 %v650_v63, %v650_v63 }
 0x105   :  { %592 = vst [vmem:[%s890_s2 + $0x8] sm:$0xff] %v560_v1   ;;  %v456_v5 = vadd.f32 %v455_v0, %v441_v3  ;;  %v627_v6 = vpop.f32.mrb[8].mxu0  ;;  %v651_v7 = vpop.f32.mrb[8].mxu1 }
 0x106   :  { %v628_v8 = vpop.f32.mrb[9].mxu0  ;;  %596 = vst [vmem:[%s890_s2 + $0x28] sm:$0xff] %v580_v4   ;;  %v652_v9 = vpop.f32.mrb[9].mxu1 }
 0x107   :  { %v629_v10 = vadd.f32 %v628_v8, %v627_v6  ;;  %v630_v11 = vpop.f32.mrb[10].mxu0  ;;  %v653_v12 = vadd.f32 %v652_v9, %v651_v7  ;;  %v654_v13 = vpop.f32.mrb[10].mxu1 }
 0x108   :  { %v631_v14 = vpop.f32.mrb[11].mxu0  ;;  %v655_v15 = vpop.f32.mrb[11].mxu1 }
 0x109   :  { %v419_v16 = vadd.f32 %v629_v10, %v418_v2  ;;  %v442_v17 = vmul.f32 %v629_v10, %v629_v10  ;;  %v632_v18 = vadd.f32 %v631_v14, %v630_v11  ;;  %v656_v19 = vadd.f32 %v655_v15, %v654_v13 }
 0x10a   :  { %v450_v60 = vmul.f32 %v653_v12, %v653_v12 }
 0x10b   :  { %v457_v20 = vadd.f32 %v456_v5, %v442_v17  ;;  %v565_v21 = vpack.c.bf16 %v632_v18, %v629_v10  ;;  %v420_v22 = vadd.f32 %v632_v18, %v419_v16  ;;  %v443_v23 = vmul.f32 %v632_v18, %v632_v18 }
 0x10c   :  { %v585_v24 = vpack.c.bf16 %v656_v19, %v653_v12  ;;  %v451_v1 = vmul.f32 %v656_v19, %v656_v19 }
 0x10d   :  { %593 = vst [vmem:[%s890_s2 + $0x10] sm:$0xff] %v565_v21   ;;  %v458_v25 = vadd.f32 %v457_v20, %v443_v23  ;;  %v633_v26 = vpop.f32.mrb[12].mxu0  ;;  %v657_v27 = vpop.f32.mrb[12].mxu1 }
 0x10e   :  { %v634_v28 = vpop.f32.mrb[13].mxu0  ;;  %597 = vst [vmem:[%s890_s2 + $0x30] sm:$0xff] %v585_v24   ;;  %v658_v29 = vpop.f32.mrb[13].mxu1 }
 0x10f   :  { %v635_v30 = vadd.f32 %v634_v28, %v633_v26  ;;  %v636_v31 = vpop.f32.mrb[14].mxu0  ;;  %v659_v32 = vadd.f32 %v658_v29, %v657_v27  ;;  %v660_v33 = vpop.f32.mrb[14].mxu1 }
 0x110   :  { %v637_v34 = vpop.f32.mrb[15].mxu0  ;;  %v661_v35 = vpop.f32.mrb[15].mxu1 }
 0x111   :  { %v421_v36 = vadd.f32 %v635_v30, %v420_v22  ;;  %v444_v37 = vmul.f32 %v635_v30, %v635_v30  ;;  %v638_v39 = vadd.f32 %v637_v34, %v636_v31  ;;  %v662_v40 = vadd.f32 %v661_v35, %v660_v33 }
 0x112   :  { %v452_v2 = vmul.f32 %v659_v32, %v659_v32 }
 0x113   :  { %v459_v41 = vadd.f32 %v458_v25, %v444_v37  ;;  %v570_v42 = vpack.c.bf16 %v638_v39, %v635_v30  ;;  %v422_v44 = vadd.f32 %v638_v39, %v421_v36  ;;  %v445_v45 = vmul.f32 %v638_v39, %v638_v39 }
 0x114   :  { %v590_v46 = vpack.c.bf16 %v662_v40, %v659_v32  ;;  %v453_v6 = vmul.f32 %v662_v40, %v662_v40 }
 0x115   :  { %594 = vst [vmem:[%s890_s2 + $0x18] sm:$0xff] %v570_v42   ;;  %v423_v48 = vadd.f32 %v840_v38, %v422_v44  ;;  %v460_v49 = vadd.f32 %v459_v41, %v445_v45 }
 0x116   :  { %598 = vst [vmem:[%s890_s2 + $0x38] sm:$0xff] %v590_v46  }
 0x117   :  { %v424_v51 = vadd.f32 %v842_v43, %v423_v48  ;;  %v461_v52 = vadd.f32 %v460_v49, %v446_v47 }
 0x119   :  { %v462_v54 = vadd.f32 %v461_v52, %v447_v50  ;;  %v425_v55 = vadd.f32 %v852_v56, %v424_v51 }
 0x11b   :  { %v426_v58 = vadd.f32 %v650_v63, %v425_v55  ;;  %v463_v38 = vadd.f32 %v462_v54, %v448_v53 }
 0x11d   :  { %v427_v59 = vadd.f32 %v653_v12, %v426_v58  ;;  %v464_v61 = vadd.f32 %v463_v38, %v449_v57 }
 0x11f   :  { %v465_v62 = vadd.f32 %v464_v61, %v450_v60  ;;  %v428_v0 = vadd.f32 %v656_v19, %v427_v59 }
 0x121   :  { %v466_v3 = vadd.f32 %v465_v62, %v451_v1  ;;  %v429_v4 = vadd.f32 %v659_v32, %v428_v0 }
 0x123   :  { %v467_v43 = vadd.f32 %v466_v3, %v452_v2  ;;  %v430_v5 = vadd.f32 %v662_v40, %v429_v4 }
 0x125   :  { %v431_v7 = vrot.slane %v430_v5, 4  ;;  %v468_v8 = vadd.f32 %v467_v43, %v453_v6 }
 0x127   :  { %v432_v9 = vadd.f32 %v431_v7, %v430_v5  ;;  %v469_v10 = vrot.slane %v468_v8, 4 }
 0x129   :  { %v433_v56 = vrot.slane %v432_v9, 2  ;;  %v470_v11 = vadd.f32 %v469_v10, %v468_v8 }
 0x12b   :  { %v434_v63 = vadd.f32 %v433_v56, %v432_v9  ;;  %v471_v13 = vrot.slane %v470_v11, 2 }
 0x12d   :  { %v435_v14 = vrot.slane %v434_v63, 1  ;;  %v472_v12 = vadd.f32 %v471_v13, %v470_v11 }
 0x12f   :  { %v436_v15 = vadd.f32 %v435_v14, %v434_v63  ;;  %v473_v16 = vrot.slane %v472_v12, 1 }
 0x131   :  { %437 = vst [vmem:[%s891_s3] sm:$0x1] %v436_v15  ;;  %v474_v17 = vadd.f32 %v473_v16, %v472_v12 }
 0x133   :  { %475 = vst [vmem:[%s892_s4] sm:$0x1] %v474_v17 }

// kernel: res_disparity_refinement_forward.19
= control target key start
LH: loop header
LB: loop body
LE: loop exit
PB: predicated region body
PF: predicated region fallthrough
CT: control target
= control target key end

     0   :  { %s422_s0 = inlined_call_operand.vmem [shape: bf16[128,128], index: 0, kind: input, shape index: {}]   ;;  %s423_s1 = inlined_call_operand.vmem [shape: f32[1,128], index: 1, kind: input, shape index: {}]   ;;  %s424_s2 = inlined_call_operand.vmem [shape: f32[1,128], index: 2, kind: input, shape index: {}]   ;;  %s425_s3 = inlined_call_operand.vmem [shape: bf16[128,128], index: 3, kind: output, shape index: {}]  }
   0x1   :  { %v227_v0 = vld [vmem:[%s422_s0] sm:$0xff]   ;;  %v298_v4 = vld [vmem:[%s422_s0 + $0x8] sm:$0xff]   ;;  %v299_v5 = vld [vmem:[%s422_s0 + $0x10] sm:$0xff]  }
   0x2   :  { %v338_v1 = vld [vmem:[%s423_s1] ss:$0 sm:$0xff]  ;;  %v228_v2 = vunpack.c.l.bf16 %v227_v0  ;;  %v229_v3 = vunpack.c.h.bf16 %v227_v0  ;;  %v300_v6 = vld [vmem:[%s422_s0 + $0x18] sm:$0xff]   ;;  %v232_v8 = vunpack.c.l.bf16 %v298_v4  ;;  %v233_v9 = vunpack.c.h.bf16 %v298_v4  ;;  %v302_v33 = vld [vmem:[%s422_s0 + $0x28] sm:$0xff]  }
   0x3   :  { %v352_v7 = vld [vmem:[%s424_s2] ss:$0 sm:$0xff]  ;;  %v236_v10 = vunpack.c.l.bf16 %v299_v5  ;;  %v237_v11 = vunpack.c.h.bf16 %v299_v5  ;;  %v240_v14 = vunpack.c.l.bf16 %v300_v6  ;;  %v241_v15 = vunpack.c.h.bf16 %v300_v6  ;;  %v303_v38 = vld [vmem:[%s422_s0 + $0x30] sm:$0xff]   ;;  %v304_v43 = vld [vmem:[%s422_s0 + $0x38] sm:$0xff]  }
   0x4   :  { %v53_v12 = vmul.f32 %v228_v2, %v338_v1  ;;  %v54_v13 = vmul.f32 %v229_v3, %v338_v1  ;;  %v55_v16 = vmul.f32 %v232_v8, %v338_v1  ;;  %v56_v17 = vmul.f32 %v233_v9, %v338_v1  ;;  %v301_v28 = vld [vmem:[%s422_s0 + $0x20] sm:$0xff]  }
   0x5   :  { %v57_v18 = vmul.f32 %v236_v10, %v338_v1  ;;  %v58_v19 = vmul.f32 %v237_v11, %v338_v1  ;;  %v59_v22 = vmul.f32 %v240_v14, %v338_v1  ;;  %v60_v23 = vmul.f32 %v241_v15, %v338_v1 }
   0x6   :  { %v76_v20 = vadd.f32 %v352_v7, %v53_v12  ;;  %v77_v21 = vadd.f32 %v352_v7, %v54_v13  ;;  %v78_v24 = vadd.f32 %v352_v7, %v55_v16  ;;  %v79_v25 = vadd.f32 %v352_v7, %v56_v17 }
   0x7   :  { %v80_v26 = vadd.f32 %v352_v7, %v57_v18  ;;  %v81_v27 = vadd.f32 %v352_v7, %v58_v19  ;;  %v82_v31 = vadd.f32 %v352_v7, %v59_v22  ;;  %v83_v32 = vadd.f32 %v352_v7, %v60_v23 }
   0x8   :  { %v92_v29 = vmax.f32 %v76_v20, 0.0  ;;  %v93_v30 = vmax.f32 %v77_v21, 0.0  ;;  %v94_v34 = vmax.f32 %v78_v24, 0.0  ;;  %v95_v35 = vmax.f32 %v79_v25, 0.0 }
   0x9   :  { %v96_v36 = vmax.f32 %v80_v26, 0.0  ;;  %v97_v37 = vmax.f32 %v81_v27, 0.0  ;;  %v98_v40 = vmax.f32 %v82_v31, 0.0  ;;  %v99_v41 = vmax.f32 %v83_v32, 0.0 }
   0xa   :  { %v261_v39 = vpack.c.bf16 %v93_v30, %v92_v29  ;;  %v244_v42 = vunpack.c.l.bf16 %v301_v28  ;;  %v266_v44 = vpack.c.bf16 %v95_v35, %v94_v34  ;;  %v245_v46 = vunpack.c.h.bf16 %v301_v28 }
   0xb   :  { %v271_v45 = vpack.c.bf16 %v97_v37, %v96_v36  ;;  %v248_v47 = vunpack.c.l.bf16 %v302_v33  ;;  %v276_v48 = vpack.c.bf16 %v99_v41, %v98_v40  ;;  %v249_v50 = vunpack.c.h.bf16 %v302_v33 }
   0xc   :  { %262 = vst [vmem:[%s425_s3] sm:$0xff] %v261_v39   ;;  %v61_v49 = vmul.f32 %v244_v42, %v338_v1  ;;  %v252_v51 = vunpack.c.l.bf16 %v303_v38  ;;  %305 = vst [vmem:[%s425_s3 + $0x8] sm:$0xff] %v266_v44   ;;  %v62_v52 = vmul.f32 %v245_v46, %v338_v1  ;;  %v253_v54 = vunpack.c.h.bf16 %v303_v38 }
   0xd   :  { %306 = vst [vmem:[%s425_s3 + $0x10] sm:$0xff] %v271_v45   ;;  %v63_v53 = vmul.f32 %v248_v47, %v338_v1  ;;  %v256_v55 = vunpack.c.l.bf16 %v304_v43  ;;  %307 = vst [vmem:[%s425_s3 + $0x18] sm:$0xff] %v276_v48   ;;  %v64_v57 = vmul.f32 %v249_v50, %v338_v1  ;;  %v257_v59 = vunpack.c.h.bf16 %v304_v43 }
   0xe   :  { %v84_v56 = vadd.f32 %v352_v7, %v61_v49  ;;  %v65_v58 = vmul.f32 %v252_v51, %v338_v1  ;;  %v85_v60 = vadd.f32 %v352_v7, %v62_v52  ;;  %v66_v62 = vmul.f32 %v253_v54, %v338_v1 }
   0xf   :  { %v86_v61 = vadd.f32 %v352_v7, %v63_v53  ;;  %v67_v63 = vmul.f32 %v256_v55, %v338_v1  ;;  %v87_v2 = vadd.f32 %v352_v7, %v64_v57  ;;  %v68_v4 = vmul.f32 %v257_v59, %v338_v1 }
  0x10   :  { %v100_v0 = vmax.f32 %v84_v56, 0.0  ;;  %v88_v3 = vadd.f32 %v352_v7, %v65_v58  ;;  %v101_v5 = vmax.f32 %v85_v60, 0.0  ;;  %v89_v8 = vadd.f32 %v352_v7, %v66_v62 }
  0x11   :  { %v102_v6 = vmax.f32 %v86_v61, 0.0  ;;  %v90_v9 = vadd.f32 %v352_v7, %v67_v63  ;;  %v103_v10 = vmax.f32 %v87_v2, 0.0  ;;  %v91_v12 = vadd.f32 %v352_v7, %v68_v4 }
  0x12   :  { %v104_v11 = vmax.f32 %v88_v3, 0.0  ;;  %v281_v13 = vpack.c.bf16 %v101_v5, %v100_v0  ;;  %v105_v14 = vmax.f32 %v89_v8, 0.0 }
  0x13   :  { %v106_v15 = vmax.f32 %v90_v9, 0.0  ;;  %v286_v16 = vpack.c.bf16 %v103_v10, %v102_v6  ;;  %v107_v17 = vmax.f32 %v91_v12, 0.0 }
  0x14   :  { %308 = vst [vmem:[%s425_s3 + $0x20] sm:$0xff] %v281_v13   ;;  %v291_v1 = vpack.c.bf16 %v105_v14, %v104_v11 }
  0x15   :  { %309 = vst [vmem:[%s425_s3 + $0x28] sm:$0xff] %v286_v16   ;;  %v296_v18 = vpack.c.bf16 %v107_v17, %v106_v15 }
  0x16   :  { %310 = vst [vmem:[%s425_s3 + $0x30] sm:$0xff] %v291_v1  }
  0x17   :  { %311 = vst [vmem:[%s425_s3 + $0x38] sm:$0xff] %v296_v18  }

// kernel: res_disparity_refinement_forward.26
= control target key start
LH: loop header
LB: loop body
LE: loop exit
PB: predicated region body
PF: predicated region fallthrough
CT: control target
= control target key end

     0   :  { %vm84_vm0 = vcmask 261120   ;;  %s508_s1 = inlined_call_operand.vmem [shape: bf16[32,128], index: 1, kind: input, shape index: {}]   ;;  %s509_s0 = inlined_call_operand.vmem [shape: bf16[128,32], index: 0, kind: input, shape index: {}]   ;;  %s510_s2 = inlined_call_operand.vmem [shape: bf16[128,128], index: 2, kind: output, shape index: {}]  }
   0x1   :  { %v421_v0 = vld [vmem:[%s508_s1] sm:$0xff]   ;;  %v422_v1 = vld [vmem:[%s508_s1 + $0x8] sm:$0xff]   ;;  %v427_v6 = vld [vmem:[%s509_s0 + $0x10] sm:$0xff]  }
   0x2   :  { %397 = vmatprep.subr.bf16.mxu0 %v421_v0  ;;  %417 = vmatprep.subr.bf16.mxu1 %v421_v0  ;;  %v423_v2 = vld [vmem:[%s509_s0] sm:$0xff]   ;;  %v425_v4 = vld [vmem:[%s509_s0 + $0x8] sm:$0xff]   ;;  %v428_v7 = vld [vmem:[%s509_s0 + $0x30] sm:$0xff]  }
   0x3   :  { %398 = vmatpush3.bf16.msra.mxu0 %v421_v0  ;;  %419 = vmatpush3.bf16.msra.mxu1 %v421_v0  ;;  %v424_v3 = vld [vmem:[%s509_s0 + $0x20] sm:$0xff]   ;;  %v426_v5 = vld [vmem:[%s509_s0 + $0x28] sm:$0xff]   ;;  %v429_v8 = vld [vmem:[%s509_s0 + $0x18] sm:$0xff]  }
   0x4   :  { %399 = vmatprep.subr.bf16.mxu0 %v422_v1  ;;  %418 = vmatprep.subr.bf16.mxu1 %v422_v1  ;;  %v430_v9 = vld [vmem:[%s509_s0 + $0x38] sm:$0xff]  }
   0x5   :  { %401 = vmatprep.mubr.msk.bf16.mxu0 %vm84_vm0, %v423_v2  ;;  %409 = vmatprep.mubr.msk.bf16.mxu1 %vm84_vm0, %v424_v3 }
   0x7   :  { %400 = vmatpush3.bf16.msra.mxu0 %v422_v1  ;;  %420 = vmatpush3.bf16.msra.mxu1 %v422_v1 }
   0xa   :  { %402 = vmatmul.mubr.msk.bf16.vlgmr.msra.gmra.mrb[0].mxu0 %vm84_vm0, %v425_v4  ;;  %410 = vmatmul.mubr.msk.bf16.vlgmr.msra.gmra.mrb[0].mxu1 %vm84_vm0, %v426_v5 }
   0xb   :  { %405 = vmatprep.mubr.msk.bf16.mxu0 %vm84_vm0, %v427_v6  ;;  %413 = vmatprep.mubr.msk.bf16.mxu1 %vm84_vm0, %v428_v7 }
  0x12   :  { %406 = vmatmul.mubr.msk.bf16.gmra.mrb[4].mxu0 %vm84_vm0, %v429_v8  ;;  %414 = vmatmul.mubr.msk.bf16.gmra.mrb[4].mxu1 %vm84_vm0, %v430_v9 }
  0xdd   :  { %v403_v10 = vpop.f32.mrb[0].mxu0  ;;  %v411_v11 = vpop.f32.mrb[0].mxu1 }
  0xde   :  { %v143_v12 = vpop.f32.mrb[1].mxu0  ;;  %v175_v13 = vpop.f32.mrb[1].mxu1 }
  0xdf   :  { %v404_v14 = vpop.f32.mrb[2].mxu0  ;;  %v412_v15 = vpop.f32.mrb[2].mxu1 }
  0xe0   :  { %v348_v16 = vpack.c.bf16 %v404_v14, %v403_v10  ;;  %v368_v17 = vpack.c.bf16 %v412_v15, %v411_v11  ;;  %v146_v18 = vpop.f32.mrb[3].mxu0  ;;  %v178_v19 = vpop.f32.mrb[3].mxu1 }
  0xe1   :  { %v343_v20 = vpack.c.bf16 %v146_v18, %v143_v12  ;;  %v363_v21 = vpack.c.bf16 %v178_v19, %v175_v13 }
  0xe2   :  { %380 = vst [vmem:[%s510_s2 + $0x8] sm:$0xff] %v348_v16   ;;  %384 = vst [vmem:[%s510_s2 + $0x28] sm:$0xff] %v368_v17  }
  0xe3   :  { %344 = vst [vmem:[%s510_s2] sm:$0xff] %v343_v20   ;;  %383 = vst [vmem:[%s510_s2 + $0x20] sm:$0xff] %v363_v21  }
  0xe5   :  { %v407_v22 = vpop.f32.mrb[4].mxu0  ;;  %v415_v23 = vpop.f32.mrb[4].mxu1 }
  0xe6   :  { %v159_v24 = vpop.f32.mrb[5].mxu0  ;;  %v191_v25 = vpop.f32.mrb[5].mxu1 }
  0xe7   :  { %v408_v26 = vpop.f32.mrb[6].mxu0  ;;  %v416_v27 = vpop.f32.mrb[6].mxu1 }
  0xe8   :  { %v358_v28 = vpack.c.bf16 %v408_v26, %v407_v22  ;;  %v378_v29 = vpack.c.bf16 %v416_v27, %v415_v23  ;;  %v162_v30 = vpop.f32.mrb[7].mxu0  ;;  %v194_v31 = vpop.f32.mrb[7].mxu1 }
  0xe9   :  { %v353_v32 = vpack.c.bf16 %v162_v30, %v159_v24  ;;  %v373_v33 = vpack.c.bf16 %v194_v31, %v191_v25 }
  0xea   :  { %382 = vst [vmem:[%s510_s2 + $0x18] sm:$0xff] %v358_v28   ;;  %386 = vst [vmem:[%s510_s2 + $0x38] sm:$0xff] %v378_v29  }
  0xeb   :  { %381 = vst [vmem:[%s510_s2 + $0x10] sm:$0xff] %v353_v32   ;;  %385 = vst [vmem:[%s510_s2 + $0x30] sm:$0xff] %v373_v33  }

// kernel: res_disparity_refinement_forward.20
= control target key start
LH: loop header
LB: loop body
LE: loop exit
PB: predicated region body
PF: predicated region fallthrough
CT: control target
= control target key end

     0   :  { %s1213_s1 = inlined_call_operand.vmem [shape: bf16[384,128], index: 1, kind: input, shape index: {}]   ;;  %s1214_s0 = inlined_call_operand.vmem [shape: bf16[128,384], index: 0, kind: input, shape index: {}]   ;;  %s1215_s2 = inlined_call_operand.vmem [shape: bf16[128,128], index: 2, kind: output, shape index: {0}]   ;;  %s1216_s3 = inlined_call_operand.vmem [shape: f32[1,1,128], index: 3, kind: output, shape index: {1}]   ;;  %s1217_s4 = inlined_call_operand.vmem [shape: f32[1,1,128], index: 4, kind: output, shape index: {2}]  }
   0x1   :  { %v952_v0 = vld [vmem:[%s1213_s1 + $0x40] sm:$0xff]   ;;  %v955_v3 = vld [vmem:[%s1213_s1 + $0x48] sm:$0xff]   ;;  %v958_v6 = vld [vmem:[%s1213_s1 + $0x50] sm:$0xff]  }
   0x2   :  { %v953_v1 = vld [vmem:[%s1213_s1] sm:$0xff]   ;;  %840 = vmatprep.subr.bf16.mxu0 %v952_v0  ;;  %v956_v4 = vld [vmem:[%s1213_s1 + $0x8] sm:$0xff]   ;;  %v959_v7 = vld [vmem:[%s1213_s1 + $0x10] sm:$0xff]  }
   0x3   :  { %v954_v2 = vld [vmem:[%s1213_s1 + $0x80] sm:$0xff]   ;;  %841 = vmatpush3.bf16.msra.mxu0 %v953_v1  ;;  %v957_v5 = vld [vmem:[%s1213_s1 + $0x88] sm:$0xff]   ;;  %v960_v8 = vld [vmem:[%s1213_s1 + $0x90] sm:$0xff]  }
   0x4   :  { %920 = vmatprep.subr.bf16.mxu1 %v954_v2  ;;  %842 = vmatprep.subr.bf16.mxu0 %v955_v3  ;;  %v961_v9 = vld [vmem:[%s1213_s1 + $0x58] sm:$0xff]   ;;  %v964_v12 = vld [vmem:[%s1213_s1 + $0x60] sm:$0xff]   ;;  %v967_v15 = vld [vmem:[%s1213_s1 + $0x68] sm:$0xff]  }
   0x5   :  { %921 = vmatpush3.bf16.msra.mxu1 %v954_v2  ;;  %v962_v10 = vld [vmem:[%s1213_s1 + $0x18] sm:$0xff]   ;;  %v966_v13 = vld [vmem:[%s1213_s1 + $0xa0] sm:$0xff]   ;;  %v969_v16 = vld [vmem:[%s1213_s1 + $0xa8] sm:$0xff]  }
   0x6   :  { %922 = vmatprep.subr.bf16.mxu1 %v957_v5  ;;  %v963_v11 = vld [vmem:[%s1213_s1 + $0x98] sm:$0xff]   ;;  %v965_v14 = vld [vmem:[%s1213_s1 + $0x20] sm:$0xff]   ;;  %v968_v17 = vld [vmem:[%s1213_s1 + $0x28] sm:$0xff]  }
   0x7   :  { %843 = vmatpush3.bf16.msra.mxu0 %v956_v4  ;;  %v970_v18 = vld [vmem:[%s1213_s1 + $0x70] sm:$0xff]   ;;  %v973_v21 = vld [vmem:[%s1213_s1 + $0x78] sm:$0xff]   ;;  %v976_v26 = vld [vmem:[%s1214_s0] ss:$12 sps:$4 sm:$0xff]  }
   0x8   :  { %844 = vmatprep.subr.bf16.mxu0 %v958_v6  ;;  %v971_v19 = vld [vmem:[%s1213_s1 + $0x30] sm:$0xff]   ;;  %v975_v22 = vld [vmem:[%s1213_s1 + $0xb8] sm:$0xff]   ;;  %v980_v28 = vld [vmem:[%s1214_s0 + $0x20] ss:$12 sps:$4 sm:$0xff]  }
   0x9   :  { %923 = vmatpush3.bf16.msra.mxu1 %v957_v5  ;;  %v972_v20 = vld [vmem:[%s1213_s1 + $0xb0] sm:$0xff]   ;;  %v974_v25 = vld [vmem:[%s1213_s1 + $0x38] sm:$0xff]   ;;  %v996_v36 = vld [vmem:[%s1214_s0 + $0x80] ss:$12 sps:$4 sm:$0xff]  }
   0xa   :  { %924 = vmatprep.subr.bf16.mxu1 %v960_v8  ;;  %v978_v23 = vld [vmem:[%s1214_s0 + $0x4] ss:$12 sps:$4 sm:$0xff]   ;;  %v979_v24 = vld [vmem:[%s1214_s0 + $0x8] ss:$12 sps:$4 sm:$0xff]   ;;  %v989_v35 = vld [vmem:[%s1214_s0 + $0x4c] ss:$12 sps:$4 sm:$0xff]  }
   0xb   :  { %845 = vmatpush3.bf16.msra.mxu0 %v959_v7  ;;  %399 = vmatprep.mubr.bf16.mxu0 %v978_v23  ;;  %v981_v27 = vld [vmem:[%s1214_s0 + $0x1c] ss:$12 sps:$4 sm:$0xff]   ;;  %v987_v29 = vld [vmem:[%s1214_s0 + $0x38] ss:$12 sps:$4 sm:$0xff]   ;;  %v984_v31 = vld [vmem:[%s1214_s0 + $0x34] ss:$12 sps:$4 sm:$0xff]  }
   0xc   :  { %846 = vmatprep.subr.bf16.mxu0 %v961_v9  ;;  %936 = vmatprep.mubr.bf16.mxu1 %v979_v24  ;;  %v983_v30 = vld [vmem:[%s1214_s0 + $0x18] ss:$12 sps:$4 sm:$0xff]   ;;  %v988_v32 = vld [vmem:[%s1214_s0 + $0x50] ss:$12 sps:$4 sm:$0xff]   ;;  %v995_v33 = vld [vmem:[%s1214_s0 + $0x68] ss:$12 sps:$4 sm:$0xff]  }
   0xd   :  { %925 = vmatpush3.bf16.msra.mxu1 %v960_v8  ;;  %v986_v34 = vld [vmem:[%s1214_s0 + $0x30] ss:$12 sps:$4 sm:$0xff]   ;;  %v1003_v37 = vld [vmem:[%s1214_s0 + $0x98] ss:$12 sps:$4 sm:$0xff]   ;;  %v991_v38 = vld [vmem:[%s1214_s0 + $0x48] ss:$12 sps:$4 sm:$0xff]  }
   0xe   :  { %926 = vmatprep.subr.bf16.mxu1 %v963_v11  ;;  %v992_v39 = vld [vmem:[%s1214_s0 + $0x64] ss:$12 sps:$4 sm:$0xff]   ;;  %v994_v41 = vld [vmem:[%s1214_s0 + $0x60] ss:$12 sps:$4 sm:$0xff]   ;;  %v997_v42 = vld [vmem:[%s1214_s0 + $0x7c] ss:$12 sps:$4 sm:$0xff]  }
   0xf   :  { %847 = vmatpush3.bf16.msra.mxu0 %v962_v10  ;;  %v1004_v40 = vld [vmem:[%s1214_s0 + $0xb0] ss:$12 sps:$4 sm:$0xff]   ;;  %v999_v43 = vld [vmem:[%s1214_s0 + $0x78] ss:$12 sps:$4 sm:$0xff]   ;;  %v1000_v44 = vld [vmem:[%s1214_s0 + $0x94] ss:$12 sps:$4 sm:$0xff]  }
  0x10   :  { %848 = vmatprep.subr.bf16.mxu0 %v964_v12  ;;  %v1002_v45 = vld [vmem:[%s1214_s0 + $0x90] ss:$12 sps:$4 sm:$0xff]   ;;  %v1005_v46 = vld [vmem:[%s1214_s0 + $0xac] ss:$12 sps:$4 sm:$0xff]   ;;  %v1007_v47 = vld [vmem:[%s1214_s0 + $0xa8] ss:$12 sps:$4 sm:$0xff]  }
  0x11   :  { %927 = vmatpush3.bf16.msra.mxu1 %v963_v11 }
  0x12   :  { %928 = vmatprep.subr.bf16.mxu1 %v966_v13 }
  0x13   :  { %849 = vmatpush3.bf16.msra.mxu0 %v965_v14 }
  0x14   :  { %850 = vmatprep.subr.bf16.mxu0 %v967_v15 }
  0x15   :  { %929 = vmatpush3.bf16.msra.mxu1 %v966_v13 }
  0x16   :  { %930 = vmatprep.subr.bf16.mxu1 %v969_v16 }
  0x17   :  { %851 = vmatpush3.bf16.msra.mxu0 %v968_v17 }
  0x18   :  { %852 = vmatprep.subr.bf16.mxu0 %v970_v18 }
  0x19   :  { %931 = vmatpush3.bf16.msra.mxu1 %v969_v16 }
  0x1a   :  { %932 = vmatprep.subr.bf16.mxu1 %v972_v20 }
  0x1b   :  { %853 = vmatpush3.bf16.msra.mxu0 %v971_v19 }
  0x1c   :  { %854 = vmatprep.subr.bf16.mxu0 %v973_v21 }
  0x1d   :  { %933 = vmatpush3.bf16.msra.mxu1 %v972_v20 }
  0x1e   :  { %934 = vmatprep.subr.bf16.mxu1 %v975_v22 }
  0x1f   :  { %855 = vmatpush3.bf16.msra.mxu0 %v974_v25 }
  0x21   :  { %935 = vmatpush3.bf16.msra.mxu1 %v975_v22 }
  0x22   :  { %400 = vmatmul.mubr.bf16.vlgmr.msra.gmra.mrb[0].mxu0 %v976_v26 }
  0x23   :  { %407 = vmatprep.mubr.bf16.mxu0 %v981_v27 }
  0x24   :  { %937 = vmatmul.mubr.bf16.vlgmr.msra.gmra.mrb[0].mxu1 %v980_v28 }
  0x25   :  { %940 = vmatprep.mubr.bf16.mxu1 %v987_v29 }
  0x2a   :  { %408 = vmatmul.mubr.bf16.gmra.mrb[4].mxu0 %v983_v30 }
  0x2b   :  { %415 = vmatprep.mubr.bf16.mxu0 %v984_v31 }
  0x2c   :  { %941 = vmatmul.mubr.bf16.gmra.mrb[4].mxu1 %v988_v32 }
  0x2d   :  { %944 = vmatprep.mubr.bf16.mxu1 %v995_v33 }
  0x32   :  { %416 = vmatmul.mubr.bf16.gmra.mrb[8].mxu0 %v986_v34 }
  0x33   :  { %423 = vmatprep.mubr.bf16.mxu0 %v989_v35 }
  0x34   :  { %945 = vmatmul.mubr.bf16.gmra.mrb[8].mxu1 %v996_v36 }
  0x35   :  { %948 = vmatprep.mubr.bf16.mxu1 %v1003_v37 }
  0x3a   :  { %424 = vmatmul.mubr.bf16.gmra.mrb[12].mxu0 %v991_v38 }
  0x3b   :  { %431 = vmatprep.mubr.bf16.mxu0 %v992_v39 }
  0x3c   :  { %949 = vmatmul.mubr.bf16.gmra.mrb[12].mxu1 %v1004_v40 }
  0x42   :  { %432 = vmatmul.mubr.bf16.gmra.mrb[16].mxu0 %v994_v41 }
  0x43   :  { %439 = vmatprep.mubr.bf16.mxu0 %v997_v42 }
  0x4a   :  { %440 = vmatmul.mubr.bf16.gmra.mrb[20].mxu0 %v999_v43 }
  0x4b   :  { %447 = vmatprep.mubr.bf16.mxu0 %v1000_v44 }
  0x52   :  { %448 = vmatmul.mubr.bf16.gmra.mrb[24].mxu0 %v1002_v45 }
  0x53   :  { %455 = vmatprep.mubr.bf16.mxu0 %v1005_v46 }
  0x5a   :  { %456 = vmatmul.mubr.bf16.gmra.mrb[28].mxu0 %v1007_v47 }
  0xf5   :  { %v856_v48 = vpop.f32.mrb[0].mxu0 }
  0xf6   :  { %v857_v49 = vpop.f32.mrb[1].mxu0 }
  0xf7   :  { %v858_v50 = vadd.f32 %v857_v49, %v856_v48  ;;  %v859_v51 = vpop.f32.mrb[2].mxu0  ;;  %v938_v52 = vpop.f32.mrb[0].mxu1 }
  0xf8   :  { %v860_v53 = vpop.f32.mrb[3].mxu0  ;;  %v498_v54 = vpop.f32.mrb[1].mxu1 }
  0xf9   :  { %v861_v55 = vadd.f32 %v860_v53, %v859_v51  ;;  %v499_v56 = vadd.f32 %v858_v50, %v498_v54  ;;  %v939_v57 = vpop.f32.mrb[2].mxu1 }
  0xfa   :  { %v501_v58 = vpop.f32.mrb[3].mxu1 }
  0xfb   :  { %v502_v59 = vadd.f32 %v861_v55, %v501_v58  ;;  %v663_v60 = vmul.f32 %v499_v56, %v499_v56 }
  0xfd   :  { %v796_v61 = vpack.c.bf16 %v502_v59, %v499_v56  ;;  %v641_v62 = vadd.f32 %v502_v59, %v499_v56  ;;  %v664_v63 = vmul.f32 %v502_v59, %v502_v59  ;;  %v862_v0 = vpop.f32.mrb[4].mxu0 }
  0xfe   :  { %v863_v1 = vpop.f32.mrb[5].mxu0 }
  0xff   :  { %797 = vst [vmem:[%s1215_s2] sm:$0xff] %v796_v61   ;;  %v679_v2 = vadd.f32 %v664_v63, %v663_v60  ;;  %v864_v3 = vadd.f32 %v863_v1, %v862_v0  ;;  %v865_v4 = vpop.f32.mrb[6].mxu0  ;;  %v942_v5 = vpop.f32.mrb[4].mxu1 }
 0x100   :  { %v866_v6 = vpop.f32.mrb[7].mxu0  ;;  %v514_v7 = vpop.f32.mrb[5].mxu1 }
 0x101   :  { %v507_v8 = vadd.f32 %v938_v52, %v864_v3  ;;  %v867_v9 = vadd.f32 %v866_v6, %v865_v4  ;;  %v943_v10 = vpop.f32.mrb[6].mxu1 }
 0x102   :  { %v517_v11 = vpop.f32.mrb[7].mxu1 }
 0x103   :  { %v642_v12 = vadd.f32 %v641_v62, %v507_v8  ;;  %v665_v13 = vmul.f32 %v507_v8, %v507_v8  ;;  %v510_v14 = vadd.f32 %v939_v57, %v867_v9 }
 0x105   :  { %v680_v15 = vadd.f32 %v679_v2, %v665_v13  ;;  %v801_v16 = vpack.c.bf16 %v510_v14, %v507_v8  ;;  %v666_v17 = vmul.f32 %v510_v14, %v510_v14  ;;  %v868_v18 = vpop.f32.mrb[8].mxu0  ;;  %v643_v19 = vadd.f32 %v642_v12, %v510_v14 }
 0x106   :  { %v869_v20 = vpop.f32.mrb[9].mxu0 }
 0x107   :  { %833 = vst [vmem:[%s1215_s2 + $0x8] sm:$0xff] %v801_v16   ;;  %v870_v21 = vadd.f32 %v869_v20, %v868_v18  ;;  %v871_v22 = vpop.f32.mrb[10].mxu0  ;;  %v681_v23 = vadd.f32 %v680_v15, %v666_v17  ;;  %v946_v24 = vpop.f32.mrb[8].mxu1 }
 0x108   :  { %v872_v25 = vpop.f32.mrb[11].mxu0  ;;  %v530_v26 = vpop.f32.mrb[9].mxu1 }
 0x109   :  { %v873_v27 = vadd.f32 %v872_v25, %v871_v22  ;;  %v515_v28 = vadd.f32 %v870_v21, %v514_v7  ;;  %v947_v29 = vpop.f32.mrb[10].mxu1 }
 0x10a   :  { %v533_v30 = vpop.f32.mrb[11].mxu1 }
 0x10b   :  { %v644_v31 = vadd.f32 %v643_v19, %v515_v28  ;;  %v667_v32 = vmul.f32 %v515_v28, %v515_v28  ;;  %v518_v33 = vadd.f32 %v873_v27, %v517_v11 }
 0x10d   :  { %v682_v34 = vadd.f32 %v681_v23, %v667_v32  ;;  %v806_v35 = vpack.c.bf16 %v518_v33, %v515_v28  ;;  %v645_v36 = vadd.f32 %v644_v31, %v518_v33  ;;  %v668_v37 = vmul.f32 %v518_v33, %v518_v33  ;;  %v874_v38 = vpop.f32.mrb[12].mxu0 }
 0x10e   :  { %v875_v39 = vpop.f32.mrb[13].mxu0 }
 0x10f   :  { %834 = vst [vmem:[%s1215_s2 + $0x10] sm:$0xff] %v806_v35   ;;  %v683_v40 = vadd.f32 %v682_v34, %v668_v37  ;;  %v876_v41 = vadd.f32 %v875_v39, %v874_v38  ;;  %v877_v42 = vpop.f32.mrb[14].mxu0  ;;  %v1186_v43 = vpop.f32.mrb[12].mxu1 }
 0x110   :  { %v878_v44 = vpop.f32.mrb[15].mxu0  ;;  %v546_v45 = vpop.f32.mrb[13].mxu1 }
 0x111   :  { %v523_v46 = vadd.f32 %v942_v5, %v876_v41  ;;  %v879_v47 = vadd.f32 %v878_v44, %v877_v42  ;;  %v1188_v48 = vpop.f32.mrb[14].mxu1 }
 0x112   :  { %v549_v49 = vpop.f32.mrb[15].mxu1 }
 0x113   :  { %v646_v50 = vadd.f32 %v645_v36, %v523_v46  ;;  %v669_v51 = vmul.f32 %v523_v46, %v523_v46  ;;  %v526_v52 = vadd.f32 %v943_v10, %v879_v47 }
 0x115   :  { %v684_v53 = vadd.f32 %v683_v40, %v669_v51  ;;  %v811_v54 = vpack.c.bf16 %v526_v52, %v523_v46  ;;  %v670_v55 = vmul.f32 %v526_v52, %v526_v52  ;;  %v880_v56 = vpop.f32.mrb[16].mxu0  ;;  %v647_v57 = vadd.f32 %v646_v50, %v526_v52 }
 0x116   :  { %v881_v58 = vpop.f32.mrb[17].mxu0 }
 0x117   :  { %835 = vst [vmem:[%s1215_s2 + $0x18] sm:$0xff] %v811_v54   ;;  %v882_v59 = vadd.f32 %v881_v58, %v880_v56  ;;  %v883_v60 = vpop.f32.mrb[18].mxu0  ;;  %v685_v61 = vadd.f32 %v684_v53, %v670_v55 }
 0x118   :  { %v884_v62 = vpop.f32.mrb[19].mxu0 }
 0x119   :  { %v885_v63 = vadd.f32 %v884_v62, %v883_v60  ;;  %v531_v0 = vadd.f32 %v882_v59, %v530_v26 }
 0x11b   :  { %v648_v1 = vadd.f32 %v647_v57, %v531_v0  ;;  %v671_v2 = vmul.f32 %v531_v0, %v531_v0  ;;  %v534_v3 = vadd.f32 %v885_v63, %v533_v30 }
 0x11d   :  { %v686_v4 = vadd.f32 %v685_v61, %v671_v2  ;;  %v816_v5 = vpack.c.bf16 %v534_v3, %v531_v0  ;;  %v649_v6 = vadd.f32 %v648_v1, %v534_v3  ;;  %v672_v7 = vmul.f32 %v534_v3, %v534_v3  ;;  %v886_v8 = vpop.f32.mrb[20].mxu0 }
 0x11e   :  { %v887_v9 = vpop.f32.mrb[21].mxu0 }
 0x11f   :  { %836 = vst [vmem:[%s1215_s2 + $0x20] sm:$0xff] %v816_v5   ;;  %v687_v10 = vadd.f32 %v686_v4, %v672_v7  ;;  %v888_v11 = vadd.f32 %v887_v9, %v886_v8  ;;  %v889_v12 = vpop.f32.mrb[22].mxu0 }
 0x120   :  { %v890_v13 = vpop.f32.mrb[23].mxu0 }
 0x121   :  { %v539_v14 = vadd.f32 %v946_v24, %v888_v11  ;;  %v891_v15 = vadd.f32 %v890_v13, %v889_v12 }
 0x123   :  { %v650_v16 = vadd.f32 %v649_v6, %v539_v14  ;;  %v673_v17 = vmul.f32 %v539_v14, %v539_v14  ;;  %v542_v18 = vadd.f32 %v947_v29, %v891_v15 }
 0x125   :  { %v688_v19 = vadd.f32 %v687_v10, %v673_v17  ;;  %v821_v20 = vpack.c.bf16 %v542_v18, %v539_v14  ;;  %v674_v21 = vmul.f32 %v542_v18, %v542_v18  ;;  %v892_v22 = vpop.f32.mrb[24].mxu0  ;;  %v651_v23 = vadd.f32 %v650_v16, %v542_v18 }
 0x126   :  { %v893_v25 = vpop.f32.mrb[25].mxu0 }
 0x127   :  { %837 = vst [vmem:[%s1215_s2 + $0x28] sm:$0xff] %v821_v20   ;;  %v894_v26 = vadd.f32 %v893_v25, %v892_v22  ;;  %v895_v27 = vpop.f32.mrb[26].mxu0  ;;  %v689_v28 = vadd.f32 %v688_v19, %v674_v21 }
 0x128   :  { %v896_v30 = vpop.f32.mrb[27].mxu0 }
 0x129   :  { %v897_v31 = vadd.f32 %v896_v30, %v895_v27  ;;  %v547_v24 = vadd.f32 %v894_v26, %v546_v45 }
 0x12b   :  { %v652_v32 = vadd.f32 %v651_v23, %v547_v24  ;;  %v675_v33 = vmul.f32 %v547_v24, %v547_v24  ;;  %v550_v34 = vadd.f32 %v897_v31, %v549_v49 }
 0x12d   :  { %v690_v29 = vadd.f32 %v689_v28, %v675_v33  ;;  %v826_v35 = vpack.c.bf16 %v550_v34, %v547_v24  ;;  %v653_v36 = vadd.f32 %v652_v32, %v550_v34  ;;  %v676_v37 = vmul.f32 %v550_v34, %v550_v34  ;;  %v898_v38 = vpop.f32.mrb[28].mxu0 }
 0x12e   :  { %v899_v39 = vpop.f32.mrb[29].mxu0 }
 0x12f   :  { %838 = vst [vmem:[%s1215_s2 + $0x30] sm:$0xff] %v826_v35   ;;  %v691_v40 = vadd.f32 %v690_v29, %v676_v37  ;;  %v900_v41 = vadd.f32 %v899_v39, %v898_v38  ;;  %v901_v42 = vpop.f32.mrb[30].mxu0 }
 0x130   :  { %v902_v44 = vpop.f32.mrb[31].mxu0 }
 0x131   :  { %v555_v46 = vadd.f32 %v1186_v43, %v900_v41  ;;  %v903_v45 = vadd.f32 %v902_v44, %v901_v42 }
 0x133   :  { %v654_v47 = vadd.f32 %v653_v36, %v555_v46  ;;  %v677_v50 = vmul.f32 %v555_v46, %v555_v46  ;;  %v558_v49 = vadd.f32 %v1188_v48, %v903_v45 }
 0x135   :  { %v692_v51 = vadd.f32 %v691_v40, %v677_v50  ;;  %v831_v52 = vpack.c.bf16 %v558_v49, %v555_v46  ;;  %v655_v53 = vadd.f32 %v654_v47, %v558_v49  ;;  %v678_v54 = vmul.f32 %v558_v49, %v558_v49 }
 0x137   :  { %839 = vst [vmem:[%s1215_s2 + $0x38] sm:$0xff] %v831_v52   ;;  %v656_v55 = vrot.slane %v655_v53, 4  ;;  %v693_v56 = vadd.f32 %v692_v51, %v678_v54 }
 0x139   :  { %v657_v57 = vadd.f32 %v656_v55, %v655_v53  ;;  %v694_v58 = vrot.slane %v693_v56, 4 }
 0x13b   :  { %v658_v59 = vrot.slane %v657_v57, 2  ;;  %v695_v60 = vadd.f32 %v694_v58, %v693_v56 }
 0x13d   :  { %v659_v43 = vadd.f32 %v658_v59, %v657_v57  ;;  %v696_v61 = vrot.slane %v695_v60, 2 }
 0x13f   :  { %v660_v62 = vrot.slane %v659_v43, 1  ;;  %v697_v63 = vadd.f32 %v696_v61, %v695_v60 }
 0x141   :  { %v661_v0 = vadd.f32 %v660_v62, %v659_v43  ;;  %v698_v48 = vrot.slane %v697_v63, 1 }
 0x143   :  { %662 = vst [vmem:[%s1216_s3] sm:$0x1] %v661_v0  ;;  %v699_v1 = vadd.f32 %v698_v48, %v697_v63 }
 0x145   :  { %700 = vst [vmem:[%s1217_s4] sm:$0x1] %v699_v1 }

// kernel: res_disparity_refinement_forward.24
= control target key start
LH: loop header
LB: loop body
LE: loop exit
PB: predicated region body
PF: predicated region fallthrough
CT: control target
= control target key end

     0   :  { %s1821_s1 = inlined_call_operand.vmem [shape: bf16[640,128], index: 1, kind: input, shape index: {}]   ;;  %s1822_s0 = inlined_call_operand.vmem [shape: bf16[128,640], index: 0, kind: input, shape index: {}]   ;;  %s1823_s2 = inlined_call_operand.vmem [shape: bf16[128,128], index: 2, kind: output, shape index: {0}]   ;;  %s1824_s3 = inlined_call_operand.vmem [shape: f32[1,1,128], index: 3, kind: output, shape index: {1}]   ;;  %s1825_s4 = inlined_call_operand.vmem [shape: f32[1,1,128], index: 4, kind: output, shape index: {2}]  }
   0x1   :  { %v1385_v0 = vld [vmem:[%s1821_s1 + $0x40] sm:$0xff]   ;;  %v1389_v4 = vld [vmem:[%s1821_s1 + $0x48] sm:$0xff]   ;;  %v1393_v8 = vld [vmem:[%s1821_s1 + $0x50] sm:$0xff]  }
   0x2   :  { %v1386_v1 = vld [vmem:[%s1821_s1 + $0xc0] sm:$0xff]   ;;  %1193 = vmatprep.subr.bf16.mxu0 %v1385_v0  ;;  %v1390_v5 = vld [vmem:[%s1821_s1 + $0xc8] sm:$0xff]   ;;  %v1394_v9 = vld [vmem:[%s1821_s1 + $0xd0] sm:$0xff]  }
   0x3   :  { %v1387_v2 = vld [vmem:[%s1821_s1] sm:$0xff]   ;;  %1257 = vmatprep.subr.bf16.mxu1 %v1386_v1  ;;  %v1391_v6 = vld [vmem:[%s1821_s1 + $0x8] sm:$0xff]   ;;  %v1395_v10 = vld [vmem:[%s1821_s1 + $0x10] sm:$0xff]  }
   0x4   :  { %v1388_v3 = vld [vmem:[%s1821_s1 + $0x80] sm:$0xff]   ;;  %1194 = vmatpush3.bf16.msra.mxu0 %v1387_v2  ;;  %v1392_v7 = vld [vmem:[%s1821_s1 + $0x88] sm:$0xff]   ;;  %v1396_v11 = vld [vmem:[%s1821_s1 + $0x90] sm:$0xff]  }
   0x5   :  { %1258 = vmatpush3.bf16.msra.mxu1 %v1388_v3  ;;  %1195 = vmatprep.subr.bf16.mxu0 %v1389_v4  ;;  %v1397_v12 = vld [vmem:[%s1821_s1 + $0x58] sm:$0xff]   ;;  %v1401_v16 = vld [vmem:[%s1821_s1 + $0x60] sm:$0xff]   ;;  %v1405_v20 = vld [vmem:[%s1821_s1 + $0x68] sm:$0xff]  }
   0x6   :  { %1259 = vmatprep.subr.bf16.mxu1 %v1390_v5  ;;  %v1398_v13 = vld [vmem:[%s1821_s1 + $0xd8] sm:$0xff]   ;;  %v1402_v17 = vld [vmem:[%s1821_s1 + $0xe0] sm:$0xff]   ;;  %v1406_v21 = vld [vmem:[%s1821_s1 + $0xe8] sm:$0xff]  }
   0x7   :  { %v1399_v14 = vld [vmem:[%s1821_s1 + $0x18] sm:$0xff]   ;;  %v1403_v18 = vld [vmem:[%s1821_s1 + $0x20] sm:$0xff]   ;;  %v1407_v22 = vld [vmem:[%s1821_s1 + $0x28] sm:$0xff]  }
   0x8   :  { %1196 = vmatpush3.bf16.msra.mxu0 %v1391_v6  ;;  %v1400_v15 = vld [vmem:[%s1821_s1 + $0x98] sm:$0xff]   ;;  %v1404_v19 = vld [vmem:[%s1821_s1 + $0xa0] sm:$0xff]   ;;  %v1408_v23 = vld [vmem:[%s1821_s1 + $0xa8] sm:$0xff]  }
   0x9   :  { %1260 = vmatpush3.bf16.msra.mxu1 %v1392_v7  ;;  %1197 = vmatprep.subr.bf16.mxu0 %v1393_v8  ;;  %v1409_v24 = vld [vmem:[%s1821_s1 + $0x70] sm:$0xff]   ;;  %v1413_v28 = vld [vmem:[%s1821_s1 + $0x78] sm:$0xff]   ;;  %v1422_v35 = vld [vmem:[%s1822_s0 + $0xc] ss:$20 sps:$4 sm:$0xff]  }
   0xa   :  { %1261 = vmatprep.subr.bf16.mxu1 %v1394_v9  ;;  %v1410_v25 = vld [vmem:[%s1821_s1 + $0xf0] sm:$0xff]   ;;  %v1414_v29 = vld [vmem:[%s1821_s1 + $0xf8] sm:$0xff]   ;;  %v1423_v36 = vld [vmem:[%s1821_s1 + $0x100] sm:$0xff]   ;;  %720 = vmatprep.mubr.bf16.mxu1 %v1422_v35 }
   0xb   :  { %v1411_v26 = vld [vmem:[%s1821_s1 + $0x30] sm:$0xff]   ;;  %v1415_v30 = vld [vmem:[%s1821_s1 + $0x38] sm:$0xff]   ;;  %v1424_v37 = vld [vmem:[%s1822_s0 + $0x2c] ss:$20 sps:$4 sm:$0xff]  }
   0xc   :  { %1198 = vmatpush3.bf16.msra.mxu0 %v1395_v10  ;;  %v1412_v27 = vld [vmem:[%s1821_s1 + $0xb0] sm:$0xff]   ;;  %v1416_v31 = vld [vmem:[%s1821_s1 + $0xb8] sm:$0xff]   ;;  %v1430_v39 = vld [vmem:[%s1821_s1 + $0x108] sm:$0xff]  }
   0xd   :  { %1262 = vmatpush3.bf16.msra.mxu1 %v1396_v11  ;;  %1199 = vmatprep.subr.bf16.mxu0 %v1397_v12  ;;  %v1417_v32 = vld [vmem:[%s1822_s0] ss:$20 sps:$4 sm:$0xff]   ;;  %v1419_v33 = vld [vmem:[%s1822_s0 + $0x4] ss:$20 sps:$4 sm:$0xff]   ;;  %v1420_v34 = vld [vmem:[%s1822_s0 + $0x8] ss:$20 sps:$4 sm:$0xff]  }
   0xe   :  { %1263 = vmatprep.subr.bf16.mxu1 %v1398_v13  ;;  %623 = vmatprep.mubr.bf16.mxu0 %v1419_v33  ;;  %v1426_v38 = vld [vmem:[%s1822_s0 + $0x34] ss:$20 sps:$4 sm:$0xff]   ;;  %v1429_v41 = vld [vmem:[%s1822_s0 + $0x30] ss:$20 sps:$4 sm:$0xff]   ;;  %v1444_v45 = vld [vmem:[%s1821_s1 + $0x118] sm:$0xff]  }
   0xf   :  { %v1428_v40 = vld [vmem:[%s1822_s0 + $0x28] ss:$20 sps:$4 sm:$0xff]   ;;  %v1437_v44 = vld [vmem:[%s1821_s1 + $0x110] sm:$0xff]   ;;  %v1436_v47 = vld [vmem:[%s1822_s0 + $0x58] ss:$20 sps:$4 sm:$0xff]  }
  0x10   :  { %1200 = vmatpush3.bf16.msra.mxu0 %v1399_v14  ;;  %v1431_v42 = vld [vmem:[%s1822_s0 + $0x54] ss:$20 sps:$4 sm:$0xff]   ;;  %v1433_v43 = vld [vmem:[%s1822_s0 + $0x5c] ss:$20 sps:$4 sm:$0xff]   ;;  %v1440_v49 = vld [vmem:[%s1822_s0 + $0x84] ss:$20 sps:$4 sm:$0xff]  }
  0x11   :  { %1264 = vmatpush3.bf16.msra.mxu1 %v1400_v15  ;;  %1201 = vmatprep.subr.bf16.mxu0 %v1401_v16  ;;  %v1435_v46 = vld [vmem:[%s1822_s0 + $0x50] ss:$20 sps:$4 sm:$0xff]   ;;  %v1458_v51 = vld [vmem:[%s1821_s1 + $0x128] sm:$0xff]   ;;  %v1443_v53 = vld [vmem:[%s1822_s0 + $0x80] ss:$20 sps:$4 sm:$0xff]  }
  0x12   :  { %1265 = vmatprep.subr.bf16.mxu1 %v1402_v17  ;;  %v1438_v48 = vld [vmem:[%s1822_s0 + $0x7c] ss:$20 sps:$4 sm:$0xff]   ;;  %v1451_v50 = vld [vmem:[%s1821_s1 + $0x120] sm:$0xff]   ;;  %v1442_v52 = vld [vmem:[%s1822_s0 + $0x78] ss:$20 sps:$4 sm:$0xff]  }
  0x13   :  { %v1445_v54 = vld [vmem:[%s1822_s0 + $0xa4] ss:$20 sps:$4 sm:$0xff]   ;;  %v1465_v55 = vld [vmem:[%s1821_s1 + $0x130] sm:$0xff]   ;;  %v1447_v56 = vld [vmem:[%s1822_s0 + $0xac] ss:$20 sps:$4 sm:$0xff]  }
  0x14   :  { %1202 = vmatpush3.bf16.msra.mxu0 %v1403_v18  ;;  %v1472_v57 = vld [vmem:[%s1821_s1 + $0x138] sm:$0xff]   ;;  %v1449_v58 = vld [vmem:[%s1822_s0 + $0xa0] ss:$20 sps:$4 sm:$0xff]   ;;  %v1457_v63 = vld [vmem:[%s1822_s0 + $0xd0] ss:$20 sps:$4 sm:$0xff]  }
  0x15   :  { %1266 = vmatpush3.bf16.msra.mxu1 %v1404_v19  ;;  %1203 = vmatprep.subr.bf16.mxu0 %v1405_v20  ;;  %v1450_v59 = vld [vmem:[%s1822_s0 + $0xa8] ss:$20 sps:$4 sm:$0xff]   ;;  %v1452_v60 = vld [vmem:[%s1822_s0 + $0xcc] ss:$20 sps:$4 sm:$0xff]   ;;  %v1463_v2 = vld [vmem:[%s1822_s0 + $0xf0] ss:$20 sps:$4 sm:$0xff]  }
  0x16   :  { %1267 = vmatprep.subr.bf16.mxu1 %v1406_v21  ;;  %v1454_v61 = vld [vmem:[%s1822_s0 + $0xd4] ss:$20 sps:$4 sm:$0xff]   ;;  %v1461_v1 = vld [vmem:[%s1822_s0 + $0xfc] ss:$20 sps:$4 sm:$0xff]   ;;  %v1464_v3 = vld [vmem:[%s1822_s0 + $0xf8] ss:$20 sps:$4 sm:$0xff]  }
  0x17   :  { %v1456_v62 = vld [vmem:[%s1822_s0 + $0xc8] ss:$20 sps:$4 sm:$0xff]   ;;  %v1468_v5 = vld [vmem:[%s1822_s0 + $0x124] ss:$20 sps:$4 sm:$0xff]   ;;  %v1471_v7 = vld [vmem:[%s1822_s0 + $0x120] ss:$20 sps:$4 sm:$0xff]  }
  0x18   :  { %1204 = vmatpush3.bf16.msra.mxu0 %v1407_v22  ;;  %v1459_v0 = vld [vmem:[%s1822_s0 + $0xf4] ss:$20 sps:$4 sm:$0xff]   ;;  %v1466_v4 = vld [vmem:[%s1822_s0 + $0x11c] ss:$20 sps:$4 sm:$0xff]   ;;  %v1470_v6 = vld [vmem:[%s1822_s0 + $0x118] ss:$20 sps:$4 sm:$0xff]  }
  0x19   :  { %1268 = vmatpush3.bf16.msra.mxu1 %v1408_v23  ;;  %1205 = vmatprep.subr.bf16.mxu0 %v1409_v24  ;;  %v1473_v8 = vld [vmem:[%s1822_s0 + $0x10] ss:$20 sps:$4 sm:$0xff]   ;;  %v1475_v10 = vld [vmem:[%s1822_s0 + $0x38] ss:$20 sps:$4 sm:$0xff]   ;;  %v1477_v12 = vld [vmem:[%s1822_s0 + $0x60] ss:$20 sps:$4 sm:$0xff]  }
  0x1a   :  { %1269 = vmatprep.subr.bf16.mxu1 %v1410_v25  ;;  %v1474_v9 = vld [vmem:[%s1822_s0 + $0xb0] ss:$20 sps:$4 sm:$0xff]   ;;  %v1476_v11 = vld [vmem:[%s1822_s0 + $0xd8] ss:$20 sps:$4 sm:$0xff]   ;;  %v1478_v13 = vld [vmem:[%s1822_s0 + $0x100] ss:$20 sps:$4 sm:$0xff]  }
  0x1b   :  { %v1479_v14 = vld [vmem:[%s1822_s0 + $0x88] ss:$20 sps:$4 sm:$0xff]  }
  0x1c   :  { %1206 = vmatpush3.bf16.msra.mxu0 %v1411_v26  ;;  %v1480_v15 = vld [vmem:[%s1822_s0 + $0x128] ss:$20 sps:$4 sm:$0xff]  }
  0x1d   :  { %1270 = vmatpush3.bf16.msra.mxu1 %v1412_v27  ;;  %1207 = vmatprep.subr.bf16.mxu0 %v1413_v28 }
  0x1e   :  { %1271 = vmatprep.subr.bf16.mxu1 %v1414_v29 }
  0x20   :  { %1208 = vmatpush3.bf16.msra.mxu0 %v1415_v30 }
  0x21   :  { %1272 = vmatpush3.bf16.msra.mxu1 %v1416_v31  ;;  %1337 = vmatprep.subr.bf16.mxu0 %v1423_v36 }
  0x22   :  { %1369 = vmatprep.subr.bf16.mxu1 %v1423_v36 }
  0x23   :  { %624 = vmatmul.mubr.bf16.vlgmr.msra.gmra.mrb[0].mxu0 %v1417_v32 }
  0x24   :  { %721 = vmatmul.mubr.bf16.vlgmr.msra.gmra.mrb[0].mxu1 %v1420_v34  ;;  %1338 = vmatpush3.bf16.msra.mxu0 %v1423_v36 }
  0x25   :  { %631 = vmatprep.mubr.bf16.mxu0 %v1424_v37  ;;  %728 = vmatprep.mubr.bf16.mxu1 %v1426_v38 }
  0x26   :  { %1377 = vmatpush3.bf16.msra.mxu1 %v1423_v36  ;;  %1339 = vmatprep.subr.bf16.mxu0 %v1430_v39 }
  0x27   :  { %1370 = vmatprep.subr.bf16.mxu1 %v1430_v39 }
  0x28   :  { %1340 = vmatpush3.bf16.msra.mxu0 %v1430_v39 }
  0x29   :  { %1341 = vmatprep.subr.bf16.mxu0 %v1437_v44 }
  0x2a   :  { %1378 = vmatpush3.bf16.msra.mxu1 %v1430_v39 }
  0x2b   :  { %632 = vmatmul.mubr.bf16.gmra.mrb[4].mxu0 %v1428_v40  ;;  %1371 = vmatprep.subr.bf16.mxu1 %v1437_v44 }
  0x2c   :  { %729 = vmatmul.mubr.bf16.gmra.mrb[4].mxu1 %v1429_v41  ;;  %639 = vmatprep.mubr.bf16.mxu0 %v1431_v42 }
  0x2d   :  { %736 = vmatprep.mubr.bf16.mxu1 %v1433_v43  ;;  %1342 = vmatpush3.bf16.msra.mxu0 %v1437_v44 }
  0x2e   :  { %1343 = vmatprep.subr.bf16.mxu0 %v1444_v45  ;;  %1379 = vmatpush3.bf16.msra.mxu1 %v1437_v44 }
  0x2f   :  { %1372 = vmatprep.subr.bf16.mxu1 %v1444_v45 }
  0x31   :  { %1344 = vmatpush3.bf16.msra.mxu0 %v1444_v45 }
  0x32   :  { %1345 = vmatprep.subr.bf16.mxu0 %v1451_v50  ;;  %1380 = vmatpush3.bf16.msra.mxu1 %v1444_v45 }
  0x33   :  { %640 = vmatmul.mubr.bf16.gmra.mrb[8].mxu0 %v1435_v46  ;;  %1373 = vmatprep.subr.bf16.mxu1 %v1451_v50 }
  0x34   :  { %737 = vmatmul.mubr.bf16.gmra.mrb[8].mxu1 %v1436_v47  ;;  %647 = vmatprep.mubr.bf16.mxu0 %v1438_v48 }
  0x35   :  { %744 = vmatprep.mubr.bf16.mxu1 %v1440_v49  ;;  %1346 = vmatpush3.bf16.msra.mxu0 %v1451_v50 }
  0x36   :  { %1347 = vmatprep.subr.bf16.mxu0 %v1458_v51  ;;  %1381 = vmatpush3.bf16.msra.mxu1 %v1451_v50 }
  0x37   :  { %1374 = vmatprep.subr.bf16.mxu1 %v1458_v51 }
  0x39   :  { %1348 = vmatpush3.bf16.msra.mxu0 %v1458_v51 }
  0x3a   :  { %1349 = vmatprep.subr.bf16.mxu0 %v1465_v55  ;;  %1382 = vmatpush3.bf16.msra.mxu1 %v1458_v51 }
  0x3b   :  { %648 = vmatmul.mubr.bf16.gmra.mrb[12].mxu0 %v1442_v52  ;;  %1375 = vmatprep.subr.bf16.mxu1 %v1465_v55 }
  0x3c   :  { %745 = vmatmul.mubr.bf16.gmra.mrb[12].mxu1 %v1443_v53  ;;  %655 = vmatprep.mubr.bf16.mxu0 %v1445_v54 }
  0x3d   :  { %752 = vmatprep.mubr.bf16.mxu1 %v1447_v56  ;;  %1350 = vmatpush3.bf16.msra.mxu0 %v1465_v55 }
  0x3e   :  { %1351 = vmatprep.subr.bf16.mxu0 %v1472_v57  ;;  %1383 = vmatpush3.bf16.msra.mxu1 %v1465_v55 }
  0x3f   :  { %1376 = vmatprep.subr.bf16.mxu1 %v1472_v57 }
  0x41   :  { %1352 = vmatpush3.bf16.msra.mxu0 %v1472_v57 }
  0x42   :  { %1384 = vmatpush3.bf16.msra.mxu1 %v1472_v57 }
  0x43   :  { %656 = vmatmul.mubr.bf16.gmra.mrb[16].mxu0 %v1449_v58 }
  0x44   :  { %753 = vmatmul.mubr.bf16.gmra.mrb[16].mxu1 %v1450_v59  ;;  %663 = vmatprep.mubr.bf16.mxu0 %v1452_v60 }
  0x45   :  { %760 = vmatprep.mubr.bf16.mxu1 %v1454_v61 }
  0x4b   :  { %664 = vmatmul.mubr.bf16.gmra.mrb[20].mxu0 %v1456_v62 }
  0x4c   :  { %761 = vmatmul.mubr.bf16.gmra.mrb[20].mxu1 %v1457_v63  ;;  %671 = vmatprep.mubr.bf16.mxu0 %v1459_v0 }
  0x4d   :  { %768 = vmatprep.mubr.bf16.mxu1 %v1461_v1 }
  0x53   :  { %672 = vmatmul.mubr.bf16.gmra.mrb[24].mxu0 %v1463_v2 }
  0x54   :  { %769 = vmatmul.mubr.bf16.gmra.mrb[24].mxu1 %v1464_v3  ;;  %679 = vmatprep.mubr.bf16.mxu0 %v1466_v4 }
  0x55   :  { %776 = vmatprep.mubr.bf16.mxu1 %v1468_v5 }
  0x5b   :  { %680 = vmatmul.mubr.bf16.gmra.mrb[28].mxu0 %v1470_v6 }
  0x5c   :  { %777 = vmatmul.mubr.bf16.gmra.mrb[28].mxu1 %v1471_v7  ;;  %1353 = vmatprep.mubr.bf16.mxu0 %v1473_v8 }
  0x5d   :  { %1361 = vmatprep.mubr.bf16.mxu1 %v1474_v9 }
  0x63   :  { %1354 = vmatmul.mubr.bf16.vlgmr.msra.gmra.mrb[32].mxu0 %v1475_v10 }
  0x64   :  { %1362 = vmatmul.mubr.bf16.vlgmr.msra.gmra.mrb[32].mxu1 %v1476_v11  ;;  %1357 = vmatprep.mubr.bf16.mxu0 %v1477_v12 }
  0x65   :  { %1365 = vmatprep.mubr.bf16.mxu1 %v1478_v13 }
  0x6b   :  { %1358 = vmatmul.mubr.bf16.gmra.mrb[36].mxu0 %v1479_v14 }
  0x6c   :  { %1366 = vmatmul.mubr.bf16.gmra.mrb[36].mxu1 %v1480_v15 }
  0xf6   :  { %v1209_v16 = vpop.f32.mrb[0].mxu0 }
  0xf7   :  { %v1273_v17 = vpop.f32.mrb[0].mxu1  ;;  %v1210_v18 = vpop.f32.mrb[1].mxu0 }
  0xf8   :  { %v1211_v19 = vadd.f32 %v1210_v18, %v1209_v16  ;;  %v1274_v20 = vpop.f32.mrb[1].mxu1  ;;  %v1212_v21 = vpop.f32.mrb[2].mxu0 }
  0xf9   :  { %v1275_v22 = vadd.f32 %v1274_v20, %v1273_v17  ;;  %v1276_v23 = vpop.f32.mrb[2].mxu1  ;;  %v1213_v24 = vpop.f32.mrb[3].mxu0 }
  0xfa   :  { %v1214_v25 = vadd.f32 %v1213_v24, %v1212_v21  ;;  %v1277_v26 = vpop.f32.mrb[3].mxu1 }
  0xfb   :  { %v1278_v27 = vadd.f32 %v1277_v26, %v1276_v23  ;;  %v1746_v28 = vadd.f32 %v1275_v22, %v1211_v19 }
  0xfd   :  { %v1748_v29 = vadd.f32 %v1278_v27, %v1214_v25 }
  0xfe   :  { %v1215_v30 = vpop.f32.mrb[4].mxu0 }
  0xff   :  { %v1279_v31 = vpop.f32.mrb[4].mxu1  ;;  %v1216_v32 = vpop.f32.mrb[5].mxu0 }
 0x100   :  { %v1217_v33 = vadd.f32 %v1216_v32, %v1215_v30  ;;  %v1280_v34 = vpop.f32.mrb[5].mxu1  ;;  %v1218_v35 = vpop.f32.mrb[6].mxu0 }
 0x101   :  { %v1281_v36 = vadd.f32 %v1280_v34, %v1279_v31  ;;  %v1282_v37 = vpop.f32.mrb[6].mxu1  ;;  %v1219_v38 = vpop.f32.mrb[7].mxu0 }
 0x102   :  { %v1220_v39 = vadd.f32 %v1219_v38, %v1218_v35  ;;  %v1283_v40 = vpop.f32.mrb[7].mxu1 }
 0x103   :  { %v1284_v41 = vadd.f32 %v1283_v40, %v1282_v37  ;;  %v1750_v42 = vadd.f32 %v1281_v36, %v1217_v33 }
 0x105   :  { %v1752_v43 = vadd.f32 %v1284_v41, %v1220_v39 }
 0x106   :  { %v1221_v44 = vpop.f32.mrb[8].mxu0 }
 0x107   :  { %v1285_v45 = vpop.f32.mrb[8].mxu1  ;;  %v1222_v46 = vpop.f32.mrb[9].mxu0 }
 0x108   :  { %v1223_v47 = vadd.f32 %v1222_v46, %v1221_v44  ;;  %v1286_v48 = vpop.f32.mrb[9].mxu1  ;;  %v1224_v49 = vpop.f32.mrb[10].mxu0 }
 0x109   :  { %v1287_v50 = vadd.f32 %v1286_v48, %v1285_v45  ;;  %v1288_v51 = vpop.f32.mrb[10].mxu1  ;;  %v1225_v52 = vpop.f32.mrb[11].mxu0 }
 0x10a   :  { %v1226_v53 = vadd.f32 %v1225_v52, %v1224_v49  ;;  %v1289_v54 = vpop.f32.mrb[11].mxu1 }
 0x10b   :  { %v1290_v55 = vadd.f32 %v1289_v54, %v1288_v51  ;;  %v1754_v56 = vadd.f32 %v1287_v50, %v1223_v47 }
 0x10d   :  { %v1756_v57 = vadd.f32 %v1290_v55, %v1226_v53 }
 0x10e   :  { %v1227_v58 = vpop.f32.mrb[12].mxu0 }
 0x10f   :  { %v1291_v59 = vpop.f32.mrb[12].mxu1  ;;  %v1228_v60 = vpop.f32.mrb[13].mxu0 }
 0x110   :  { %v1229_v61 = vadd.f32 %v1228_v60, %v1227_v58  ;;  %v1292_v62 = vpop.f32.mrb[13].mxu1  ;;  %v1230_v63 = vpop.f32.mrb[14].mxu0 }
 0x111   :  { %v1293_v0 = vadd.f32 %v1292_v62, %v1291_v59  ;;  %v1294_v1 = vpop.f32.mrb[14].mxu1  ;;  %v1231_v2 = vpop.f32.mrb[15].mxu0 }
 0x112   :  { %v1232_v3 = vadd.f32 %v1231_v2, %v1230_v63  ;;  %v1295_v4 = vpop.f32.mrb[15].mxu1 }
 0x113   :  { %v1296_v5 = vadd.f32 %v1295_v4, %v1294_v1  ;;  %v1758_v6 = vadd.f32 %v1293_v0, %v1229_v61 }
 0x115   :  { %v1760_v7 = vadd.f32 %v1296_v5, %v1232_v3 }
 0x116   :  { %v1233_v8 = vpop.f32.mrb[16].mxu0 }
 0x117   :  { %v1297_v9 = vpop.f32.mrb[16].mxu1  ;;  %v1234_v10 = vpop.f32.mrb[17].mxu0 }
 0x118   :  { %v1235_v11 = vadd.f32 %v1234_v10, %v1233_v8  ;;  %v1298_v12 = vpop.f32.mrb[17].mxu1  ;;  %v1236_v13 = vpop.f32.mrb[18].mxu0 }
 0x119   :  { %v1299_v14 = vadd.f32 %v1298_v12, %v1297_v9  ;;  %v1300_v15 = vpop.f32.mrb[18].mxu1  ;;  %v1237_v16 = vpop.f32.mrb[19].mxu0 }
 0x11a   :  { %v1238_v17 = vadd.f32 %v1237_v16, %v1236_v13  ;;  %v1301_v18 = vpop.f32.mrb[19].mxu1 }
 0x11b   :  { %v1302_v19 = vadd.f32 %v1301_v18, %v1300_v15  ;;  %v755_v20 = vadd.f32 %v1299_v14, %v1235_v11 }
 0x11d   :  { %v758_v21 = vadd.f32 %v1302_v19, %v1238_v17 }
 0x11e   :  { %v1239_v22 = vpop.f32.mrb[20].mxu0 }
 0x11f   :  { %v1303_v23 = vpop.f32.mrb[20].mxu1  ;;  %v1240_v24 = vpop.f32.mrb[21].mxu0 }
 0x120   :  { %v1241_v25 = vadd.f32 %v1240_v24, %v1239_v22  ;;  %v1304_v26 = vpop.f32.mrb[21].mxu1  ;;  %v1242_v27 = vpop.f32.mrb[22].mxu0 }
 0x121   :  { %v1305_v30 = vadd.f32 %v1304_v26, %v1303_v23  ;;  %v1306_v31 = vpop.f32.mrb[22].mxu1  ;;  %v1243_v32 = vpop.f32.mrb[23].mxu0 }
 0x122   :  { %v1244_v33 = vadd.f32 %v1243_v32, %v1242_v27  ;;  %v1307_v34 = vpop.f32.mrb[23].mxu1 }
 0x123   :  { %v1308_v35 = vadd.f32 %v1307_v34, %v1306_v31  ;;  %v763_v36 = vadd.f32 %v1305_v30, %v1241_v25 }
 0x125   :  { %v766_v37 = vadd.f32 %v1308_v35, %v1244_v33 }
 0x126   :  { %v1245_v38 = vpop.f32.mrb[24].mxu0 }
 0x127   :  { %v1309_v39 = vpop.f32.mrb[24].mxu1  ;;  %v1246_v40 = vpop.f32.mrb[25].mxu0 }
 0x128   :  { %v1247_v41 = vadd.f32 %v1246_v40, %v1245_v38  ;;  %v1310_v44 = vpop.f32.mrb[25].mxu1  ;;  %v1248_v45 = vpop.f32.mrb[26].mxu0 }
 0x129   :  { %v1311_v46 = vadd.f32 %v1310_v44, %v1309_v39  ;;  %v1312_v47 = vpop.f32.mrb[26].mxu1  ;;  %v1249_v48 = vpop.f32.mrb[27].mxu0 }
 0x12a   :  { %v1250_v49 = vadd.f32 %v1249_v48, %v1248_v45  ;;  %v1313_v50 = vpop.f32.mrb[27].mxu1 }
 0x12b   :  { %v1314_v51 = vadd.f32 %v1313_v50, %v1312_v47  ;;  %v771_v52 = vadd.f32 %v1311_v46, %v1247_v41 }
 0x12d   :  { %v1762_v53 = vadd.f32 %v1314_v51, %v1250_v49 }
 0x12e   :  { %v1251_v54 = vpop.f32.mrb[28].mxu0 }
 0x12f   :  { %v1315_v55 = vpop.f32.mrb[28].mxu1  ;;  %v1252_v58 = vpop.f32.mrb[29].mxu0 }
 0x130   :  { %v1253_v59 = vadd.f32 %v1252_v58, %v1251_v54  ;;  %v1316_v60 = vpop.f32.mrb[29].mxu1  ;;  %v1254_v61 = vpop.f32.mrb[30].mxu0 }
 0x131   :  { %v1317_v62 = vadd.f32 %v1316_v60, %v1315_v55  ;;  %v1318_v63 = vpop.f32.mrb[30].mxu1  ;;  %v1255_v0 = vpop.f32.mrb[31].mxu0 }
 0x132   :  { %v1256_v1 = vadd.f32 %v1255_v0, %v1254_v61  ;;  %v1319_v2 = vpop.f32.mrb[31].mxu1 }
 0x133   :  { %v1320_v3 = vadd.f32 %v1319_v2, %v1318_v63  ;;  %v779_v4 = vadd.f32 %v1317_v62, %v1253_v59 }
 0x135   :  { %v782_v5 = vadd.f32 %v1320_v3, %v1256_v1 }
 0x136   :  { %v1355_v8 = vpop.f32.mrb[32].mxu0 }
 0x137   :  { %v828_v9 = vadd.f32 %v1355_v8, %v1750_v42  ;;  %v1363_v10 = vpop.f32.mrb[32].mxu1  ;;  %v819_v11 = vpop.f32.mrb[33].mxu0 }
 0x138   :  { %v1765_v12 = vadd.f32 %v1363_v10, %v763_v36  ;;  %v820_v13 = vadd.f32 %v819_v11, %v1746_v28  ;;  %v851_v14 = vpop.f32.mrb[33].mxu1  ;;  %v1356_v15 = vpop.f32.mrb[34].mxu0 }
 0x139   :  { %v1768_v16 = vadd.f32 %v851_v14, %v755_v20  ;;  %v831_v17 = vadd.f32 %v1356_v15, %v1752_v43  ;;  %v1364_v18 = vpop.f32.mrb[34].mxu1  ;;  %v822_v19 = vpop.f32.mrb[35].mxu0  ;;  %v986_v31 = vmul.f32 %v828_v9, %v828_v9 }
 0x13a   :  { %v1771_v22 = vadd.f32 %v1364_v18, %v766_v37  ;;  %v823_v23 = vadd.f32 %v822_v19, %v1748_v29  ;;  %v854_v24 = vpop.f32.mrb[35].mxu1  ;;  %v984_v30 = vmul.f32 %v820_v13, %v820_v13  ;;  %v994_v11 = vmul.f32 %v1765_v12, %v1765_v12 }
 0x13b   :  { %v1154_v42 = vpack.c.bf16 %v831_v17, %v828_v9  ;;  %v855_v25 = vadd.f32 %v854_v24, %v758_v21  ;;  %v987_v41 = vmul.f32 %v831_v17, %v831_v17  ;;  %v992_v3 = vmul.f32 %v1768_v16, %v1768_v16 }
 0x13c   :  { %v1174_v26 = vpack.c.bf16 %v1771_v22, %v1765_v12  ;;  %v1149_v27 = vpack.c.bf16 %v823_v23, %v820_v13  ;;  %v962_v28 = vadd.f32 %v823_v23, %v820_v13  ;;  %v985_v43 = vmul.f32 %v823_v23, %v823_v23 }
 0x13d   :  { %1186 = vst [vmem:[%s1823_s2 + $0x8] sm:$0xff] %v1154_v42   ;;  %v1169_v20 = vpack.c.bf16 %v855_v25, %v1768_v16  ;;  %v993_v8 = vmul.f32 %v855_v25, %v855_v25  ;;  %v995_v15 = vmul.f32 %v1771_v22, %v1771_v22 }
 0x13e   :  { %1190 = vst [vmem:[%s1823_s2 + $0x28] sm:$0xff] %v1174_v26   ;;  %1150 = vst [vmem:[%s1823_s2] sm:$0xff] %v1149_v27   ;;  %v963_v29 = vadd.f32 %v962_v28, %v828_v9  ;;  %v1359_v21 = vpop.f32.mrb[36].mxu0  ;;  %v1000_v32 = vadd.f32 %v985_v43, %v984_v30 }
 0x13f   :  { %1189 = vst [vmem:[%s1823_s2 + $0x20] sm:$0xff] %v1169_v20   ;;  %v844_v33 = vadd.f32 %v1359_v21, %v1758_v6  ;;  %v1367_v34 = vpop.f32.mrb[36].mxu1  ;;  %v835_v35 = vpop.f32.mrb[37].mxu0 }
 0x140   :  { %v876_v36 = vadd.f32 %v1367_v34, %v779_v4  ;;  %v836_v37 = vadd.f32 %v835_v35, %v1754_v56  ;;  %v964_v38 = vadd.f32 %v963_v29, %v831_v17  ;;  %v867_v39 = vpop.f32.mrb[37].mxu1  ;;  %v1360_v40 = vpop.f32.mrb[38].mxu0  ;;  %v1001_v44 = vadd.f32 %v1000_v32, %v986_v31 }
 0x141   :  { %v868_v45 = vadd.f32 %v867_v39, %v771_v52  ;;  %v847_v46 = vadd.f32 %v1360_v40, %v1760_v7  ;;  %v1368_v47 = vpop.f32.mrb[38].mxu1  ;;  %v838_v48 = vpop.f32.mrb[39].mxu0  ;;  %v990_v63 = vmul.f32 %v844_v33, %v844_v33 }
 0x142   :  { %v965_v49 = vadd.f32 %v964_v38, %v836_v37  ;;  %v988_v50 = vmul.f32 %v836_v37, %v836_v37  ;;  %v879_v51 = vadd.f32 %v1368_v47, %v782_v5  ;;  %v870_v54 = vpop.f32.mrb[39].mxu1  ;;  %v1002_v6 = vadd.f32 %v1001_v44, %v987_v41 }
 0x143   :  { %v1164_v55 = vpack.c.bf16 %v847_v46, %v844_v33  ;;  %v839_v59 = vadd.f32 %v838_v48, %v1756_v57  ;;  %v871_v56 = vadd.f32 %v870_v54, %v1762_v53  ;;  %v991_v0 = vmul.f32 %v847_v46, %v847_v46 }
 0x144   :  { %v1184_v58 = vpack.c.bf16 %v879_v51, %v876_v36  ;;  %v1003_v60 = vadd.f32 %v1002_v6, %v988_v50  ;;  %v996_v19 = vmul.f32 %v868_v45, %v868_v45  ;;  %v998_v27 = vmul.f32 %v876_v36, %v876_v36 }
 0x145   :  { %1188 = vst [vmem:[%s1823_s2 + $0x18] sm:$0xff] %v1164_v55   ;;  %v1159_v7 = vpack.c.bf16 %v839_v59, %v836_v37  ;;  %v966_v52 = vadd.f32 %v965_v49, %v839_v59  ;;  %v989_v61 = vmul.f32 %v839_v59, %v839_v59  ;;  %v1179_v62 = vpack.c.bf16 %v871_v56, %v868_v45 }
 0x146   :  { %1192 = vst [vmem:[%s1823_s2 + $0x38] sm:$0xff] %v1184_v58   ;;  %v997_v42 = vmul.f32 %v871_v56, %v871_v56  ;;  %v999_v30 = vmul.f32 %v879_v51, %v879_v51 }
 0x147   :  { %1187 = vst [vmem:[%s1823_s2 + $0x10] sm:$0xff] %v1159_v7   ;;  %v967_v57 = vadd.f32 %v966_v52, %v844_v33  ;;  %v1004_v53 = vadd.f32 %v1003_v60, %v989_v61  ;;  %1191 = vst [vmem:[%s1823_s2 + $0x30] sm:$0xff] %v1179_v62  }
 0x149   :  { %v968_v1 = vadd.f32 %v967_v57, %v847_v46  ;;  %v1005_v2 = vadd.f32 %v1004_v53, %v990_v63 }
 0x14b   :  { %v969_v4 = vadd.f32 %v968_v1, %v1768_v16  ;;  %v1006_v5 = vadd.f32 %v1005_v2, %v991_v0 }
 0x14d   :  { %v1007_v9 = vadd.f32 %v1006_v5, %v992_v3  ;;  %v970_v10 = vadd.f32 %v969_v4, %v855_v25 }
 0x14f   :  { %v971_v13 = vadd.f32 %v970_v10, %v1765_v12  ;;  %v1008_v14 = vadd.f32 %v1007_v9, %v993_v8 }
 0x151   :  { %v972_v17 = vadd.f32 %v971_v13, %v1771_v22  ;;  %v1009_v18 = vadd.f32 %v1008_v14, %v994_v11 }
 0x153   :  { %v973_v23 = vadd.f32 %v972_v17, %v868_v45  ;;  %v1010_v24 = vadd.f32 %v1009_v18, %v995_v15 }
 0x155   :  { %v974_v16 = vadd.f32 %v973_v23, %v871_v56  ;;  %v1011_v26 = vadd.f32 %v1010_v24, %v996_v19 }
 0x157   :  { %v975_v25 = vadd.f32 %v974_v16, %v876_v36  ;;  %v1012_v28 = vadd.f32 %v1011_v26, %v997_v42 }
 0x159   :  { %v976_v43 = vadd.f32 %v975_v25, %v879_v51  ;;  %v1013_v20 = vadd.f32 %v1012_v28, %v998_v27 }
 0x15b   :  { %v977_v12 = vrot.slane %v976_v43, 4  ;;  %v1014_v29 = vadd.f32 %v1013_v20, %v999_v30 }
 0x15d   :  { %v978_v21 = vadd.f32 %v977_v12, %v976_v43  ;;  %v1015_v31 = vrot.slane %v1014_v29, 4 }
 0x15f   :  { %v979_v32 = vrot.slane %v978_v21, 2  ;;  %v1016_v33 = vadd.f32 %v1015_v31, %v1014_v29 }
 0x161   :  { %v980_v22 = vadd.f32 %v979_v32, %v978_v21  ;;  %v1017_v34 = vrot.slane %v1016_v33, 2 }
 0x163   :  { %v981_v35 = vrot.slane %v980_v22, 1  ;;  %v1018_v37 = vadd.f32 %v1017_v34, %v1016_v33 }
 0x165   :  { %v982_v38 = vadd.f32 %v981_v35, %v980_v22  ;;  %v1019_v39 = vrot.slane %v1018_v37, 1 }
 0x167   :  { %983 = vst [vmem:[%s1824_s3] sm:$0x1] %v982_v38  ;;  %v1020_v36 = vadd.f32 %v1019_v39, %v1018_v37 }
 0x169   :  { %1021 = vst [vmem:[%s1825_s4] sm:$0x1] %v1020_v36 }

// kernel: res_disparity_refinement_forward.27
= control target key start
LH: loop header
LB: loop body
LE: loop exit
PB: predicated region body
PF: predicated region fallthrough
CT: control target
= control target key end

     0   :  { %s1198_s15 = smov 0   ;;  %s1200_s16 = smov 0   ;;  %s1376_s0 = inlined_call_operand.vmem [shape: bf16[128,256], index: 0, kind: input, shape index: {}]   ;;  %s1377_s1 = inlined_call_operand.vmem [shape: bf16[4,256,128], index: 1, kind: input, shape index: {}]   ;;  %s1378_s2 = inlined_call_operand.vmem [shape: bf16[4,128,128], index: 2, kind: output, shape index: {0}]   ;;  %s1379_s3 = inlined_call_operand.vmem [shape: f32[1,1,128], index: 3, kind: output, shape index: {1}]   ;;  %s1380_s4 = inlined_call_operand.vmem [shape: f32[1,1,128], index: 4, kind: output, shape index: {2}]  }
   0x1   :  { %s1202_s17 = smov 0  }
   0x2 LB: > { %s24_s18 = sadd.s32 1, %s1166_s16  ;;  %p880_p0 = scmp.ge.s32.totalorder %s1170_s17, 1  ;;  %s1170_s17 = sphi %s1202_s17, %s15_s17   ;;  %s1166_s16 = sphi %s1200_s16, %s1382_s16   ;;  %s1162_s15 = sphi %s1198_s15, %s1381_s15  }
   0x3   : > { %p25_p1 = scmp.ge.s32.totalorder %s24_s18, 4  ;;  %p193_p2 = scmp.lt.s32.totalorder %s1170_s17, 5 }
   0x5   : > { %s1384_s18 = smov (%p25_p1, %s24_s18), 0  ;;  %p194_p3 = pnand %p880_p0, %p193_p2 }
   0x6   : > { %p242_p4 = scmp.lt.s32.totalorder (!%p194_p3), %s1162_s15, 3  ;;  %v1126_v0 = vld [vmem:[%s1376_s0 + $0x4] ss:$8 sps:$4 sm:$0xff] (!%p194_p3)   ;;  %v1124_v18 = vld [vmem:[%s1376_s0] ss:$8 sps:$4 sm:$0xff] (!%p194_p3)   ;;  %p933_p5 = scmp.ne.s32.totalorder (!%p194_p3), %s1162_s15, 0 }
   0x7   : > { %197 = sbr.rel (%p194_p3) target bundleno = 342 (0x156), region = 28  ;;  %v1129_v1 = vld [vmem:[%s1376_s0 + $0x44] ss:$8 sps:$4 sm:$0xff] (!%p194_p3)   ;;  %520 = vmatprep.mubr.bf16.mxu0 (!%p194_p3), %v1126_v0  ;;  %v1127_v19 = vld [vmem:[%s1376_s0 + $0x40] ss:$8 sps:$4 sm:$0xff] (!%p194_p3)  }
   0x8   : > { %552 = vmatprep.mubr.bf16.mxu1 (!%p194_p3), %v1129_v1  ;;  %v1130_v20 = vld [vmem:[%s1376_s0 + $0x14] ss:$8 sps:$4 sm:$0xff] (!%p194_p3)   ;;  %v1134_v22 = vld [vmem:[%s1376_s0 + $0x10] ss:$8 sps:$4 sm:$0xff] (!%p194_p3)   ;;  %v1136_v24 = vld [vmem:[%s1376_s0 + $0x24] ss:$8 sps:$4 sm:$0xff] (!%p194_p3)  }
   0x9   : > { %v1132_v21 = vld [vmem:[%s1376_s0 + $0x54] ss:$8 sps:$4 sm:$0xff] (!%p194_p3)   ;;  %v1135_v23 = vld [vmem:[%s1376_s0 + $0x50] ss:$8 sps:$4 sm:$0xff] (!%p194_p3)   ;;  %v1138_v25 = vld [vmem:[%s1376_s0 + $0x64] ss:$8 sps:$4 sm:$0xff] (!%p194_p3)  }
   0xa   : > { %v1140_v26 = vld [vmem:[%s1376_s0 + $0x20] ss:$8 sps:$4 sm:$0xff] (!%p194_p3)   ;;  %v1142_v28 = vld [vmem:[%s1376_s0 + $0x34] ss:$8 sps:$4 sm:$0xff] (!%p194_p3)   ;;  %v1146_v30 = vld [vmem:[%s1376_s0 + $0x30] ss:$8 sps:$4 sm:$0xff] (!%p194_p3)  }
   0xb   : > { %v1141_v27 = vld [vmem:[%s1376_s0 + $0x60] ss:$8 sps:$4 sm:$0xff] (!%p194_p3)   ;;  %v1144_v29 = vld [vmem:[%s1376_s0 + $0x74] ss:$8 sps:$4 sm:$0xff] (!%p194_p3)   ;;  %v1147_v31 = vld [vmem:[%s1376_s0 + $0x70] ss:$8 sps:$4 sm:$0xff] (!%p194_p3)  }
   0xe   : > { %s1223_s21 = scalar_select %p242_p4, %s1162_s15, 3 }
  0x10   : > { %s938_s24 = sshll.u32 %s1223_s21, 7  ;;  %s939_s9 = sshll.u32 %s1223_s21, 6 }
  0x11   : > { %s1232_s27 = scalar_lea.vmem %s1377_s1, %s938_s24  ;;  %s1304_s12 = scalar_lea.vmem %s1378_s2, %s939_s9 }
  0x12   : > { %v1108_v2 = vld [vmem:[%s1232_s27 + $0x40] sm:$0xff]   ;;  %v1110_v4 = vld [vmem:[%s1232_s27 + $0x48] sm:$0xff]   ;;  %v1112_v6 = vld [vmem:[%s1232_s27 + $0x50] sm:$0xff]  }
  0x13   : > { %v1109_v3 = vld [vmem:[%s1232_s27] sm:$0xff]   ;;  %1003 = vmatprep.subr.bf16.mxu0 %v1108_v2  ;;  %1067 = vmatprep.subr.bf16.mxu1 %v1108_v2  ;;  %v1111_v5 = vld [vmem:[%s1232_s27 + $0x8] sm:$0xff]   ;;  %v1113_v7 = vld [vmem:[%s1232_s27 + $0x10] sm:$0xff]  }
  0x14   : > { %1004 = vmatpush3.bf16.msra.mxu0 %v1109_v3  ;;  %1075 = vmatpush3.bf16.msra.mxu1 %v1109_v3  ;;  %v1114_v8 = vld [vmem:[%s1232_s27 + $0x58] sm:$0xff]   ;;  %v1116_v10 = vld [vmem:[%s1232_s27 + $0x60] sm:$0xff]   ;;  %v1118_v12 = vld [vmem:[%s1232_s27 + $0x68] sm:$0xff]  }
  0x15   : > { %1005 = vmatprep.subr.bf16.mxu0 %v1110_v4  ;;  %1068 = vmatprep.subr.bf16.mxu1 %v1110_v4  ;;  %v1115_v9 = vld [vmem:[%s1232_s27 + $0x18] sm:$0xff]   ;;  %v1117_v11 = vld [vmem:[%s1232_s27 + $0x20] sm:$0xff]   ;;  %v1119_v13 = vld [vmem:[%s1232_s27 + $0x28] sm:$0xff]  }
  0x16   : > { %v1120_v14 = vld [vmem:[%s1232_s27 + $0x70] sm:$0xff]   ;;  %v1122_v16 = vld [vmem:[%s1232_s27 + $0x78] sm:$0xff]  }
  0x17   : > { %v1121_v15 = vld [vmem:[%s1232_s27 + $0x30] sm:$0xff]   ;;  %v1123_v17 = vld [vmem:[%s1232_s27 + $0x38] sm:$0xff]  }
  0x18   : > { %1006 = vmatpush3.bf16.msra.mxu0 %v1111_v5  ;;  %1076 = vmatpush3.bf16.msra.mxu1 %v1111_v5 }
  0x19   : > { %1007 = vmatprep.subr.bf16.mxu0 %v1112_v6  ;;  %1069 = vmatprep.subr.bf16.mxu1 %v1112_v6 }
  0x1c   : > { %1008 = vmatpush3.bf16.msra.mxu0 %v1113_v7  ;;  %1077 = vmatpush3.bf16.msra.mxu1 %v1113_v7 }
  0x1d   : > { %1009 = vmatprep.subr.bf16.mxu0 %v1114_v8  ;;  %1070 = vmatprep.subr.bf16.mxu1 %v1114_v8 }
  0x20   : > { %1010 = vmatpush3.bf16.msra.mxu0 %v1115_v9  ;;  %1078 = vmatpush3.bf16.msra.mxu1 %v1115_v9 }
  0x21   : > { %1011 = vmatprep.subr.bf16.mxu0 %v1116_v10  ;;  %1071 = vmatprep.subr.bf16.mxu1 %v1116_v10 }
  0x24   : > { %1012 = vmatpush3.bf16.msra.mxu0 %v1117_v11  ;;  %1079 = vmatpush3.bf16.msra.mxu1 %v1117_v11 }
  0x25   : > { %1013 = vmatprep.subr.bf16.mxu0 %v1118_v12  ;;  %1072 = vmatprep.subr.bf16.mxu1 %v1118_v12 }
  0x28   : > { %1014 = vmatpush3.bf16.msra.mxu0 %v1119_v13  ;;  %1080 = vmatpush3.bf16.msra.mxu1 %v1119_v13 }
  0x29   : > { %1015 = vmatprep.subr.bf16.mxu0 %v1120_v14  ;;  %1073 = vmatprep.subr.bf16.mxu1 %v1120_v14 }
  0x2c   : > { %1016 = vmatpush3.bf16.msra.mxu0 %v1121_v15  ;;  %1081 = vmatpush3.bf16.msra.mxu1 %v1121_v15 }
  0x2d   : > { %1017 = vmatprep.subr.bf16.mxu0 %v1122_v16  ;;  %1074 = vmatprep.subr.bf16.mxu1 %v1122_v16 }
  0x30   : > { %1018 = vmatpush3.bf16.msra.mxu0 %v1123_v17  ;;  %1082 = vmatpush3.bf16.msra.mxu1 %v1123_v17 }
  0x33   : > { %521 = vmatmul.mubr.bf16.vlgmr.msra.gmra.mrb[0].mxu0 %v1124_v18  ;;  %553 = vmatmul.mubr.bf16.vlgmr.msra.gmra.mrb[0].mxu1 %v1127_v19 }
  0x34   : > { %528 = vmatprep.mubr.bf16.mxu0 %v1130_v20  ;;  %560 = vmatprep.mubr.bf16.mxu1 %v1132_v21 }
  0x3b   : > { %529 = vmatmul.mubr.bf16.gmra.mrb[4].mxu0 %v1134_v22  ;;  %561 = vmatmul.mubr.bf16.gmra.mrb[4].mxu1 %v1135_v23 }
  0x3c   : > { %536 = vmatprep.mubr.bf16.mxu0 %v1136_v24  ;;  %568 = vmatprep.mubr.bf16.mxu1 %v1138_v25  ;;  %v1172_v24 = vmov (!%p933_p5), 0.0  }
  0x3d   : > { %669 = vst [vmem:[%s1379_s3] sm:$0x1] (!%p933_p5), %v1172_v24  ;;  %670 = vst [vmem:[%s1380_s4] sm:$0x1] (!%p933_p5), %v1172_v24 }
  0x43   : > { %537 = vmatmul.mubr.bf16.gmra.mrb[8].mxu0 %v1140_v26  ;;  %569 = vmatmul.mubr.bf16.gmra.mrb[8].mxu1 %v1141_v27 }
  0x44   : > { %544 = vmatprep.mubr.bf16.mxu0 %v1142_v28  ;;  %576 = vmatprep.mubr.bf16.mxu1 %v1144_v29 }
  0x4b   : > { %545 = vmatmul.mubr.bf16.gmra.mrb[12].mxu0 %v1146_v30  ;;  %577 = vmatmul.mubr.bf16.gmra.mrb[12].mxu1 %v1147_v31 }
 0x106   : > { %v1019_v32 = vpop.f32.mrb[0].mxu0  ;;  %v1043_v33 = vpop.f32.mrb[0].mxu1 }
 0x107   : > { %v1020_v34 = vpop.f32.mrb[1].mxu0  ;;  %v1044_v35 = vpop.f32.mrb[1].mxu1 }
 0x108   : > { %v1292_v36 = vadd.f32 %v1020_v34, %v1019_v32  ;;  %v1294_v37 = vadd.f32 %v1044_v35, %v1043_v33  ;;  %v1022_v38 = vpop.f32.mrb[2].mxu0  ;;  %v1046_v39 = vpop.f32.mrb[2].mxu1 }
 0x109   : > { %v1023_v40 = vpop.f32.mrb[3].mxu0  ;;  %v1047_v41 = vpop.f32.mrb[3].mxu1 }
 0x10a   : > { %v1297_v42 = vadd.f32 %v1023_v40, %v1022_v38  ;;  %v1299_v43 = vadd.f32 %v1047_v41, %v1046_v39 }
 0x10c   : > { %v959_v44 = vpack.c.bf16 %v1297_v42, %v1292_v36  ;;  %v979_v45 = vpack.c.bf16 %v1299_v43, %v1294_v37 }
 0x10e   : > { %960 = vst [vmem:[%s1304_s12] sm:$0xff] %v959_v44   ;;  %999 = vst [vmem:[%s1304_s12 + $0x20] sm:$0xff] %v979_v45   ;;  %v1025_v46 = vpop.f32.mrb[4].mxu0  ;;  %v1049_v47 = vpop.f32.mrb[4].mxu1 }
 0x10f   : > { %v1026_v48 = vpop.f32.mrb[5].mxu0  ;;  %v1050_v49 = vpop.f32.mrb[5].mxu1 }
 0x110   : > { %v1027_v50 = vadd.f32 %v1026_v48, %v1025_v46  ;;  %v1312_v51 = vadd.f32 %v1050_v49, %v1049_v47  ;;  %v1028_v52 = vpop.f32.mrb[6].mxu0  ;;  %v1052_v53 = vpop.f32.mrb[6].mxu1 }
 0x111   : > { %v1029_v54 = vpop.f32.mrb[7].mxu0  ;;  %v1053_v55 = vpop.f32.mrb[7].mxu1 }
 0x112   : > { %v1030_v56 = vadd.f32 %v1029_v54, %v1028_v52  ;;  %v1314_v57 = vadd.f32 %v1053_v55, %v1052_v53 }
 0x114   : > { %v964_v58 = vpack.c.bf16 %v1030_v56, %v1027_v50  ;;  %v984_v59 = vpack.c.bf16 %v1314_v57, %v1312_v51 }
 0x116   : > { %996 = vst [vmem:[%s1304_s12 + $0x8] sm:$0xff] %v964_v58   ;;  %1000 = vst [vmem:[%s1304_s12 + $0x28] sm:$0xff] %v984_v59   ;;  %v1031_v60 = vpop.f32.mrb[8].mxu0  ;;  %v1055_v61 = vpop.f32.mrb[8].mxu1 }
 0x117   : > { %v1032_v62 = vpop.f32.mrb[9].mxu0  ;;  %v1056_v63 = vpop.f32.mrb[9].mxu1 }
 0x118   : > { %v1033_v0 = vadd.f32 %v1032_v62, %v1031_v60  ;;  %v1320_v1 = vadd.f32 %v1056_v63, %v1055_v61  ;;  %v1034_v2 = vpop.f32.mrb[10].mxu0  ;;  %v1058_v3 = vpop.f32.mrb[10].mxu1 }
 0x119   : > { %v1035_v4 = vpop.f32.mrb[11].mxu0  ;;  %v1059_v5 = vpop.f32.mrb[11].mxu1 }
 0x11a   : > { %v1036_v6 = vadd.f32 %v1035_v4, %v1034_v2  ;;  %v1060_v7 = vadd.f32 %v1059_v5, %v1058_v3 }
 0x11c   : > { %v969_v8 = vpack.c.bf16 %v1036_v6, %v1033_v0  ;;  %v989_v9 = vpack.c.bf16 %v1060_v7, %v1320_v1 }
 0x11e   : > { %997 = vst [vmem:[%s1304_s12 + $0x10] sm:$0xff] %v969_v8   ;;  %1001 = vst [vmem:[%s1304_s12 + $0x30] sm:$0xff] %v989_v9   ;;  %v1037_v10 = vpop.f32.mrb[12].mxu0  ;;  %v1061_v11 = vpop.f32.mrb[12].mxu1 }
 0x11f   : > { %v1038_v12 = vpop.f32.mrb[13].mxu0  ;;  %v1062_v13 = vpop.f32.mrb[13].mxu1 }
 0x120   : > { %v1039_v14 = vadd.f32 %v1038_v12, %v1037_v10  ;;  %v1063_v15 = vadd.f32 %v1062_v13, %v1061_v11  ;;  %v1040_v16 = vpop.f32.mrb[14].mxu0  ;;  %v1064_v17 = vpop.f32.mrb[14].mxu1  ;;  %668 = sbr.rel (%p933_p5) target bundleno = 295 (0x127), region = 32 }
 0x121   : > { %v1041_v18 = vpop.f32.mrb[15].mxu0  ;;  %v1065_v19 = vpop.f32.mrb[15].mxu1 }
 0x122   : > { %v1042_v20 = vadd.f32 %v1041_v18, %v1040_v16  ;;  %v1066_v21 = vadd.f32 %v1065_v19, %v1064_v17 }
 0x124   : > { %v974_v22 = vpack.c.bf16 %v1042_v20, %v1039_v14  ;;  %v994_v23 = vpack.c.bf16 %v1066_v21, %v1063_v15 }
 0x126   : > { %998 = vst [vmem:[%s1304_s12 + $0x18] sm:$0xff] %v974_v22   ;;  %1002 = vst [vmem:[%s1304_s12 + $0x38] sm:$0xff] %v994_v23  }
 0x127 PF: > { %v672_v25 = vadd.f32 %v1297_v42, %v1292_v36  ;;  %v696_v26 = vmul.f32 %v1292_v36, %v1292_v36  ;;  %v697_v27 = vmul.f32 %v1297_v42, %v1297_v42  ;;  %v698_v29 = vmul.f32 %v1027_v50, %v1027_v50 }
 0x128   : > { %v699_v31 = vmul.f32 %v1030_v56, %v1030_v56  ;;  %v700_v34 = vmul.f32 %v1033_v0, %v1033_v0  ;;  %v701_v39 = vmul.f32 %v1036_v6, %v1036_v6  ;;  %v702_v44 = vmul.f32 %v1039_v14, %v1039_v14 }
 0x129   : > { %v673_v28 = vadd.f32 %v1027_v50, %v672_v25  ;;  %v712_v32 = vadd.f32 %v697_v27, %v696_v26  ;;  %v703_v47 = vmul.f32 %v1042_v20, %v1042_v20  ;;  %v704_v42 = vmul.f32 %v1294_v37, %v1294_v37 }
 0x12a   : > { %v705_v52 = vmul.f32 %v1299_v43, %v1299_v43  ;;  %v706_v55 = vmul.f32 %v1312_v51, %v1312_v51  ;;  %v707_v59 = vmul.f32 %v1314_v57, %v1314_v57  ;;  %v708_v61 = vmul.f32 %v1320_v1, %v1320_v1 }
 0x12b   : > { %v674_v30 = vadd.f32 %v1030_v56, %v673_v28  ;;  %v713_v35 = vadd.f32 %v712_v32, %v698_v29  ;;  %v709_v63 = vmul.f32 %v1060_v7, %v1060_v7  ;;  %v710_v3 = vmul.f32 %v1063_v15, %v1063_v15 }
 0x12c   : > { %v711_v5 = vmul.f32 %v1066_v21, %v1066_v21 }
 0x12d   : > { %v675_v33 = vadd.f32 %v1033_v0, %v674_v30  ;;  %v714_v40 = vadd.f32 %v713_v35, %v699_v31 }
 0x12f   : > { %v676_v38 = vadd.f32 %v1036_v6, %v675_v33  ;;  %v715_v45 = vadd.f32 %v714_v40, %v700_v34 }
 0x131   : > { %v677_v41 = vadd.f32 %v1039_v14, %v676_v38  ;;  %v716_v36 = vadd.f32 %v715_v45, %v701_v39 }
 0x133   : > { %v678_v46 = vadd.f32 %v1042_v20, %v677_v41  ;;  %v717_v49 = vadd.f32 %v716_v36, %v702_v44  ;;  %v695_v20 = vld [vmem:[%s1380_s4] sm:$0x1] }
 0x135   : > { %v679_v48 = vadd.f32 %v1294_v37, %v678_v46  ;;  %v718_v53 = vadd.f32 %v717_v49, %v703_v47 }
 0x137   : > { %v680_v50 = vadd.f32 %v1299_v43, %v679_v48  ;;  %v719_v56 = vadd.f32 %v718_v53, %v704_v42 }
 0x139   : > { %v681_v54 = vadd.f32 %v1312_v51, %v680_v50  ;;  %v720_v60 = vadd.f32 %v719_v56, %v705_v52 }
 0x13b   : > { %v682_v58 = vadd.f32 %v1314_v57, %v681_v54  ;;  %v721_v62 = vadd.f32 %v720_v60, %v706_v55 }
 0x13d   : > { %v683_v37 = vadd.f32 %v1320_v1, %v682_v58  ;;  %v722_v0 = vadd.f32 %v721_v62, %v707_v59 }
 0x13f   : > { %v684_v43 = vadd.f32 %v1060_v7, %v683_v37  ;;  %v723_v4 = vadd.f32 %v722_v0, %v708_v61  ;;  %v671_v7 = vld [vmem:[%s1379_s3] sm:$0x1] }
 0x141   : > { %v685_v2 = vadd.f32 %v1063_v15, %v684_v43  ;;  %v724_v6 = vadd.f32 %v723_v4, %v709_v63 }
 0x143   : > { %v686_v51 = vadd.f32 %v1066_v21, %v685_v2  ;;  %v725_v9 = vadd.f32 %v724_v6, %v710_v3 }
 0x145   : > { %v687_v8 = vrot.slane %v686_v51, 4  ;;  %v726_v57 = vadd.f32 %v725_v9, %v711_v5 }
 0x147   : > { %v688_v10 = vadd.f32 %v687_v8, %v686_v51  ;;  %v727_v12 = vrot.slane %v726_v57, 4 }
 0x149   : > { %v689_v11 = vrot.slane %v688_v10, 2  ;;  %v728_v14 = vadd.f32 %v727_v12, %v726_v57 }
 0x14b   : > { %v690_v13 = vadd.f32 %v689_v11, %v688_v10  ;;  %v729_v1 = vrot.slane %v728_v14, 2 }
 0x14d   : > { %v691_v16 = vrot.slane %v690_v13, 1  ;;  %v730_v15 = vadd.f32 %v729_v1, %v728_v14 }
 0x14f   : > { %v692_v17 = vadd.f32 %v691_v16, %v690_v13  ;;  %v731_v19 = vrot.slane %v730_v15, 1 }
 0x151   : > { %v693_v18 = vadd.f32 %v692_v17, %v671_v7  ;;  %v732_v21 = vadd.f32 %v731_v19, %v730_v15 }
 0x153   : > { %694 = vst [vmem:[%s1379_s3] sm:$0x1] %v693_v18  ;;  %v733_v22 = vadd.f32 %v732_v21, %v695_v20 }
 0x155   : > { %734 = vst [vmem:[%s1380_s4] sm:$0x1] %v733_v22 }
 0x156 PF: > { %s15_s17 = sadd.s32 1, %s1170_s17   ;;  %s1381_s15 = smov %s1166_s16 }
 0x157   : > { %p12_p6 = scmp.ge.s32.totalorder %s15_s17, 6   ;;  %s1382_s16 = smov %s1384_s18 }
 0x159   :  { %14 = sbr.rel (!%p12_p6) target bundleno = 2 (0x2), region = 89 }

// kernel: res_disparity_refinement_forward.28
= control target key start
LH: loop header
LB: loop body
LE: loop exit
PB: predicated region body
PF: predicated region fallthrough
CT: control target
= control target key end

     0   :  { %s848_s15 = smov 0   ;;  %s850_s16 = smov 0   ;;  %s961_s0 = inlined_call_operand.vmem [shape: bf16[4,128,128], index: 0, kind: input, shape index: {}]   ;;  %s962_s1 = inlined_call_operand.vmem [shape: f32[1,128], index: 1, kind: input, shape index: {}]   ;;  %s963_s2 = inlined_call_operand.vmem [shape: f32[1,128], index: 2, kind: input, shape index: {}]   ;;  %s964_s3 = inlined_call_operand.vmem [shape: bf16[4,128,128], index: 3, kind: input, shape index: {}]   ;;  %s965_s4 = inlined_call_operand.vmem [shape: bf16[4,128,128], index: 4, kind: output, shape index: {}]  }
   0x1   :  { %s852_s17 = smov 0  }
   0x2 LB: > { %s23_s18 = sadd.s32 1, %s817_s16  ;;  %p604_p0 = scmp.ge.s32.totalorder %s821_s17, 1  ;;  %s821_s17 = sphi %s852_s17, %s14_s17   ;;  %s817_s16 = sphi %s850_s16, %s967_s16   ;;  %s813_s15 = sphi %s848_s15, %s966_s15  }
   0x3   : > { %p24_p1 = scmp.ge.s32.totalorder %s23_s18, 4  ;;  %p200_p2 = scmp.lt.s32.totalorder %s821_s17, 5 }
   0x5   : > { %s969_s18 = smov (%p24_p1, %s23_s18), 0  ;;  %p201_p3 = pnand %p604_p0, %p200_p2 }
   0x6   : > { %p244_p4 = scmp.lt.s32.totalorder (!%p201_p3), %s813_s15, 3  ;;  %v883_v0 = vld [vmem:[%s962_s1] ss:$0 sm:$0xff] (!%p201_p3) }
   0x7   : > { %204 = sbr.rel (%p201_p3) target bundleno = 51 (0x33), region = 36  ;;  %v894_v11 = vld [vmem:[%s963_s2] ss:$0 sm:$0xff] (!%p201_p3) }
   0xe   : > { %s971_s15 = smov (!%p244_p4, %s813_s15), 3 }
   0xf   : > { %s866_s19 = sshll.u32 %s971_s15, 6 }
  0x10   : > { %s872_s22 = scalar_lea.vmem %s961_s0, %s866_s19  ;;  %s878_s25 = scalar_lea.vmem %s964_s3, %s866_s19 }
  0x11   : > { %v651_v1 = vld [vmem:[%s872_s22] sm:$0xff]   ;;  %v754_v3 = vld [vmem:[%s872_s22 + $0x8] sm:$0xff]   ;;  %v755_v9 = vld [vmem:[%s872_s22 + $0x10] sm:$0xff]   ;;  %s915_s6 = scalar_lea.vmem %s965_s4, %s866_s19 }
  0x12   : > { %v683_v2 = vld [vmem:[%s878_s25] sm:$0xff]   ;;  %v652_v4 = vunpack.c.l.bf16 %v651_v1  ;;  %v653_v5 = vunpack.c.h.bf16 %v651_v1  ;;  %v761_v8 = vld [vmem:[%s878_s25 + $0x8] sm:$0xff]   ;;  %v762_v10 = vld [vmem:[%s878_s25 + $0x10] sm:$0xff]   ;;  %v656_v12 = vunpack.c.l.bf16 %v754_v3  ;;  %v657_v13 = vunpack.c.h.bf16 %v754_v3 }
  0x13   : > { %v684_v6 = vunpack.c.l.bf16 %v683_v2  ;;  %v685_v7 = vunpack.c.h.bf16 %v683_v2  ;;  %v688_v14 = vunpack.c.l.bf16 %v761_v8  ;;  %v689_v15 = vunpack.c.h.bf16 %v761_v8  ;;  %v756_v20 = vld [vmem:[%s872_s22 + $0x18] sm:$0xff]   ;;  %v757_v42 = vld [vmem:[%s872_s22 + $0x20] sm:$0xff]   ;;  %v758_v56 = vld [vmem:[%s872_s22 + $0x28] sm:$0xff]  }
  0x14   : > { %v344_v16 = vmul.f32 %v652_v4, %v883_v0  ;;  %v345_v17 = vmul.f32 %v653_v5, %v883_v0  ;;  %v660_v18 = vunpack.c.l.bf16 %v755_v9  ;;  %v661_v19 = vunpack.c.h.bf16 %v755_v9  ;;  %v763_v29 = vld [vmem:[%s878_s25 + $0x18] sm:$0xff]   ;;  %v764_v51 = vld [vmem:[%s878_s25 + $0x20] sm:$0xff]   ;;  %v765_v61 = vld [vmem:[%s878_s25 + $0x28] sm:$0xff]  }
  0x15   : > { %v346_v21 = vmul.f32 %v656_v12, %v883_v0  ;;  %v347_v22 = vmul.f32 %v657_v13, %v883_v0  ;;  %v692_v23 = vunpack.c.l.bf16 %v762_v10  ;;  %v693_v24 = vunpack.c.h.bf16 %v762_v10  ;;  %v766_v13 = vld [vmem:[%s878_s25 + $0x30] sm:$0xff]  }
  0x16   : > { %v367_v25 = vadd.f32 %v894_v11, %v344_v16  ;;  %v368_v26 = vadd.f32 %v894_v11, %v345_v17  ;;  %v348_v27 = vmul.f32 %v660_v18, %v883_v0  ;;  %v349_v28 = vmul.f32 %v661_v19, %v883_v0 }
  0x17   : > { %v369_v30 = vadd.f32 %v894_v11, %v346_v21  ;;  %v370_v31 = vadd.f32 %v894_v11, %v347_v22  ;;  %v664_v32 = vunpack.c.l.bf16 %v756_v20  ;;  %v665_v33 = vunpack.c.h.bf16 %v756_v20  ;;  %v760_v22 = vld [vmem:[%s872_s22 + $0x38] sm:$0xff]  }
  0x18   : > { %v383_v34 = vadd.f32 %v684_v6, %v367_v25  ;;  %v384_v35 = vadd.f32 %v685_v7, %v368_v26  ;;  %v371_v36 = vadd.f32 %v894_v11, %v348_v27  ;;  %v372_v37 = vadd.f32 %v894_v11, %v349_v28  ;;  %v759_v7 = vld [vmem:[%s872_s22 + $0x30] sm:$0xff]   ;;  %v767_v27 = vld [vmem:[%s878_s25 + $0x38] sm:$0xff]  }
  0x19   : > { %v385_v38 = vadd.f32 %v688_v14, %v369_v30  ;;  %v386_v39 = vadd.f32 %v689_v15, %v370_v31  ;;  %v696_v40 = vunpack.c.l.bf16 %v763_v29  ;;  %v697_v41 = vunpack.c.h.bf16 %v763_v29 }
  0x1a   : > { %v399_v43 = vmax.f32 %v383_v34, 0.0  ;;  %v400_v44 = vmax.f32 %v384_v35, 0.0  ;;  %v387_v45 = vadd.f32 %v692_v23, %v371_v36  ;;  %v388_v46 = vadd.f32 %v693_v24, %v372_v37 }
  0x1b   : > { %v401_v47 = vmax.f32 %v385_v38, 0.0  ;;  %v402_v48 = vmax.f32 %v386_v39, 0.0  ;;  %v350_v49 = vmul.f32 %v664_v32, %v883_v0  ;;  %v351_v50 = vmul.f32 %v665_v33, %v883_v0 }
  0x1c   : > { %v717_v52 = vpack.c.bf16 %v400_v44, %v399_v43  ;;  %v403_v53 = vmax.f32 %v387_v45, 0.0  ;;  %v404_v54 = vmax.f32 %v388_v46, 0.0  ;;  %v668_v55 = vunpack.c.l.bf16 %v757_v42 }
  0x1d   : > { %v722_v57 = vpack.c.bf16 %v402_v48, %v401_v47  ;;  %v373_v58 = vadd.f32 %v894_v11, %v350_v49  ;;  %v374_v59 = vadd.f32 %v894_v11, %v351_v50  ;;  %v669_v60 = vunpack.c.h.bf16 %v757_v42 }
  0x1e   : > { %718 = vst [vmem:[%s915_s6] sm:$0xff] %v717_v52   ;;  %v727_v62 = vpack.c.bf16 %v404_v54, %v403_v53  ;;  %v700_v63 = vunpack.c.l.bf16 %v764_v51  ;;  %v701_v1 = vunpack.c.h.bf16 %v764_v51  ;;  %v352_v2 = vmul.f32 %v668_v55, %v883_v0 }
  0x1f   : > { %768 = vst [vmem:[%s915_s6 + $0x8] sm:$0xff] %v722_v57   ;;  %v389_v3 = vadd.f32 %v696_v40, %v373_v58  ;;  %v390_v4 = vadd.f32 %v697_v41, %v374_v59  ;;  %v353_v5 = vmul.f32 %v669_v60, %v883_v0  ;;  %v672_v6 = vunpack.c.l.bf16 %v758_v56 }
  0x20   : > { %769 = vst [vmem:[%s915_s6 + $0x10] sm:$0xff] %v727_v62   ;;  %v375_v8 = vadd.f32 %v894_v11, %v352_v2  ;;  %v673_v9 = vunpack.c.h.bf16 %v758_v56  ;;  %v704_v10 = vunpack.c.l.bf16 %v765_v61  ;;  %v705_v12 = vunpack.c.h.bf16 %v765_v61 }
  0x21   : > { %v405_v14 = vmax.f32 %v389_v3, 0.0  ;;  %v406_v15 = vmax.f32 %v390_v4, 0.0  ;;  %v376_v16 = vadd.f32 %v894_v11, %v353_v5  ;;  %v354_v17 = vmul.f32 %v672_v6, %v883_v0 }
  0x22   : > { %v391_v18 = vadd.f32 %v700_v63, %v375_v8  ;;  %v355_v19 = vmul.f32 %v673_v9, %v883_v0  ;;  %v676_v20 = vunpack.c.l.bf16 %v759_v7  ;;  %v677_v21 = vunpack.c.h.bf16 %v759_v7 }
  0x23   : > { %v732_v23 = vpack.c.bf16 %v406_v15, %v405_v14  ;;  %v392_v24 = vadd.f32 %v701_v1, %v376_v16  ;;  %v377_v25 = vadd.f32 %v894_v11, %v354_v17  ;;  %v708_v26 = vunpack.c.l.bf16 %v766_v13 }
  0x24   : > { %v407_v28 = vmax.f32 %v391_v18, 0.0  ;;  %v378_v29 = vadd.f32 %v894_v11, %v355_v19  ;;  %v709_v30 = vunpack.c.h.bf16 %v766_v13  ;;  %v356_v31 = vmul.f32 %v676_v20, %v883_v0 }
  0x25   : > { %770 = vst [vmem:[%s915_s6 + $0x18] sm:$0xff] %v732_v23   ;;  %v408_v32 = vmax.f32 %v392_v24, 0.0  ;;  %v393_v33 = vadd.f32 %v704_v10, %v377_v25  ;;  %v357_v34 = vmul.f32 %v677_v21, %v883_v0  ;;  %v680_v35 = vunpack.c.l.bf16 %v760_v22 }
  0x26   : > { %v394_v36 = vadd.f32 %v705_v12, %v378_v29  ;;  %v379_v37 = vadd.f32 %v894_v11, %v356_v31  ;;  %v681_v38 = vunpack.c.h.bf16 %v760_v22  ;;  %v712_v39 = vunpack.c.l.bf16 %v767_v27 }
  0x27   : > { %v737_v40 = vpack.c.bf16 %v408_v32, %v407_v28  ;;  %v409_v41 = vmax.f32 %v393_v33, 0.0  ;;  %v380_v42 = vadd.f32 %v894_v11, %v357_v34  ;;  %v713_v43 = vunpack.c.h.bf16 %v767_v27 }
  0x28   : > { %v410_v44 = vmax.f32 %v394_v36, 0.0  ;;  %v395_v45 = vadd.f32 %v708_v26, %v379_v37  ;;  %v358_v46 = vmul.f32 %v680_v35, %v883_v0  ;;  %v359_v47 = vmul.f32 %v681_v38, %v883_v0 }
  0x29   : > { %771 = vst [vmem:[%s915_s6 + $0x20] sm:$0xff] %v737_v40   ;;  %v396_v48 = vadd.f32 %v709_v30, %v380_v42 }
  0x2a   : > { %v742_v49 = vpack.c.bf16 %v410_v44, %v409_v41  ;;  %v411_v50 = vmax.f32 %v395_v45, 0.0  ;;  %v381_v51 = vadd.f32 %v894_v11, %v358_v46  ;;  %v382_v52 = vadd.f32 %v894_v11, %v359_v47 }
  0x2b   : > { %v412_v53 = vmax.f32 %v396_v48, 0.0 }
  0x2c   : > { %772 = vst [vmem:[%s915_s6 + $0x28] sm:$0xff] %v742_v49   ;;  %v397_v54 = vadd.f32 %v712_v39, %v381_v51  ;;  %v398_v55 = vadd.f32 %v713_v43, %v382_v52 }
  0x2d   : > { %v747_v56 = vpack.c.bf16 %v412_v53, %v411_v50 }
  0x2e   : > { %v413_v57 = vmax.f32 %v397_v54, 0.0  ;;  %v414_v58 = vmax.f32 %v398_v55, 0.0 }
  0x2f   : > { %773 = vst [vmem:[%s915_s6 + $0x30] sm:$0xff] %v747_v56  }
  0x30   : > { %v752_v59 = vpack.c.bf16 %v414_v58, %v413_v57 }
  0x32   : > { %774 = vst [vmem:[%s915_s6 + $0x38] sm:$0xff] %v752_v59  }
  0x33 PF: > { %s14_s17 = sadd.s32 1, %s821_s17   ;;  %s966_s15 = smov %s817_s16 }
  0x34   : > { %p11_p5 = scmp.ge.s32.totalorder %s14_s17, 6   ;;  %s967_s16 = smov %s969_s18 }
  0x36   :  { %13 = sbr.rel (!%p11_p5) target bundleno = 2 (0x2), region = 69 }

// kernel: res_disparity_refinement_forward.31
= control target key start
LH: loop header
LB: loop body
LE: loop exit
PB: predicated region body
PF: predicated region fallthrough
CT: control target
= control target key end

     0   :  { %s1124_s21 = smov 0   ;;  %s1126_s22 = smov 0   ;;  %s1289_s0 = inlined_call_operand.vmem [shape: bf16[4,128,128], index: 0, kind: input, shape index: {}]   ;;  %s1290_s1 = inlined_call_operand.vmem [shape: f32[1,128], index: 1, kind: input, shape index: {}]   ;;  %s1291_s2 = inlined_call_operand.vmem [shape: f32[1,128], index: 2, kind: input, shape index: {}]   ;;  %s1292_s3 = inlined_call_operand.vmem [shape: bf16[4,128,128], index: 3, kind: input, shape index: {}]   ;;  %s1293_s4 = inlined_call_operand.vmem [shape: bf16[128,128], index: 4, kind: input, shape index: {}]   ;;  %s1294_s5 = inlined_call_operand.vmem [shape: f32[4,128,128], index: 5, kind: input, shape index: {}]   ;;  %s1295_s6 = inlined_call_operand.vmem [shape: f32[4,128,128], index: 6, kind: output, shape index: {}]  }
   0x1   :  { %s1128_s23 = smov 0  }
   0x2 LB: > { %s25_s24 = sadd.s32 1, %s1083_s22  ;;  %p866_p0 = scmp.ge.s32.totalorder %s1087_s23, 1  ;;  %s1087_s23 = sphi %s1128_s23, %s16_s23   ;;  %s1083_s22 = sphi %s1126_s22, %s1297_s22   ;;  %s1079_s21 = sphi %s1124_s21, %s1296_s21  }
   0x3   : > { %p26_p1 = scmp.ge.s32.totalorder %s25_s24, 4  ;;  %p267_p2 = scmp.lt.s32.totalorder %s1087_s23, 5 }
   0x5   : > { %s1299_s24 = smov (%p26_p1, %s25_s24), 0  ;;  %p268_p3 = pnand %p866_p0, %p267_p2 }
   0x6   : > { %v1057_v0 = vld [vmem:[%s1293_s4] sm:$0xff] (!%p268_p3)   ;;  %p324_p4 = scmp.lt.s32.totalorder (!%p268_p3), %s1079_s21, 3  ;;  %v1058_v1 = vld [vmem:[%s1293_s4 + $0x8] sm:$0xff] (!%p268_p3)   ;;  %v1059_v2 = vld [vmem:[%s1293_s4 + $0x10] sm:$0xff] (!%p268_p3)  }
   0x7   : > { %271 = sbr.rel (%p268_p3) target bundleno = 270 (0x10e), region = 44  ;;  %985 = vmatprep.subr.bf16.mxu0 (!%p268_p3), %v1057_v0  ;;  %1017 = vmatprep.subr.bf16.mxu1 (!%p268_p3), %v1057_v0  ;;  %v1060_v3 = vld [vmem:[%s1293_s4 + $0x18] sm:$0xff] (!%p268_p3)   ;;  %v1172_v6 = vld [vmem:[%s1290_s1] ss:$0 sm:$0xff] (!%p268_p3)  ;;  %v1062_v43 = vld [vmem:[%s1293_s4 + $0x28] sm:$0xff] (!%p268_p3)  }
   0x8   : > { %986 = vmatpush3.bf16.msra.mxu0 (!%p268_p3), %v1057_v0  ;;  %1025 = vmatpush3.bf16.msra.mxu1 (!%p268_p3), %v1057_v0  ;;  %v1179_v13 = vld [vmem:[%s1291_s2] ss:$0 sm:$0xff] (!%p268_p3)  ;;  %v1063_v63 = vld [vmem:[%s1293_s4 + $0x30] sm:$0xff] (!%p268_p3)  }
   0x9   : > { %987 = vmatprep.subr.bf16.mxu0 (!%p268_p3), %v1058_v1  ;;  %1018 = vmatprep.subr.bf16.mxu1 (!%p268_p3), %v1058_v1  ;;  %v1061_v25 = vld [vmem:[%s1293_s4 + $0x20] sm:$0xff] (!%p268_p3)  }
   0xc   : > { %988 = vmatpush3.bf16.msra.mxu0 (!%p268_p3), %v1058_v1  ;;  %1026 = vmatpush3.bf16.msra.mxu1 (!%p268_p3), %v1058_v1 }
   0xd   : > { %989 = vmatprep.subr.bf16.mxu0 (!%p268_p3), %v1059_v2  ;;  %1019 = vmatprep.subr.bf16.mxu1 (!%p268_p3), %v1059_v2 }
   0xe   : > { %s1301_s21 = smov (!%p324_p4, %s1079_s21), 3 }
   0xf   : > { %s887_s7 = sshll.u32 %s1301_s21, 6  ;;  %s889_s8 = sshll.u32 %s1301_s21, 7 }
  0x10   : > { %s1157_s10 = scalar_lea.vmem %s1289_s0, %s887_s7  ;;  %s1162_s13 = scalar_lea.vmem %s1292_s3, %s887_s7  ;;  %990 = vmatpush3.bf16.msra.mxu0 %v1059_v2  ;;  %1027 = vmatpush3.bf16.msra.mxu1 %v1059_v2 }
  0x11   : > { %v892_v4 = vld [vmem:[%s1157_s10] sm:$0xff]   ;;  %v955_v18 = vld [vmem:[%s1157_s10 + $0x8] sm:$0xff]   ;;  %991 = vmatprep.subr.bf16.mxu0 %v1060_v3  ;;  %1020 = vmatprep.subr.bf16.mxu1 %v1060_v3  ;;  %v956_v48 = vld [vmem:[%s1157_s10 + $0x10] sm:$0xff]   ;;  %s1241_s11 = scalar_lea.vmem %s1294_s5, %s889_s8 }
  0x12   : > { %v924_v5 = vld [vmem:[%s1162_s13] sm:$0xff]   ;;  %v893_v7 = vunpack.c.l.bf16 %v892_v4  ;;  %v894_v8 = vunpack.c.h.bf16 %v892_v4  ;;  %v962_v19 = vld [vmem:[%s1162_s13 + $0x8] sm:$0xff]   ;;  %v897_v22 = vunpack.c.l.bf16 %v955_v18  ;;  %v898_v23 = vunpack.c.h.bf16 %v955_v18  ;;  %v963_v57 = vld [vmem:[%s1162_s13 + $0x10] sm:$0xff]  }
  0x13   : > { %v925_v9 = vunpack.c.l.bf16 %v924_v5  ;;  %v926_v10 = vunpack.c.h.bf16 %v924_v5  ;;  %v958_v11 = vld [vmem:[%s1157_s10 + $0x20] sm:$0xff]   ;;  %v959_v24 = vld [vmem:[%s1157_s10 + $0x28] sm:$0xff]   ;;  %v929_v28 = vunpack.c.l.bf16 %v962_v19  ;;  %v930_v29 = vunpack.c.h.bf16 %v962_v19  ;;  %v960_v62 = vld [vmem:[%s1157_s10 + $0x30] sm:$0xff]  }
  0x14   : > { %v965_v12 = vld [vmem:[%s1162_s13 + $0x20] sm:$0xff]   ;;  %v909_v14 = vunpack.c.l.bf16 %v958_v11  ;;  %v910_v15 = vunpack.c.h.bf16 %v958_v11  ;;  %v435_v20 = vmul.f32 %v893_v7, %v1172_v6  ;;  %v436_v21 = vmul.f32 %v894_v8, %v1172_v6  ;;  %v966_v30 = vld [vmem:[%s1162_s13 + $0x28] sm:$0xff]   ;;  %992 = vmatpush3.bf16.msra.mxu0 %v1060_v3  ;;  %1028 = vmatpush3.bf16.msra.mxu1 %v1060_v3  ;;  %v967_v4 = vld [vmem:[%s1162_s13 + $0x30] sm:$0xff]  }
  0x15   : > { %v941_v16 = vunpack.c.l.bf16 %v965_v12  ;;  %v942_v17 = vunpack.c.h.bf16 %v965_v12  ;;  %v437_v33 = vmul.f32 %v897_v22, %v1172_v6  ;;  %v438_v34 = vmul.f32 %v898_v23, %v1172_v6  ;;  %993 = vmatprep.subr.bf16.mxu0 %v1061_v25  ;;  %1021 = vmatprep.subr.bf16.mxu1 %v1061_v25 }
  0x16   : > { %v443_v26 = vmul.f32 %v909_v14, %v1172_v6  ;;  %v444_v27 = vmul.f32 %v910_v15, %v1172_v6  ;;  %v458_v31 = vadd.f32 %v1179_v13, %v435_v20  ;;  %v459_v32 = vadd.f32 %v1179_v13, %v436_v21  ;;  %v957_v15 = vld [vmem:[%s1157_s10 + $0x18] sm:$0xff]  }
  0x17   : > { %v913_v37 = vunpack.c.l.bf16 %v959_v24  ;;  %v914_v38 = vunpack.c.h.bf16 %v959_v24  ;;  %v460_v41 = vadd.f32 %v1179_v13, %v437_v33  ;;  %v945_v42 = vunpack.c.l.bf16 %v966_v30  ;;  %v964_v20 = vld [vmem:[%s1162_s13 + $0x18] sm:$0xff]  }
  0x18   : > { %v466_v35 = vadd.f32 %v1179_v13, %v443_v26  ;;  %v467_v36 = vadd.f32 %v1179_v13, %v444_v27  ;;  %v474_v39 = vadd.f32 %v925_v9, %v458_v31  ;;  %v475_v40 = vadd.f32 %v926_v10, %v459_v32  ;;  %994 = vmatpush3.bf16.msra.mxu0 %v1061_v25  ;;  %v1064_v21 = vld [vmem:[%s1293_s4 + $0x38] sm:$0xff]  }
  0x19   : > { %v461_v46 = vadd.f32 %v1179_v13, %v438_v34  ;;  %v946_v47 = vunpack.c.h.bf16 %v966_v30  ;;  %v476_v51 = vadd.f32 %v929_v28, %v460_v41  ;;  %v445_v52 = vmul.f32 %v913_v37, %v1172_v6  ;;  %1029 = vmatpush3.bf16.msra.mxu1 %v1061_v25  ;;  %995 = vmatprep.subr.bf16.mxu0 %v1062_v43  ;;  %v961_v30 = vld [vmem:[%s1157_s10 + $0x38] sm:$0xff]  }
  0x1a   : > { %v482_v44 = vadd.f32 %v941_v16, %v466_v35  ;;  %v483_v45 = vadd.f32 %v942_v17, %v467_v36  ;;  %v490_v49 = vmax.f32 %v474_v39, 0.0  ;;  %v491_v50 = vmax.f32 %v475_v40, 0.0  ;;  %1022 = vmatprep.subr.bf16.mxu1 %v1062_v43  ;;  %v968_v35 = vld [vmem:[%s1162_s13 + $0x38] sm:$0xff]   ;;  %s1254_s13 = scalar_lea.vmem %s1295_s6, %s889_s8 }
  0x1b   : > { %v477_v55 = vadd.f32 %v930_v29, %v461_v46  ;;  %v446_v56 = vmul.f32 %v914_v38, %v1172_v6  ;;  %v492_v59 = vmax.f32 %v476_v51, 0.0  ;;  %v468_v60 = vadd.f32 %v1179_v13, %v445_v52 }
  0x1c   : > { %v498_v53 = vmax.f32 %v482_v44, 0.0  ;;  %v499_v54 = vmax.f32 %v483_v45, 0.0  ;;  %v506_v58 = vpack.c.bf16 %v491_v50, %v490_v49  ;;  %v901_v61 = vunpack.c.l.bf16 %v956_v48  ;;  %996 = vmatpush3.bf16.msra.mxu0 %v1062_v43 }
  0x1d   : > { %v493_v1 = vmax.f32 %v477_v55, 0.0  ;;  %v469_v2 = vadd.f32 %v1179_v13, %v446_v56  ;;  %v902_v3 = vunpack.c.h.bf16 %v956_v48  ;;  %v484_v5 = vadd.f32 %v945_v42, %v468_v60  ;;  %1030 = vmatpush3.bf16.msra.mxu1 %v1062_v43  ;;  %997 = vmatprep.subr.bf16.mxu0 %v1063_v63 }
  0x1e   : > { %v510_v0 = vpack.c.bf16 %v499_v54, %v498_v53  ;;  %1001 = vmatprep.mubr.bf16.mxu0 %v506_v58  ;;  %v933_v7 = vunpack.c.l.bf16 %v963_v57  ;;  %v934_v8 = vunpack.c.h.bf16 %v963_v57  ;;  %v439_v9 = vmul.f32 %v901_v61, %v1172_v6  ;;  %1023 = vmatprep.subr.bf16.mxu1 %v1063_v63 }
  0x1f   : > { %v507_v10 = vpack.c.bf16 %v493_v1, %v492_v59  ;;  %v485_v11 = vadd.f32 %v946_v47, %v469_v2  ;;  %v440_v12 = vmul.f32 %v902_v3, %v1172_v6  ;;  %v917_v14 = vunpack.c.l.bf16 %v960_v62 }
  0x20   : > { %1009 = vmatprep.mubr.bf16.mxu1 %v510_v0  ;;  %v500_v16 = vmax.f32 %v484_v5, 0.0  ;;  %v462_v17 = vadd.f32 %v1179_v13, %v439_v9  ;;  %v918_v18 = vunpack.c.h.bf16 %v960_v62  ;;  %v949_v19 = vunpack.c.l.bf16 %v967_v4  ;;  %998 = vmatpush3.bf16.msra.mxu0 %v1063_v63  ;;  %v683_v5 = vld [vmem:[%s1241_s11 + $0x40] sm:$0xff]  ;;  %v678_v9 = vld [vmem:[%s1241_s11 + $0x18] sm:$0xff] }
  0x21   : > { %v501_v22 = vmax.f32 %v485_v11, 0.0  ;;  %v463_v23 = vadd.f32 %v1179_v13, %v440_v12  ;;  %v950_v24 = vunpack.c.h.bf16 %v967_v4  ;;  %v447_v25 = vmul.f32 %v917_v14, %v1172_v6  ;;  %1031 = vmatpush3.bf16.msra.mxu1 %v1063_v63  ;;  %999 = vmatprep.subr.bf16.mxu0 %v1064_v21  ;;  %v675_v4 = vld [vmem:[%s1241_s11] sm:$0xff] }
  0x22   : > { %v478_v26 = vadd.f32 %v933_v7, %v462_v17  ;;  %v448_v27 = vmul.f32 %v918_v18, %v1172_v6  ;;  %v905_v28 = vunpack.c.l.bf16 %v957_v15  ;;  %v906_v29 = vunpack.c.h.bf16 %v957_v15  ;;  %1024 = vmatprep.subr.bf16.mxu1 %v1064_v21  ;;  %v684_v17 = vld [vmem:[%s1241_s11 + $0x48] sm:$0xff] }
  0x23   : > { %v511_v31 = vpack.c.bf16 %v501_v22, %v500_v16  ;;  %v479_v32 = vadd.f32 %v934_v8, %v463_v23  ;;  %v470_v33 = vadd.f32 %v1179_v13, %v447_v25  ;;  %v937_v34 = vunpack.c.l.bf16 %v964_v20  ;;  %v676_v16 = vld [vmem:[%s1241_s11 + $0x8] sm:$0xff] }
  0x24   : > { %v494_v36 = vmax.f32 %v478_v26, 0.0  ;;  %v471_v37 = vadd.f32 %v1179_v13, %v448_v27  ;;  %v938_v38 = vunpack.c.h.bf16 %v964_v20  ;;  %v441_v39 = vmul.f32 %v905_v28, %v1172_v6  ;;  %1000 = vmatpush3.bf16.msra.mxu0 %v1064_v21 }
  0x25   : > { %v495_v40 = vmax.f32 %v479_v32, 0.0  ;;  %v486_v41 = vadd.f32 %v949_v19, %v470_v33  ;;  %v442_v42 = vmul.f32 %v906_v29, %v1172_v6  ;;  %v921_v43 = vunpack.c.l.bf16 %v961_v30  ;;  %1032 = vmatpush3.bf16.msra.mxu1 %v1064_v21 }
  0x26   : > { %v487_v44 = vadd.f32 %v950_v24, %v471_v37  ;;  %v464_v45 = vadd.f32 %v1179_v13, %v441_v39  ;;  %v922_v46 = vunpack.c.h.bf16 %v961_v30  ;;  %v953_v47 = vunpack.c.l.bf16 %v968_v35  ;;  %v689_v37 = vld [vmem:[%s1241_s11 + $0x70] sm:$0xff]  ;;  %v687_v39 = vld [vmem:[%s1241_s11 + $0x60] sm:$0xff] }
  0x27   : > { %v508_v48 = vpack.c.bf16 %v495_v40, %v494_v36  ;;  %v502_v49 = vmax.f32 %v486_v41, 0.0  ;;  %v465_v50 = vadd.f32 %v1179_v13, %v442_v42  ;;  %v954_v51 = vunpack.c.h.bf16 %v968_v35  ;;  %1002 = vmatmul.mubr.bf16.vlgmr.msra.gmra.mrb[0].mxu0 %v507_v10  ;;  %v686_v10 = vld [vmem:[%s1241_s11 + $0x58] sm:$0xff]  ;;  %v681_v36 = vld [vmem:[%s1241_s11 + $0x30] sm:$0xff] }
  0x28   : > { %v503_v52 = vmax.f32 %v487_v44, 0.0  ;;  %v480_v53 = vadd.f32 %v937_v34, %v464_v45  ;;  %v449_v54 = vmul.f32 %v921_v43, %v1172_v6  ;;  %v450_v55 = vmul.f32 %v922_v46, %v1172_v6  ;;  %1010 = vmatmul.mubr.bf16.vlgmr.msra.gmra.mrb[0].mxu1 %v511_v31  ;;  %v677_v6 = vld [vmem:[%s1241_s11 + $0x10] sm:$0xff]  ;;  %v682_v42 = vld [vmem:[%s1241_s11 + $0x38] sm:$0xff] }
  0x29   : > { %v481_v56 = vadd.f32 %v938_v38, %v465_v50  ;;  %1005 = vmatprep.mubr.bf16.mxu0 %v508_v48  ;;  %v679_v38 = vld [vmem:[%s1241_s11 + $0x20] sm:$0xff]  ;;  %v690_v43 = vld [vmem:[%s1241_s11 + $0x78] sm:$0xff]  ;;  %v680_v48 = vld [vmem:[%s1241_s11 + $0x28] sm:$0xff] }
  0x2a   : > { %v512_v57 = vpack.c.bf16 %v503_v52, %v502_v49  ;;  %v472_v58 = vadd.f32 %v1179_v13, %v449_v54  ;;  %v473_v59 = vadd.f32 %v1179_v13, %v450_v55  ;;  %v496_v60 = vmax.f32 %v480_v53, 0.0  ;;  %v685_v13 = vld [vmem:[%s1241_s11 + $0x50] sm:$0xff]  ;;  %v688_v49 = vld [vmem:[%s1241_s11 + $0x68] sm:$0xff] }
  0x2b   : > { %v497_v61 = vmax.f32 %v481_v56, 0.0 }
  0x2c   : > { %1013 = vmatprep.mubr.bf16.mxu1 %v512_v57  ;;  %v488_v62 = vadd.f32 %v953_v47, %v472_v58  ;;  %v489_v63 = vadd.f32 %v954_v51, %v473_v59 }
  0x2d   : > { %v509_v2 = vpack.c.bf16 %v497_v61, %v496_v60 }
  0x2e   : > { %v504_v0 = vmax.f32 %v488_v62, 0.0  ;;  %v505_v1 = vmax.f32 %v489_v63, 0.0 }
  0x2f   : > { %1006 = vmatmul.mubr.bf16.gmra.mrb[4].mxu0 %v509_v2 }
  0x30   : > { %v513_v3 = vpack.c.bf16 %v505_v1, %v504_v0 }
  0x32   : > { %1014 = vmatmul.mubr.bf16.gmra.mrb[4].mxu1 %v513_v3 }
  0xfa   : > { %v1003_v7 = vpop.f32.mrb[0].mxu0 }
  0xfb   : > { %v1011_v8 = vpop.f32.mrb[0].mxu1  ;;  %v693_v11 = vadd.f32 %v1003_v7, %v677_v6  ;;  %v612_v14 = vpop.f32.mrb[1].mxu0 }
  0xfc   : > { %v701_v12 = vadd.f32 %v1011_v8, %v685_v13  ;;  %v644_v15 = vpop.f32.mrb[1].mxu1  ;;  %v691_v18 = vadd.f32 %v675_v4, %v612_v14  ;;  %v1004_v20 = vpop.f32.mrb[2].mxu0 }
  0xfd   : > { %v699_v19 = vadd.f32 %v683_v5, %v644_v15  ;;  %v1012_v21 = vpop.f32.mrb[2].mxu1  ;;  %v709_v22 = vmax.f32 %v693_v11, 0.0  ;;  %v694_v24 = vadd.f32 %v1004_v20, %v678_v9  ;;  %v615_v26 = vpop.f32.mrb[3].mxu0 }
  0xfe   : > { %v717_v23 = vmax.f32 %v701_v12, 0.0  ;;  %v702_v25 = vadd.f32 %v1012_v21, %v686_v10  ;;  %v647_v27 = vpop.f32.mrb[3].mxu1  ;;  %v707_v28 = vmax.f32 %v691_v18, 0.0  ;;  %v692_v30 = vadd.f32 %v676_v16, %v615_v26 }
  0xff   : > { %v715_v29 = vmax.f32 %v699_v19, 0.0  ;;  %v700_v31 = vadd.f32 %v684_v17, %v647_v27  ;;  %725 = vst [vmem:[%s1254_s13 + $0x10] sm:$0xff] %v709_v22  ;;  %v710_v32 = vmax.f32 %v694_v24, 0.0 }
 0x100   : > { %733 = vst [vmem:[%s1254_s13 + $0x50] sm:$0xff] %v717_v23  ;;  %v718_v33 = vmax.f32 %v702_v25, 0.0  ;;  %723 = vst [vmem:[%s1254_s13] sm:$0xff] %v707_v28  ;;  %v708_v34 = vmax.f32 %v692_v30, 0.0 }
 0x101   : > { %731 = vst [vmem:[%s1254_s13 + $0x40] sm:$0xff] %v715_v29  ;;  %v716_v35 = vmax.f32 %v700_v31, 0.0  ;;  %726 = vst [vmem:[%s1254_s13 + $0x18] sm:$0xff] %v710_v32 }
 0x102   : > { %734 = vst [vmem:[%s1254_s13 + $0x58] sm:$0xff] %v718_v33  ;;  %724 = vst [vmem:[%s1254_s13 + $0x8] sm:$0xff] %v708_v34  ;;  %v1007_v40 = vpop.f32.mrb[4].mxu0 }
 0x103   : > { %732 = vst [vmem:[%s1254_s13 + $0x48] sm:$0xff] %v716_v35  ;;  %v697_v44 = vadd.f32 %v1007_v40, %v681_v36  ;;  %v628_v46 = vpop.f32.mrb[5].mxu0 }
 0x104   : > { %v695_v50 = vadd.f32 %v679_v38, %v628_v46  ;;  %v1008_v52 = vpop.f32.mrb[6].mxu0 }
 0x105   : > { %v1015_v41 = vpop.f32.mrb[4].mxu1  ;;  %v713_v54 = vmax.f32 %v697_v44, 0.0  ;;  %v698_v56 = vadd.f32 %v1008_v52, %v682_v42  ;;  %v631_v58 = vpop.f32.mrb[7].mxu0 }
 0x106   : > { %v705_v45 = vadd.f32 %v1015_v41, %v689_v37  ;;  %v660_v47 = vpop.f32.mrb[5].mxu1  ;;  %v711_v60 = vmax.f32 %v695_v50, 0.0  ;;  %v696_v62 = vadd.f32 %v680_v48, %v631_v58 }
 0x107   : > { %v703_v51 = vadd.f32 %v687_v39, %v660_v47  ;;  %v1016_v53 = vpop.f32.mrb[6].mxu1  ;;  %729 = vst [vmem:[%s1254_s13 + $0x30] sm:$0xff] %v713_v54  ;;  %v714_v0 = vmax.f32 %v698_v56, 0.0 }
 0x108   : > { %v721_v55 = vmax.f32 %v705_v45, 0.0  ;;  %v706_v57 = vadd.f32 %v1016_v53, %v690_v43  ;;  %v663_v59 = vpop.f32.mrb[7].mxu1  ;;  %727 = vst [vmem:[%s1254_s13 + $0x20] sm:$0xff] %v711_v60  ;;  %v712_v2 = vmax.f32 %v696_v62, 0.0 }
 0x109   : > { %v719_v61 = vmax.f32 %v703_v51, 0.0  ;;  %v704_v63 = vadd.f32 %v688_v49, %v663_v59  ;;  %730 = vst [vmem:[%s1254_s13 + $0x38] sm:$0xff] %v714_v0 }
 0x10a   : > { %737 = vst [vmem:[%s1254_s13 + $0x70] sm:$0xff] %v721_v55  ;;  %v722_v1 = vmax.f32 %v706_v57, 0.0  ;;  %728 = vst [vmem:[%s1254_s13 + $0x28] sm:$0xff] %v712_v2 }
 0x10b   : > { %735 = vst [vmem:[%s1254_s13 + $0x60] sm:$0xff] %v719_v61  ;;  %v720_v3 = vmax.f32 %v704_v63, 0.0 }
 0x10c   : > { %738 = vst [vmem:[%s1254_s13 + $0x78] sm:$0xff] %v722_v1 }
 0x10d   : > { %736 = vst [vmem:[%s1254_s13 + $0x68] sm:$0xff] %v720_v3 }
 0x10e PF: > { %s16_s23 = sadd.s32 1, %s1087_s23   ;;  %s1296_s21 = smov %s1083_s22 }
 0x10f   : > { %p13_p5 = scmp.ge.s32.totalorder %s16_s23, 6   ;;  %s1297_s22 = smov %s1299_s24 }
 0x111   :  { %15 = sbr.rel (!%p13_p5) target bundleno = 2 (0x2), region = 80 }

// kernel: res_disparity_refinement_forward.30
= control target key start
LH: loop header
LB: loop body
LE: loop exit
PB: predicated region body
PF: predicated region fallthrough
CT: control target
= control target key end

     0   :  { %s1043_s15 = smov 0   ;;  %s1045_s16 = smov 0   ;;  %s1146_s0 = inlined_call_operand.vmem [shape: bf16[128,128], index: 0, kind: input, shape index: {}]   ;;  %s1147_s1 = inlined_call_operand.vmem [shape: bf16[4,128,128], index: 1, kind: input, shape index: {}]   ;;  %s1148_s2 = inlined_call_operand.vmem [shape: bf16[4,128,128], index: 2, kind: output, shape index: {0}]   ;;  %s1149_s3 = inlined_call_operand.vmem [shape: f32[1,1,128], index: 3, kind: output, shape index: {1}]   ;;  %s1150_s4 = inlined_call_operand.vmem [shape: f32[1,1,128], index: 4, kind: output, shape index: {2}]  }
   0x1   :  { %s1047_s17 = smov 0  }
   0x2 LB: > { %s24_s18 = sadd.s32 1, %s1011_s16  ;;  %p781_p0 = scmp.ge.s32.totalorder %s1015_s17, 1  ;;  %s1015_s17 = sphi %s1047_s17, %s15_s17   ;;  %s1011_s16 = sphi %s1045_s16, %s1152_s16   ;;  %s1007_s15 = sphi %s1043_s15, %s1151_s15  }
   0x3   : > { %p25_p1 = scmp.ge.s32.totalorder %s24_s18, 4  ;;  %p192_p2 = scmp.lt.s32.totalorder %s1015_s17, 5 }
   0x5   : > { %s1154_s18 = smov (%p25_p1, %s24_s18), 0  ;;  %p193_p3 = pnand %p781_p0, %p192_p2 }
   0x6   : > { %p239_p4 = scmp.lt.s32.totalorder (!%p193_p3), %s1007_s15, 3  ;;  %v985_v0 = vld [vmem:[%s1146_s0] sm:$0xff] (!%p193_p3)   ;;  %v987_v10 = vld [vmem:[%s1146_s0 + $0x8] sm:$0xff] (!%p193_p3)   ;;  %v989_v12 = vld [vmem:[%s1146_s0 + $0x10] sm:$0xff] (!%p193_p3)   ;;  %p818_p5 = scmp.ne.s32.totalorder (!%p193_p3), %s1007_s15, 0 }
   0x7   : > { %196 = sbr.rel (%p193_p3) target bundleno = 324 (0x144), region = 28  ;;  %v986_v1 = vld [vmem:[%s1146_s0 + $0x20] sm:$0xff] (!%p193_p3)   ;;  %920 = vmatprep.mubr.bf16.mxu0 (!%p193_p3), %v985_v0  ;;  %v988_v11 = vld [vmem:[%s1146_s0 + $0x28] sm:$0xff] (!%p193_p3)   ;;  %v990_v13 = vld [vmem:[%s1146_s0 + $0x30] sm:$0xff] (!%p193_p3)  }
   0x8   : > { %928 = vmatprep.mubr.bf16.mxu1 (!%p193_p3), %v986_v1  ;;  %v991_v14 = vld [vmem:[%s1146_s0 + $0x18] sm:$0xff] (!%p193_p3)  }
   0x9   : > { %v992_v15 = vld [vmem:[%s1146_s0 + $0x38] sm:$0xff] (!%p193_p3)  }
   0xe   : > { %s1071_s23 = scalar_select %p239_p4, %s1007_s15, 3 }
   0xf   : > { %v1017_v40 = vmov (!%p818_p5), 0.0  }
  0x10   : > { %s823_s24 = sshll.u32 %s1071_s23, 6  ;;  %570 = vst [vmem:[%s1149_s3] sm:$0x1] (!%p818_p5), %v1017_v40  ;;  %571 = vst [vmem:[%s1150_s4] sm:$0x1] (!%p818_p5), %v1017_v40 }
  0x11   : > { %s1079_s27 = scalar_lea.vmem %s1147_s1, %s823_s24  ;;  %s252_s20 = scalar_lea.vmem %s1148_s2, %s823_s24 }
  0x12   : > { %v977_v2 = vld [vmem:[%s1079_s27] sm:$0xff]   ;;  %v978_v3 = vld [vmem:[%s1079_s27 + $0x8] sm:$0xff]   ;;  %v979_v4 = vld [vmem:[%s1079_s27 + $0x10] sm:$0xff]  }
  0x13   : > { %904 = vmatprep.subr.bf16.mxu0 %v977_v2  ;;  %936 = vmatprep.subr.bf16.mxu1 %v977_v2  ;;  %v980_v5 = vld [vmem:[%s1079_s27 + $0x18] sm:$0xff]   ;;  %v981_v6 = vld [vmem:[%s1079_s27 + $0x20] sm:$0xff]   ;;  %v982_v7 = vld [vmem:[%s1079_s27 + $0x28] sm:$0xff]  }
  0x14   : > { %905 = vmatpush3.bf16.msra.mxu0 %v977_v2  ;;  %944 = vmatpush3.bf16.msra.mxu1 %v977_v2  ;;  %v983_v8 = vld [vmem:[%s1079_s27 + $0x30] sm:$0xff]   ;;  %v984_v9 = vld [vmem:[%s1079_s27 + $0x38] sm:$0xff]  }
  0x15   : > { %906 = vmatprep.subr.bf16.mxu0 %v978_v3  ;;  %937 = vmatprep.subr.bf16.mxu1 %v978_v3 }
  0x18   : > { %907 = vmatpush3.bf16.msra.mxu0 %v978_v3  ;;  %945 = vmatpush3.bf16.msra.mxu1 %v978_v3 }
  0x19   : > { %908 = vmatprep.subr.bf16.mxu0 %v979_v4  ;;  %938 = vmatprep.subr.bf16.mxu1 %v979_v4 }
  0x1c   : > { %909 = vmatpush3.bf16.msra.mxu0 %v979_v4  ;;  %946 = vmatpush3.bf16.msra.mxu1 %v979_v4 }
  0x1d   : > { %910 = vmatprep.subr.bf16.mxu0 %v980_v5  ;;  %939 = vmatprep.subr.bf16.mxu1 %v980_v5 }
  0x20   : > { %911 = vmatpush3.bf16.msra.mxu0 %v980_v5  ;;  %947 = vmatpush3.bf16.msra.mxu1 %v980_v5 }
  0x21   : > { %912 = vmatprep.subr.bf16.mxu0 %v981_v6  ;;  %940 = vmatprep.subr.bf16.mxu1 %v981_v6 }
  0x24   : > { %913 = vmatpush3.bf16.msra.mxu0 %v981_v6  ;;  %948 = vmatpush3.bf16.msra.mxu1 %v981_v6 }
  0x25   : > { %914 = vmatprep.subr.bf16.mxu0 %v982_v7  ;;  %941 = vmatprep.subr.bf16.mxu1 %v982_v7 }
  0x28   : > { %915 = vmatpush3.bf16.msra.mxu0 %v982_v7  ;;  %949 = vmatpush3.bf16.msra.mxu1 %v982_v7 }
  0x29   : > { %916 = vmatprep.subr.bf16.mxu0 %v983_v8  ;;  %942 = vmatprep.subr.bf16.mxu1 %v983_v8 }
  0x2c   : > { %917 = vmatpush3.bf16.msra.mxu0 %v983_v8  ;;  %950 = vmatpush3.bf16.msra.mxu1 %v983_v8 }
  0x2d   : > { %918 = vmatprep.subr.bf16.mxu0 %v984_v9  ;;  %943 = vmatprep.subr.bf16.mxu1 %v984_v9 }
  0x30   : > { %919 = vmatpush3.bf16.msra.mxu0 %v984_v9  ;;  %951 = vmatpush3.bf16.msra.mxu1 %v984_v9 }
  0x33   : > { %921 = vmatmul.mubr.bf16.vlgmr.msra.gmra.mrb[0].mxu0 %v987_v10  ;;  %929 = vmatmul.mubr.bf16.vlgmr.msra.gmra.mrb[0].mxu1 %v988_v11 }
  0x34   : > { %924 = vmatprep.mubr.bf16.mxu0 %v989_v12  ;;  %932 = vmatprep.mubr.bf16.mxu1 %v990_v13 }
  0x3b   : > { %925 = vmatmul.mubr.bf16.gmra.mrb[4].mxu0 %v991_v14  ;;  %933 = vmatmul.mubr.bf16.gmra.mrb[4].mxu1 %v992_v15 }
 0x106   : > { %v922_v16 = vpop.f32.mrb[0].mxu0  ;;  %v1107_v17 = vpop.f32.mrb[0].mxu1 }
 0x107   : > { %v423_v18 = vpop.f32.mrb[1].mxu0  ;;  %v455_v19 = vpop.f32.mrb[1].mxu1 }
 0x108   : > { %v923_v20 = vpop.f32.mrb[2].mxu0  ;;  %v931_v21 = vpop.f32.mrb[2].mxu1 }
 0x109   : > { %v849_v22 = vpack.c.bf16 %v923_v20, %v922_v16  ;;  %v869_v23 = vpack.c.bf16 %v931_v21, %v1107_v17  ;;  %v426_v24 = vpop.f32.mrb[3].mxu0  ;;  %v458_v25 = vpop.f32.mrb[3].mxu1 }
 0x10a   : > { %v844_v26 = vpack.c.bf16 %v426_v24, %v423_v18  ;;  %v864_v27 = vpack.c.bf16 %v458_v25, %v455_v19 }
 0x10b   : > { %881 = vst [vmem:[%s252_s20 + $0x8] sm:$0xff] %v849_v22   ;;  %885 = vst [vmem:[%s252_s20 + $0x28] sm:$0xff] %v869_v23  }
 0x10c   : > { %845 = vst [vmem:[%s252_s20] sm:$0xff] %v844_v26   ;;  %884 = vst [vmem:[%s252_s20 + $0x20] sm:$0xff] %v864_v27  }
 0x10e   : > { %v926_v28 = vpop.f32.mrb[4].mxu0  ;;  %v934_v29 = vpop.f32.mrb[4].mxu1  ;;  %569 = sbr.rel (%p818_p5) target bundleno = 277 (0x115), region = 32 }
 0x10f   : > { %v439_v30 = vpop.f32.mrb[5].mxu0  ;;  %v471_v31 = vpop.f32.mrb[5].mxu1 }
 0x110   : > { %v927_v32 = vpop.f32.mrb[6].mxu0  ;;  %v935_v33 = vpop.f32.mrb[6].mxu1 }
 0x111   : > { %v859_v34 = vpack.c.bf16 %v927_v32, %v926_v28  ;;  %v879_v35 = vpack.c.bf16 %v935_v33, %v934_v29  ;;  %v442_v36 = vpop.f32.mrb[7].mxu0  ;;  %v474_v37 = vpop.f32.mrb[7].mxu1 }
 0x112   : > { %v854_v38 = vpack.c.bf16 %v442_v36, %v439_v30  ;;  %v874_v39 = vpack.c.bf16 %v474_v37, %v471_v31 }
 0x113   : > { %883 = vst [vmem:[%s252_s20 + $0x18] sm:$0xff] %v859_v34   ;;  %887 = vst [vmem:[%s252_s20 + $0x38] sm:$0xff] %v879_v35  }
 0x114   : > { %882 = vst [vmem:[%s252_s20 + $0x10] sm:$0xff] %v854_v38   ;;  %886 = vst [vmem:[%s252_s20 + $0x30] sm:$0xff] %v874_v39  }
 0x115 PF: > { %v573_v41 = vadd.f32 %v426_v24, %v423_v18  ;;  %v597_v42 = vmul.f32 %v423_v18, %v423_v18  ;;  %v598_v43 = vmul.f32 %v426_v24, %v426_v24  ;;  %v599_v45 = vmul.f32 %v922_v16, %v922_v16 }
 0x116   : > { %v600_v47 = vmul.f32 %v923_v20, %v923_v20  ;;  %v601_v50 = vmul.f32 %v439_v30, %v439_v30  ;;  %v602_v53 = vmul.f32 %v442_v36, %v442_v36  ;;  %v603_v56 = vmul.f32 %v926_v28, %v926_v28 }
 0x117   : > { %v574_v44 = vadd.f32 %v922_v16, %v573_v41  ;;  %v613_v48 = vadd.f32 %v598_v43, %v597_v42  ;;  %v604_v59 = vmul.f32 %v927_v32, %v927_v32  ;;  %v605_v62 = vmul.f32 %v455_v19, %v455_v19 }
 0x118   : > { %v606_v1 = vmul.f32 %v458_v25, %v458_v25  ;;  %v607_v4 = vmul.f32 %v1107_v17, %v1107_v17  ;;  %v608_v7 = vmul.f32 %v931_v21, %v931_v21  ;;  %v609_v10 = vmul.f32 %v471_v31, %v471_v31 }
 0x119   : > { %v575_v46 = vadd.f32 %v923_v20, %v574_v44  ;;  %v614_v51 = vadd.f32 %v613_v48, %v599_v45  ;;  %v610_v13 = vmul.f32 %v474_v37, %v474_v37  ;;  %v611_v16 = vmul.f32 %v934_v29, %v934_v29 }
 0x11a   : > { %v612_v20 = vmul.f32 %v935_v33, %v935_v33 }
 0x11b   : > { %v576_v49 = vadd.f32 %v575_v46, %v439_v30  ;;  %v615_v54 = vadd.f32 %v614_v51, %v600_v47 }
 0x11d   : > { %v577_v52 = vadd.f32 %v576_v49, %v442_v36  ;;  %v616_v57 = vadd.f32 %v615_v54, %v601_v50 }
 0x11f   : > { %v578_v55 = vadd.f32 %v926_v28, %v577_v52  ;;  %v617_v60 = vadd.f32 %v616_v57, %v602_v53 }
 0x121   : > { %v579_v58 = vadd.f32 %v927_v32, %v578_v55  ;;  %v618_v63 = vadd.f32 %v617_v60, %v603_v56  ;;  %v572_v32 = vld [vmem:[%s1149_s3] sm:$0x1] }
 0x123   : > { %v580_v61 = vadd.f32 %v579_v58, %v455_v19  ;;  %v619_v2 = vadd.f32 %v618_v63, %v604_v59 }
 0x125   : > { %v581_v0 = vadd.f32 %v580_v61, %v458_v25  ;;  %v620_v5 = vadd.f32 %v619_v2, %v605_v62 }
 0x127   : > { %v582_v3 = vadd.f32 %v1107_v17, %v581_v0  ;;  %v621_v8 = vadd.f32 %v620_v5, %v606_v1 }
 0x129   : > { %v583_v6 = vadd.f32 %v931_v21, %v582_v3  ;;  %v622_v11 = vadd.f32 %v621_v8, %v607_v4 }
 0x12b   : > { %v584_v9 = vadd.f32 %v583_v6, %v471_v31  ;;  %v623_v14 = vadd.f32 %v622_v11, %v608_v7 }
 0x12d   : > { %v585_v12 = vadd.f32 %v584_v9, %v474_v37  ;;  %v624_v18 = vadd.f32 %v623_v14, %v609_v10 }
 0x12f   : > { %v586_v15 = vadd.f32 %v934_v29, %v585_v12  ;;  %v625_v22 = vadd.f32 %v624_v18, %v610_v13 }
 0x131   : > { %v587_v19 = vadd.f32 %v935_v33, %v586_v15  ;;  %v626_v24 = vadd.f32 %v625_v22, %v611_v16  ;;  %v596_v33 = vld [vmem:[%s1150_s4] sm:$0x1] }
 0x133   : > { %v588_v23 = vrot.slane %v587_v19, 4  ;;  %v627_v17 = vadd.f32 %v626_v24, %v612_v20 }
 0x135   : > { %v589_v25 = vadd.f32 %v588_v23, %v587_v19  ;;  %v628_v27 = vrot.slane %v627_v17, 4 }
 0x137   : > { %v590_v26 = vrot.slane %v589_v25, 2  ;;  %v629_v28 = vadd.f32 %v628_v27, %v627_v17 }
 0x139   : > { %v591_v21 = vadd.f32 %v590_v26, %v589_v25  ;;  %v630_v31 = vrot.slane %v629_v28, 2 }
 0x13b   : > { %v592_v30 = vrot.slane %v591_v21, 1  ;;  %v631_v29 = vadd.f32 %v630_v31, %v629_v28 }
 0x13d   : > { %v593_v34 = vadd.f32 %v592_v30, %v591_v21  ;;  %v632_v36 = vrot.slane %v631_v29, 1 }
 0x13f   : > { %v594_v35 = vadd.f32 %v593_v34, %v572_v32  ;;  %v633_v37 = vadd.f32 %v632_v36, %v631_v29 }
 0x141   : > { %595 = vst [vmem:[%s1149_s3] sm:$0x1] %v594_v35  ;;  %v634_v38 = vadd.f32 %v633_v37, %v596_v33 }
 0x143   : > { %635 = vst [vmem:[%s1150_s4] sm:$0x1] %v634_v38 }
 0x144 PF: > { %s15_s17 = sadd.s32 1, %s1015_s17   ;;  %s1151_s15 = smov %s1011_s16 }
 0x145   : > { %p12_p6 = scmp.ge.s32.totalorder %s15_s17, 6   ;;  %s1152_s16 = smov %s1154_s18 }
 0x147   :  { %14 = sbr.rel (!%p12_p6) target bundleno = 2 (0x2), region = 89 }

</bundles_post_ra>
